<compile_context>
chip_gen: v7x
topology: tpu7x:2x2x1
jax: 0.10.0
libtpu: 0.0.40
codegen_flags: <defaults>
</compile_context>

<pallas_src>
import functools
import numpy as np
import jax
import jax.numpy as jnp
from jax.experimental import pallas as pl
from jax.experimental.pallas import tpu as pltpu

_VMEM = pl.BlockSpec(memory_space=pltpu.MemorySpace.VMEM)


def _row_tile(m, cap=512):
    """Largest row tile <= cap dividing m (multiple of 8 when actually tiling)."""
    if m <= cap:
        return m
    for t in range(cap - cap % 8, 7, -8):
        if m % t == 0:
            return t
    return m


# ----------------------------- elementwise helpers ---------------------------

def _erf_f32(x):
    # Abramowitz & Stegun 7.1.26, |err| < 1.5e-7 (fp32-level exact erf).
    a1, a2, a3, a4, a5 = (0.254829592, -0.284496736, 1.421413741,
                          -1.453152027, 1.061405429)
    p = 0.3275911
    ax = jnp.abs(x)
    t = 1.0 / (1.0 + p * ax)
    poly = ((((a5 * t + a4) * t + a3) * t + a2) * t + a1) * t
    y = 1.0 - poly * jnp.exp(-ax * ax)
    return jnp.where(x >= 0.0, y, -y)


def _gelu_exact(x):
    return 0.5 * x * (1.0 + _erf_f32(x * 0.7071067811865476))


def _apply_act(y, act):
    if act == "relu":
        return jnp.maximum(y, 0.0)
    if act == "gelu":
        return _gelu_exact(y)
    return y


# --------------------------------- kernels -----------------------------------

def _matmul_bias_kernel(x_ref, w_ref, b_ref, o_ref, *, act):
    y = jnp.dot(x_ref[...], w_ref[...], preferred_element_type=jnp.float32)
    y = y + b_ref[...]
    o_ref[...] = _apply_act(y, act).astype(o_ref.dtype)


def _ln_relu_conv3x3_kernel(*refs, eps=1e-5, residual=False):
    # Fused: CNNLayerNorm(nfeats) -> ReLU -> (dropout=id) -> 3x3/s1/p1 conv
    # (+ residual add for the second conv of a ResidualCNN block).
    if residual:
        x_ref, g_ref, be_ref, w_ref, b_ref, r_ref, o_ref = refs
    else:
        x_ref, g_ref, be_ref, w_ref, b_ref, o_ref = refs
        r_ref = None
    x = x_ref[0].astype(jnp.float32)                 # (H, W, C) one batch image
    H, W, C = x.shape
    # LayerNorm over the nfeats (H) axis per (w, c) -- leading-axis reduction,
    # so compute and stores stay lane-dense over (W, C).
    mu = jnp.mean(x, axis=0, keepdims=True)
    var = jnp.mean(jnp.square(x - mu), axis=0, keepdims=True)
    y = (x - mu) * jax.lax.rsqrt(var + eps)
    y = y * g_ref[...] + be_ref[...]                 # affine, per-h gamma/beta
    y = jnp.maximum(y, 0.0)                          # ReLU
    # zero pad (kernel=3, pad=1) AFTER the activation, inside the kernel.
    zr = jnp.zeros((1, W, C), jnp.float32)
    yp = jnp.concatenate([zr, y, zr], axis=0)        # (H+2, W, C)
    zc = jnp.zeros((H + 2, 1, C), jnp.float32)
    yp = jnp.concatenate([zc, yp, zc], axis=1)       # (H+2, W+2, C)
    # in-kernel im2col -> one MXU matmul (K = 9*C)
    parts = [yp[kh:kh + H, kw:kw + W, :] for kh in range(3) for kw in range(3)]
    patches = jnp.concatenate(parts, axis=-1)        # (H, W, 9C)
    a = patches.reshape(H * W, 9 * C)
    out = jnp.dot(a, w_ref[...], preferred_element_type=jnp.float32)
    out = out + b_ref[...]
    cout = w_ref.shape[1]
    out = out.reshape(H, W, cout)
    if r_ref is not None:
        out = out + r_ref[0].astype(jnp.float32)
    o_ref[0] = out.astype(o_ref.dtype)


def _bigru_kernel(x_ref, g_ref, be_ref, wih_ref, whh_ref, bih_ref, bhh_ref,
                  of_ref, ob_ref, gi_scr, *, eps=1e-5):
    # x_ref: (L, N, D) seq-major.  wih_ref: (D, 6H) [fwd r,z,n | bwd r,z,n],
    # whh_ref: (2, H, 3H), bih_ref: (1, 6H), bhh_ref: (2, 1, 3H).
    # Outputs: of_ref/ob_ref (L, N, H) -- direction-major, lane-dense stores.
    L, N, D = x_ref.shape
    H = whh_ref.shape[1]
    f32 = jnp.float32

    # Fused LayerNorm + GELU over the feature axis.
    x = x_ref[...].reshape(L * N, D).astype(f32)
    mu = jnp.mean(x, axis=-1, keepdims=True)
    var = jnp.mean(jnp.square(x - mu), axis=-1, keepdims=True)
    xn = (x - mu) * jax.lax.rsqrt(var + eps)
    xn = xn * g_ref[...] + be_ref[...]
    xn = _gelu_exact(xn)

    # One input projection for BOTH directions: (L*N, D) @ (D, 6H).
    gi = jnp.dot(xn, wih_ref[...], preferred_element_type=f32) + bih_ref[...]
    gi_scr[...] = gi.reshape(L, N, 6 * H)
    # TODO(synk): for production L (~1000) x H (~512), chunk gi through VMEM
    # with a double-buffered time-block pipeline instead of whole-array scratch.

    whh_f = whh_ref[0]
    whh_b = whh_ref[1]
    bhh_f = bhh_ref[0]
    bhh_b = bhh_ref[1]

    def gru_cell(gx, h, whh, bhh):
        # PyTorch GRU gate order [r, z, n].
        gh = jnp.dot(h, whh, preferred_element_type=f32) + bhh
        r = jax.nn.sigmoid(gx[:, 0:H] + gh[:, 0:H])
        z = jax.nn.sigmoid(gx[:, H:2 * H] + gh[:, H:2 * H])
        n = jnp.tanh(gx[:, 2 * H:3 * H] + r * gh[:, 2 * H:3 * H])
        return (1.0 - z) * n + z * h

    def step(t, carry):
        h_f, h_b = carry                      # hidden states live in registers
        tb = L - 1 - t
        gx_f = gi_scr[t][:, 0:3 * H]
        gx_b = gi_scr[tb][:, 3 * H:6 * H]
        h_f = gru_cell(gx_f, h_f, whh_f, bhh_f)
        h_b = gru_cell(gx_b, h_b, whh_b, bhh_b)
        of_ref[pl.ds(t, 1)] = h_f[None].astype(of_ref.dtype)
        ob_ref[pl.ds(tb, 1)] = h_b[None].astype(ob_ref.dtype)
        return (h_f, h_b)

    h0 = jnp.zeros((N, H), f32)
    jax.lax.fori_loop(0, L, step, (h0, h0))


def _classifier_kernel(x_ref, w1_ref, b1_ref, w2_ref, b2_ref, o_ref):
    # Fused Linear -> ReLU -> (dropout=id) -> Linear -> log_softmax.
    h = jnp.dot(x_ref[...], w1_ref[...], preferred_element_type=jnp.float32)
    h = jnp.maximum(h + b1_ref[...], 0.0)
    z = jnp.dot(h, w2_ref[...], preferred_element_type=jnp.float32) + b2_ref[...]
    m = jnp.max(z, axis=-1, keepdims=True)
    s = z - m
    lse = jnp.log(jnp.sum(jnp.exp(s), axis=-1, keepdims=True))
    o_ref[...] = (s - lse).astype(o_ref.dtype)


# --------------------------------- wrappers -----------------------------------

def linear(x2d, w_t, b, act="none"):
    m, k = x2d.shape
    n = w_t.shape[1]
    tm = _row_tile(m)
    return pl.pallas_call(
        functools.partial(_matmul_bias_kernel, act=act),
        out_shape=jax.ShapeDtypeStruct((m, n), jnp.float32),
        grid=(m // tm,),
        in_specs=[pl.BlockSpec((tm, k), lambda i: (i, 0)),
                  pl.BlockSpec((k, n), lambda i: (0, 0)),
                  pl.BlockSpec((1, n), lambda i: (0, 0))],
        out_specs=pl.BlockSpec((tm, n), lambda i: (i, 0)),
        compiler_params=pltpu.CompilerParams(
            dimension_semantics=("parallel",)),
    )(x2d, w_t, b.reshape(1, n))


def ln_relu_conv3x3(x, gamma, beta, w, b, residual=None):
    # x: NHWC (B, H, W, Cin); w: (Cout, Cin, 3, 3); gamma/beta: (H,)
    B, H, W, Cin = x.shape
    Cout = w.shape[0]
    w_t = w.transpose(2, 3, 1, 0).reshape(9 * Cin, Cout)   # rows: (kh, kw, cin)
    g3 = jnp.broadcast_to(gamma.reshape(H, 1, 1), (H, 1, Cin))
    b3 = jnp.broadcast_to(beta.reshape(H, 1, 1), (H, 1, Cin))
    in_specs = [
        pl.BlockSpec((1, H, W, Cin), lambda i: (i, 0, 0, 0)),
        pl.BlockSpec((H, 1, Cin), lambda i: (0, 0, 0)),
        pl.BlockSpec((H, 1, Cin), lambda i: (0, 0, 0)),
        pl.BlockSpec((9 * Cin, Cout), lambda i: (0, 0)),
        pl.BlockSpec((1, Cout), lambda i: (0, 0)),
    ]
    args = [x, g3, b3, w_t, b.reshape(1, Cout)]
    if residual is not None:
        in_specs.append(pl.BlockSpec((1, H, W, Cout), lambda i: (i, 0, 0, 0)))
        args.append(residual)
    # TODO(synk): for production-length time axes also tile W (with 1-px halo).
    return pl.pallas_call(
        functools.partial(_ln_relu_conv3x3_kernel,
                          residual=residual is not None),
        out_shape=jax.ShapeDtypeStruct((B, H, W, Cout), jnp.float32),
        grid=(B,),
        in_specs=in_specs,
        out_specs=pl.BlockSpec((1, H, W, Cout), lambda i: (i, 0, 0, 0)),
        compiler_params=pltpu.CompilerParams(
            dimension_semantics=("parallel",)),
    )(*args)


def bigru(x_seq, p):
    # x_seq: (L, N, D) seq-major.  Returns (of, ob) each (L, N, H).
    L, N, D = x_seq.shape
    H = p["whh_t"].shape[1]
    wih_cat = jnp.concatenate([p["wih_t"][0], p["wih_t"][1]], axis=-1)  # (D,6H)
    bih_cat = jnp.concatenate([p["bih"][0], p["bih"][1]], axis=-1)      # (1,6H)
    sds = jax.ShapeDtypeStruct((L, N, H), jnp.float32)
    return pl.pallas_call(
        _bigru_kernel,
        out_shape=(sds, sds),
        in_specs=[_VMEM] * 7,
        out_specs=(_VMEM, _VMEM),
        scratch_shapes=[pltpu.VMEM((L, N, 6 * H), jnp.float32)],
        compiler_params=pltpu.CompilerParams(
            vmem_limit_bytes=32 * 1024 * 1024),
    )(x_seq, p["ln_g"].reshape(1, D), p["ln_b"].reshape(1, D),
      wih_cat, p["whh_t"], bih_cat, p["bhh"])


def birnn(x, p, batch_first):
    # LayerNorm + GELU are fused inside the BiGRU kernel.  Dropout = identity.
    xs = x.transpose(1, 0, 2) if batch_first else x    # batch_first=False quirk
    out_f, out_b = bigru(xs, p)
    out = jnp.concatenate([out_f, out_b], axis=-1)     # (L, N, 2H)
    if batch_first:
        out = out.transpose(1, 0, 2)
    return out


def classifier(x2d, w1_t, b1, w2_t, b2):
    m, k1 = x2d.shape
    h1 = w1_t.shape[1]
    n = w2_t.shape[1]
    tm = _row_tile(m)
    return pl.pallas_call(
        _classifier_kernel,
        out_shape=jax.ShapeDtypeStruct((m, n), jnp.float32),
        grid=(m // tm,),
        in_specs=[pl.BlockSpec((tm, k1), lambda i: (i, 0)),
                  pl.BlockSpec((k1, h1), lambda i: (0, 0)),
                  pl.BlockSpec((1, h1), lambda i: (0, 0)),
                  pl.BlockSpec((h1, n), lambda i: (0, 0)),
                  pl.BlockSpec((1, n), lambda i: (0, 0))],
        out_specs=pl.BlockSpec((tm, n), lambda i: (i, 0)),
        compiler_params=pltpu.CompilerParams(
            dimension_semantics=("parallel",)),
    )(x2d, w1_t, b1.reshape(1, h1), w2_t, b2.reshape(1, n))


def asr_forward(x, params):
    # x: (B, 1, nfeats, T) NCHW -> NHWC (B, nfeats, T, 1)
    B, _, F, T = x.shape
    xh = x.transpose(0, 2, 3, 1)
    # Stem conv (3x3, stride 2, pad 1): Cin=1 so im2col is tiny -> XLA im2col
    # feeding the row-tiled matmul kernel.
    Ho = (F + 2 - 3) // 2 + 1
    Wo = (T + 2 - 3) // 2 + 1
    xp = jnp.pad(xh, ((0, 0), (1, 1), (1, 1), (0, 0)))
    parts = [xp[:, kh:kh + 2 * Ho:2, kw:kw + 2 * Wo:2, :]
             for kh in range(3) for kw in range(3)]
    cols = jnp.concatenate(parts, axis=-1).reshape(B * Ho * Wo, 9)
    w0 = params["cnn_w"].transpose(2, 3, 1, 0).reshape(9, 32)
    y = linear(cols, w0, params["cnn_b"]).reshape(B, Ho, Wo, 32)

    # Residual CNN blocks, NHWC throughout; 2 fused kernels per block.
    for lp in params["rescnn"]:
        res = y
        y = ln_relu_conv3x3(y, lp["ln1_g"], lp["ln1_b"],
                            lp["conv1_w"], lp["conv1_b"])
        y = ln_relu_conv3x3(y, lp["ln2_g"], lp["ln2_b"],
                            lp["conv2_w"], lp["conv2_b"], residual=res)

    # torch: view(B, C*H, W).transpose(1, 2)  ->  features ordered (c, h).
    Bc, Hc, Wc, Cc = y.shape
    y = y.transpose(0, 2, 3, 1).reshape(Bc * Wc, Cc * Hc)
    y = linear(y, params["fc_w_t"], params["fc_b"]).reshape(Bc, Wc, -1)

    # BiRNN stack (layer 0 batch_first=True; layer >=1 reproduces the
    # batch_first=False quirk: recurrence over the batch axis).
    for i, rp in enumerate(params["birnn"]):
        y = birnn(y, rp, batch_first=(i == 0))

    A, S, D2 = y.shape
    z = classifier(y.reshape(A * S, D2),
                   params["cls_w1_t"], params["cls_b1"],
                   params["cls_w2_t"], params["cls_b2"])
    return z.reshape(A, S, -1)


# ----------------------------- deterministic params ---------------------------

def init_params(key, n_cnn_layers, n_rnn_layers, rnn_dim, n_class, nfeats):
    h = nfeats // 2
    kit = iter(jax.random.split(key, 64))

    def u(shape, fan_in):
        bound = 1.0 / float(np.sqrt(fan_in))
        return jax.random.uniform(next(kit), shape, jnp.float32, -bound, bound)

    p = {"cnn_w": u((32, 1, 3, 3), 1 * 9), "cnn_b": u((32,), 1 * 9)}
    p["rescnn"] = [
        dict(ln1_g=jnp.ones((h,), jnp.float32), ln1_b=jnp.zeros((h,), jnp.float32),
             conv1_w=u((32, 32, 3, 3), 32 * 9), conv1_b=u((32,), 32 * 9),
             ln2_g=jnp.ones((h,), jnp.float32), ln2_b=jnp.zeros((h,), jnp.float32),
             conv2_w=u((32, 32, 3, 3), 32 * 9), conv2_b=u((32,), 32 * 9))
        for _ in range(n_cnn_layers)]
    fc_in = 32 * h
    p["fc_w_t"] = u((fc_in, rnn_dim), fc_in)
    p["fc_b"] = u((rnn_dim,), fc_in)
    r = rnn_dim
    p["birnn"] = []
    for i in range(n_rnn_layers):
        d = r if i == 0 else 2 * r
        p["birnn"].append(dict(
            ln_g=jnp.ones((d,), jnp.float32), ln_b=jnp.zeros((d,), jnp.float32),
            wih_t=u((2, d, 3 * r), r),       # stacked W_ih^T (forward, backward)
            whh_t=u((2, r, 3 * r), r),       # stacked W_hh^T
            bih=u((2, 1, 3 * r), r),
            bhh=u((2, 1, 3 * r), r)))
    p["cls_w1_t"] = u((2 * r, r), 2 * r)
    p["cls_b1"] = u((r,), 2 * r)
    p["cls_w2_t"] = u((r, n_class), r)
    p["cls_b2"] = u((n_class,), r)
    return p


if __name__ == "__main__":
    B, NFEATS, T = 2, 16, 16
    N_CNN, N_RNN, RNN_DIM, N_CLASS = 2, 2, 32, 10
    key = jax.random.PRNGKey(0)
    pkey, xkey = jax.random.split(key)
    params = init_params(pkey, N_CNN, N_RNN, RNN_DIM, N_CLASS, NFEATS)
    x = jax.random.normal(xkey, (B, 1, NFEATS, T), jnp.float32)

    out = jax.block_until_ready(jax.jit(asr_forward)(x, params))
    assert out.shape == (B, T // 2, N_CLASS), out.shape
    assert bool(jnp.all(jnp.isfinite(out)))
    print("KERNEL_OK")
</pallas_src>

<mosaic_0001>
module attributes {stable_mosaic.version = 11 : i64} {
  func.func @_matmul_bias_kernel(%arg0: i32, %arg1: memref<128x9xf32, #tpu.memory_space<vmem>>, %arg2: memref<9x32xf32, #tpu.memory_space<vmem>>, %arg3: memref<1x32xf32, #tpu.memory_space<vmem>>, %arg4: memref<128x32xf32, #tpu.memory_space<vmem>>) attributes {dimension_semantics = [#tpu.dimension_semantics<parallel>], iteration_bounds = array<i64: 1>, scalar_prefetch = 0 : i64, scratch_operands = 0 : i64, tpu.core_type = #tpu.core_type<tc>, window_params = [{transform_indices = @transform_0, window_bounds = array<i64: 128, 9>}, {pipeline_mode = #tpu.pipeline_mode<synchronous>, transform_indices = @transform_1, window_bounds = array<i64: 9, 32>}, {pipeline_mode = #tpu.pipeline_mode<synchronous>, transform_indices = @transform_2, window_bounds = array<i64: 1, 32>}, {transform_indices = @transform_3, window_bounds = array<i64: 128, 32>}]} {
    %c0 = arith.constant 0 : index
    %c0_0 = arith.constant 0 : index
    %0 = vector.load %arg1[%c0, %c0_0] : memref<128x9xf32, #tpu.memory_space<vmem>>, vector<128x9xf32>
    %c0_1 = arith.constant 0 : index
    %c0_2 = arith.constant 0 : index
    %1 = vector.load %arg2[%c0_1, %c0_2] : memref<9x32xf32, #tpu.memory_space<vmem>>, vector<9x32xf32>
    %cst = arith.constant dense<0.000000e+00> : vector<128x32xf32>
    %2 = tpu.matmul %0, %1, %cst {dimension_numbers = #tpu.dot_dimension_numbers<[1], [0], [0], [1], [0, 0, 1, 1], [], []>} : vector<128x9xf32>, vector<9x32xf32>, vector<128x32xf32> -> vector<128x32xf32>
    %c0_3 = arith.constant 0 : index
    %c0_4 = arith.constant 0 : index
    %3 = vector.load %arg3[%c0_3, %c0_4] : memref<1x32xf32, #tpu.memory_space<vmem>>, vector<1x32xf32>
    %4 = vector.broadcast %3 : vector<1x32xf32> to vector<128x32xf32>
    %5 = arith.addf %2, %4 : vector<128x32xf32>
    %c0_5 = arith.constant 0 : index
    %c0_6 = arith.constant 0 : index
    %6 = vector.load %arg4[%c0_5, %c0_6] : memref<128x32xf32, #tpu.memory_space<vmem>>, vector<128x32xf32>
    tpu.vector_store %arg4[%c0_5, %c0_6], %5 {strides = array<i32>} : memref<128x32xf32, #tpu.memory_space<vmem>>, vector<128x32xf32>,
    return
  }
  func.func @transform_0(%arg0: i32) -> (i32, i32) {
    %c0_i32 = arith.constant 0 : i32
    %c0_i32_0 = arith.constant 0 : i32
    return %arg0, %c0_i32 : i32, i32
  }
  func.func @transform_1(%arg0: i32) -> (i32, i32) {
    %c0_i32 = arith.constant 0 : i32
    %c0_i32_0 = arith.constant 0 : i32
    %c0_i32_1 = arith.constant 0 : i32
    return %c0_i32, %c0_i32_0 : i32, i32
  }
  func.func @transform_2(%arg0: i32) -> (i32, i32) {
    %c0_i32 = arith.constant 0 : i32
    %c0_i32_0 = arith.constant 0 : i32
    %c0_i32_1 = arith.constant 0 : i32
    return %c0_i32, %c0_i32_0 : i32, i32
  }
  func.func @transform_3(%arg0: i32) -> (i32, i32) {
    %c0_i32 = arith.constant 0 : i32
    %c0_i32_0 = arith.constant 0 : i32
    return %arg0, %c0_i32 : i32, i32
  }
}

module attributes {stable_mosaic.version = 11 : i64} {
  func.func @_ln_relu_conv3x3_kernel(%arg0: i32, %arg1: memref<1x8x8x32xf32, #tpu.memory_space<vmem>>, %arg2: memref<8x1x32xf32, #tpu.memory_space<vmem>>, %arg3: memref<8x1x32xf32, #tpu.memory_space<vmem>>, %arg4: memref<288x32xf32, #tpu.memory_space<vmem>>, %arg5: memref<1x32xf32, #tpu.memory_space<vmem>>, %arg6: memref<1x8x8x32xf32, #tpu.memory_space<vmem>>) attributes {dimension_semantics = [#tpu.dimension_semantics<parallel>], iteration_bounds = array<i64: 2>, scalar_prefetch = 0 : i64, scratch_operands = 0 : i64, tpu.core_type = #tpu.core_type<tc>, window_params = [{transform_indices = @transform_0, window_bounds = array<i64: 1, 8, 8, 32>}, {pipeline_mode = #tpu.pipeline_mode<synchronous>, transform_indices = @transform_1, window_bounds = array<i64: 8, 1, 32>}, {pipeline_mode = #tpu.pipeline_mode<synchronous>, transform_indices = @transform_2, window_bounds = array<i64: 8, 1, 32>}, {pipeline_mode = #tpu.pipeline_mode<synchronous>, transform_indices = @transform_3, window_bounds = array<i64: 288, 32>}, {pipeline_mode = #tpu.pipeline_mode<synchronous>, transform_indices = @transform_4, window_bounds = array<i64: 1, 32>}, {transform_indices = @transform_5, window_bounds = array<i64: 1, 8, 8, 32>}]} {
    %c0 = arith.constant 0 : index
    %c0_0 = arith.constant 0 : index
    %c0_1 = arith.constant 0 : index
    %c0_2 = arith.constant 0 : index
    %0 = vector.load %arg1[%c0, %c0_0, %c0_1, %c0_2] : memref<1x8x8x32xf32, #tpu.memory_space<vmem>>, vector<1x8x8x32xf32>
    %1 = vector.shape_cast %0 : vector<1x8x8x32xf32> to vector<8x8x32xf32>
    %cst = arith.constant dense<0.000000e+00> : vector<8x32xf32>
    %2 = vector.multi_reduction <add>, %1, %cst [0] : vector<8x8x32xf32> to vector<8x32xf32>
    %3 = vector.shape_cast %2 : vector<8x32xf32> to vector<1x8x32xf32>
    %cst_3 = arith.constant 8.000000e+00 : f32
    %4 = vector.broadcast %cst_3 : f32 to vector<1x8x32xf32>
    %5 = arith.divf %3, %4 : vector<1x8x32xf32>
    %6 = vector.broadcast %5 : vector<1x8x32xf32> to vector<8x8x32xf32>
    %7 = arith.subf %1, %6 : vector<8x8x32xf32>
    %8 = arith.mulf %7, %7 : vector<8x8x32xf32>
    %cst_4 = arith.constant dense<0.000000e+00> : vector<8x32xf32>
    %9 = vector.multi_reduction <add>, %8, %cst_4 [0] : vector<8x8x32xf32> to vector<8x32xf32>
    %10 = vector.shape_cast %9 : vector<8x32xf32> to vector<1x8x32xf32>
    %cst_5 = arith.constant 8.000000e+00 : f32
    %11 = vector.broadcast %cst_5 : f32 to vector<1x8x32xf32>
    %12 = arith.divf %10, %11 : vector<1x8x32xf32>
    %13 = vector.broadcast %5 : vector<1x8x32xf32> to vector<8x8x32xf32>
    %14 = arith.subf %1, %13 : vector<8x8x32xf32>
    %cst_6 = arith.constant 9.99999974E-6 : f32
    %15 = vector.broadcast %cst_6 : f32 to vector<1x8x32xf32>
    %16 = arith.addf %12, %15 : vector<1x8x32xf32>
    %17 = math.rsqrt %16 : vector<1x8x32xf32>
    %18 = vector.broadcast %17 : vector<1x8x32xf32> to vector<8x8x32xf32>
    %19 = arith.mulf %14, %18 : vector<8x8x32xf32>
    %c0_7 = arith.constant 0 : index
    %c0_8 = arith.constant 0 : index
    %c0_9 = arith.constant 0 : index
    %20 = vector.load %arg2[%c0_7, %c0_8, %c0_9] : memref<8x1x32xf32, #tpu.memory_space<vmem>>, vector<8x1x32xf32>
    %21 = vector.broadcast %20 : vector<8x1x32xf32> to vector<8x8x32xf32>
    %22 = arith.mulf %19, %21 : vector<8x8x32xf32>
    %c0_10 = arith.constant 0 : index
    %c0_11 = arith.constant 0 : index
    %c0_12 = arith.constant 0 : index
    %23 = vector.load %arg3[%c0_10, %c0_11, %c0_12] : memref<8x1x32xf32, #tpu.memory_space<vmem>>, vector<8x1x32xf32>
    %24 = vector.broadcast %23 : vector<8x1x32xf32> to vector<8x8x32xf32>
    %25 = arith.addf %22, %24 : vector<8x8x32xf32>
    %cst_13 = arith.constant 0.000000e+00 : f32
    %26 = vector.broadcast %cst_13 : f32 to vector<8x8x32xf32>
    %27 = arith.maximumf %25, %26 : vector<8x8x32xf32>
    %cst_14 = arith.constant 0.000000e+00 : f32
    %28 = vector.broadcast %cst_14 : f32 to vector<1x8x32xf32>
    %29 = tpu.concatenate %28, %27, %28 in 0 : vector<1x8x32xf32>, vector<8x8x32xf32>, vector<1x8x32xf32> -> vector<10x8x32xf32>
    %cst_15 = arith.constant 0.000000e+00 : f32
    %30 = vector.broadcast %cst_15 : f32 to vector<10x1x32xf32>
    %31 = tpu.concatenate %30, %29, %30 in 1 : vector<10x1x32xf32>, vector<10x8x32xf32>, vector<10x1x32xf32> -> vector<10x10x32xf32>
    %32 = vector.extract_strided_slice %31 {offsets = [0, 0, 0], sizes = [8, 8, 32], strides = [1, 1, 1]} : vector<10x10x32xf32> to vector<8x8x32xf32>
    %33 = vector.extract_strided_slice %31 {offsets = [0, 1, 0], sizes = [8, 8, 32], strides = [1, 1, 1]} : vector<10x10x32xf32> to vector<8x8x32xf32>
    %34 = vector.extract_strided_slice %31 {offsets = [0, 2, 0], sizes = [8, 8, 32], strides = [1, 1, 1]} : vector<10x10x32xf32> to vector<8x8x32xf32>
    %35 = vector.extract_strided_slice %31 {offsets = [1, 0, 0], sizes = [8, 8, 32], strides = [1, 1, 1]} : vector<10x10x32xf32> to vector<8x8x32xf32>
    %36 = vector.extract_strided_slice %31 {offsets = [1, 1, 0], sizes = [8, 8, 32], strides = [1, 1, 1]} : vector<10x10x32xf32> to vector<8x8x32xf32>
    %37 = vector.extract_strided_slice %31 {offsets = [1, 2, 0], sizes = [8, 8, 32], strides = [1, 1, 1]} : vector<10x10x32xf32> to vector<8x8x32xf32>
    %38 = vector.extract_strided_slice %31 {offsets = [2, 0, 0], sizes = [8, 8, 32], strides = [1, 1, 1]} : vector<10x10x32xf32> to vector<8x8x32xf32>
    %39 = vector.extract_strided_slice %31 {offsets = [2, 1, 0], sizes = [8, 8, 32], strides = [1, 1, 1]} : vector<10x10x32xf32> to vector<8x8x32xf32>
    %40 = vector.extract_strided_slice %31 {offsets = [2, 2, 0], sizes = [8, 8, 32], strides = [1, 1, 1]} : vector<10x10x32xf32> to vector<8x8x32xf32>
    %41 = tpu.concatenate %32, %33, %34, %35, %36, %37, %38, %39, %40 in 2 : vector<8x8x32xf32>, vector<8x8x32xf32>, vector<8x8x32xf32>, vector<8x8x32xf32>, vector<8x8x32xf32>, vector<8x8x32xf32>, vector<8x8x32xf32>, vector<8x8x32xf32>, vector<8x8x32xf32> -> vector<8x8x288xf32>
    %42 = vector.shape_cast %41 : vector<8x8x288xf32> to vector<64x288xf32>
    %c0_16 = arith.constant 0 : index
    %c0_17 = arith.constant 0 : index
    %43 = vector.load %arg4[%c0_16, %c0_17] : memref<288x32xf32, #tpu.memory_space<vmem>>, vector<288x32xf32>
    %cst_18 = arith.constant dense<0.000000e+00> : vector<64x32xf32>
    %44 = tpu.matmul %42, %43, %cst_18 {dimension_numbers = #tpu.dot_dimension_numbers<[1], [0], [0], [1], [0, 0, 1, 1], [], []>} : vector<64x288xf32>, vector<288x32xf32>, vector<64x32xf32> -> vector<64x32xf32>
    %c0_19 = arith.constant 0 : index
    %c0_20 = arith.constant 0 : index
    %45 = vector.load %arg5[%c0_19, %c0_20] : memref<1x32xf32, #tpu.memory_space<vmem>>, vector<1x32xf32>
    %46 = vector.broadcast %45 : vector<1x32xf32> to vector<64x32xf32>
    %47 = arith.addf %44, %46 : vector<64x32xf32>
    %48 = vector.shape_cast %47 : vector<64x32xf32> to vector<8x8x32xf32>
    %c0_21 = arith.constant 0 : index
    %c0_22 = arith.constant 0 : index
    %c0_23 = arith.constant 0 : index
    %c0_24 = arith.constant 0 : index
    %49 = vector.load %arg6[%c0_21, %c0_22, %c0_23, %c0_24] : memref<1x8x8x32xf32, #tpu.memory_space<vmem>>, vector<1x8x8x32xf32>
    %50 = vector.shape_cast %49 : vector<1x8x8x32xf32> to vector<8x8x32xf32>
    %51 = vector.shape_cast %48 : vector<8x8x32xf32> to vector<1x8x8x32xf32>
    tpu.vector_store %arg6[%c0_21, %c0_22, %c0_23, %c0_24], %51 {strides = array<i32>} : memref<1x8x8x32xf32, #tpu.memory_space<vmem>>, vector<1x8x8x32xf32>,
    return
  }
  func.func @transform_0(%arg0: i32) -> (i32, i32, i32, i32) {
    %c0_i32 = arith.constant 0 : i32
    %c0_i32_0 = arith.constant 0 : i32
    %c0_i32_1 = arith.constant 0 : i32
    %c0_i32_2 = arith.constant 0 : i32
    return %arg0, %c0_i32, %c0_i32_0, %c0_i32_1 : i32, i32, i32, i32
  }
  func.func @transform_1(%arg0: i32) -> (i32, i32, i32) {
    %c0_i32 = arith.constant 0 : i32
    %c0_i32_0 = arith.constant 0 : i32
    %c0_i32_1 = arith.constant 0 : i32
    %c0_i32_2 = arith.constant 0 : i32
    return %c0_i32, %c0_i32_0, %c0_i32_1 : i32, i32, i32
  }
  func.func @transform_2(%arg0: i32) -> (i32, i32, i32) {
    %c0_i32 = arith.constant 0 : i32
    %c0_i32_0 = arith.constant 0 : i32
    %c0_i32_1 = arith.constant 0 : i32
    %c0_i32_2 = arith.constant 0 : i32
    return %c0_i32, %c0_i32_0, %c0_i32_1 : i32, i32, i32
  }
  func.func @transform_3(%arg0: i32) -> (i32, i32) {
    %c0_i32 = arith.constant 0 : i32
    %c0_i32_0 = arith.constant 0 : i32
    %c0_i32_1 = arith.constant 0 : i32
    return %c0_i32, %c0_i32_0 : i32, i32
  }
  func.func @transform_4(%arg0: i32) -> (i32, i32) {
    %c0_i32 = arith.constant 0 : i32
    %c0_i32_0 = arith.constant 0 : i32
    %c0_i32_1 = arith.constant 0 : i32
    return %c0_i32, %c0_i32_0 : i32, i32
  }
  func.func @transform_5(%arg0: i32) -> (i32, i32, i32, i32) {
    %c0_i32 = arith.constant 0 : i32
    %c0_i32_0 = arith.constant 0 : i32
    %c0_i32_1 = arith.constant 0 : i32
    %c0_i32_2 = arith.constant 0 : i32
    return %arg0, %c0_i32, %c0_i32_0, %c0_i32_1 : i32, i32, i32, i32
  }
}

module attributes {stable_mosaic.version = 11 : i64} {
  func.func @_ln_relu_conv3x3_kernel(%arg0: i32, %arg1: memref<1x8x8x32xf32, #tpu.memory_space<vmem>>, %arg2: memref<8x1x32xf32, #tpu.memory_space<vmem>>, %arg3: memref<8x1x32xf32, #tpu.memory_space<vmem>>, %arg4: memref<288x32xf32, #tpu.memory_space<vmem>>, %arg5: memref<1x32xf32, #tpu.memory_space<vmem>>, %arg6: memref<1x8x8x32xf32, #tpu.memory_space<vmem>>, %arg7: memref<1x8x8x32xf32, #tpu.memory_space<vmem>>) attributes {dimension_semantics = [#tpu.dimension_semantics<parallel>], iteration_bounds = array<i64: 2>, scalar_prefetch = 0 : i64, scratch_operands = 0 : i64, tpu.core_type = #tpu.core_type<tc>, window_params = [{transform_indices = @transform_0, window_bounds = array<i64: 1, 8, 8, 32>}, {pipeline_mode = #tpu.pipeline_mode<synchronous>, transform_indices = @transform_1, window_bounds = array<i64: 8, 1, 32>}, {pipeline_mode = #tpu.pipeline_mode<synchronous>, transform_indices = @transform_2, window_bounds = array<i64: 8, 1, 32>}, {pipeline_mode = #tpu.pipeline_mode<synchronous>, transform_indices = @transform_3, window_bounds = array<i64: 288, 32>}, {pipeline_mode = #tpu.pipeline_mode<synchronous>, transform_indices = @transform_4, window_bounds = array<i64: 1, 32>}, {transform_indices = @transform_5, window_bounds = array<i64: 1, 8, 8, 32>}, {transform_indices = @transform_6, window_bounds = array<i64: 1, 8, 8, 32>}]} {
    %c0 = arith.constant 0 : index
    %c0_0 = arith.constant 0 : index
    %c0_1 = arith.constant 0 : index
    %c0_2 = arith.constant 0 : index
    %0 = vector.load %arg1[%c0, %c0_0, %c0_1, %c0_2] : memref<1x8x8x32xf32, #tpu.memory_space<vmem>>, vector<1x8x8x32xf32>
    %1 = vector.shape_cast %0 : vector<1x8x8x32xf32> to vector<8x8x32xf32>
    %cst = arith.constant dense<0.000000e+00> : vector<8x32xf32>
    %2 = vector.multi_reduction <add>, %1, %cst [0] : vector<8x8x32xf32> to vector<8x32xf32>
    %3 = vector.shape_cast %2 : vector<8x32xf32> to vector<1x8x32xf32>
    %cst_3 = arith.constant 8.000000e+00 : f32
    %4 = vector.broadcast %cst_3 : f32 to vector<1x8x32xf32>
    %5 = arith.divf %3, %4 : vector<1x8x32xf32>
    %6 = vector.broadcast %5 : vector<1x8x32xf32> to vector<8x8x32xf32>
    %7 = arith.subf %1, %6 : vector<8x8x32xf32>
    %8 = arith.mulf %7, %7 : vector<8x8x32xf32>
    %cst_4 = arith.constant dense<0.000000e+00> : vector<8x32xf32>
    %9 = vector.multi_reduction <add>, %8, %cst_4 [0] : vector<8x8x32xf32> to vector<8x32xf32>
    %10 = vector.shape_cast %9 : vector<8x32xf32> to vector<1x8x32xf32>
    %cst_5 = arith.constant 8.000000e+00 : f32
    %11 = vector.broadcast %cst_5 : f32 to vector<1x8x32xf32>
    %12 = arith.divf %10, %11 : vector<1x8x32xf32>
    %13 = vector.broadcast %5 : vector<1x8x32xf32> to vector<8x8x32xf32>
    %14 = arith.subf %1, %13 : vector<8x8x32xf32>
    %cst_6 = arith.constant 9.99999974E-6 : f32
    %15 = vector.broadcast %cst_6 : f32 to vector<1x8x32xf32>
    %16 = arith.addf %12, %15 : vector<1x8x32xf32>
    %17 = math.rsqrt %16 : vector<1x8x32xf32>
    %18 = vector.broadcast %17 : vector<1x8x32xf32> to vector<8x8x32xf32>
    %19 = arith.mulf %14, %18 : vector<8x8x32xf32>
    %c0_7 = arith.constant 0 : index
    %c0_8 = arith.constant 0 : index
    %c0_9 = arith.constant 0 : index
    %20 = vector.load %arg2[%c0_7, %c0_8, %c0_9] : memref<8x1x32xf32, #tpu.memory_space<vmem>>, vector<8x1x32xf32>
    %21 = vector.broadcast %20 : vector<8x1x32xf32> to vector<8x8x32xf32>
    %22 = arith.mulf %19, %21 : vector<8x8x32xf32>
    %c0_10 = arith.constant 0 : index
    %c0_11 = arith.constant 0 : index
    %c0_12 = arith.constant 0 : index
    %23 = vector.load %arg3[%c0_10, %c0_11, %c0_12] : memref<8x1x32xf32, #tpu.memory_space<vmem>>, vector<8x1x32xf32>
    %24 = vector.broadcast %23 : vector<8x1x32xf32> to vector<8x8x32xf32>
    %25 = arith.addf %22, %24 : vector<8x8x32xf32>
    %cst_13 = arith.constant 0.000000e+00 : f32
    %26 = vector.broadcast %cst_13 : f32 to vector<8x8x32xf32>
    %27 = arith.maximumf %25, %26 : vector<8x8x32xf32>
    %cst_14 = arith.constant 0.000000e+00 : f32
    %28 = vector.broadcast %cst_14 : f32 to vector<1x8x32xf32>
    %29 = tpu.concatenate %28, %27, %28 in 0 : vector<1x8x32xf32>, vector<8x8x32xf32>, vector<1x8x32xf32> -> vector<10x8x32xf32>
    %cst_15 = arith.constant 0.000000e+00 : f32
    %30 = vector.broadcast %cst_15 : f32 to vector<10x1x32xf32>
    %31 = tpu.concatenate %30, %29, %30 in 1 : vector<10x1x32xf32>, vector<10x8x32xf32>, vector<10x1x32xf32> -> vector<10x10x32xf32>
    %32 = vector.extract_strided_slice %31 {offsets = [0, 0, 0], sizes = [8, 8, 32], strides = [1, 1, 1]} : vector<10x10x32xf32> to vector<8x8x32xf32>
    %33 = vector.extract_strided_slice %31 {offsets = [0, 1, 0], sizes = [8, 8, 32], strides = [1, 1, 1]} : vector<10x10x32xf32> to vector<8x8x32xf32>
    %34 = vector.extract_strided_slice %31 {offsets = [0, 2, 0], sizes = [8, 8, 32], strides = [1, 1, 1]} : vector<10x10x32xf32> to vector<8x8x32xf32>
    %35 = vector.extract_strided_slice %31 {offsets = [1, 0, 0], sizes = [8, 8, 32], strides = [1, 1, 1]} : vector<10x10x32xf32> to vector<8x8x32xf32>
    %36 = vector.extract_strided_slice %31 {offsets = [1, 1, 0], sizes = [8, 8, 32], strides = [1, 1, 1]} : vector<10x10x32xf32> to vector<8x8x32xf32>
    %37 = vector.extract_strided_slice %31 {offsets = [1, 2, 0], sizes = [8, 8, 32], strides = [1, 1, 1]} : vector<10x10x32xf32> to vector<8x8x32xf32>
    %38 = vector.extract_strided_slice %31 {offsets = [2, 0, 0], sizes = [8, 8, 32], strides = [1, 1, 1]} : vector<10x10x32xf32> to vector<8x8x32xf32>
    %39 = vector.extract_strided_slice %31 {offsets = [2, 1, 0], sizes = [8, 8, 32], strides = [1, 1, 1]} : vector<10x10x32xf32> to vector<8x8x32xf32>
    %40 = vector.extract_strided_slice %31 {offsets = [2, 2, 0], sizes = [8, 8, 32], strides = [1, 1, 1]} : vector<10x10x32xf32> to vector<8x8x32xf32>
    %41 = tpu.concatenate %32, %33, %34, %35, %36, %37, %38, %39, %40 in 2 : vector<8x8x32xf32>, vector<8x8x32xf32>, vector<8x8x32xf32>, vector<8x8x32xf32>, vector<8x8x32xf32>, vector<8x8x32xf32>, vector<8x8x32xf32>, vector<8x8x32xf32>, vector<8x8x32xf32> -> vector<8x8x288xf32>
    %42 = vector.shape_cast %41 : vector<8x8x288xf32> to vector<64x288xf32>
    %c0_16 = arith.constant 0 : index
    %c0_17 = arith.constant 0 : index
    %43 = vector.load %arg4[%c0_16, %c0_17] : memref<288x32xf32, #tpu.memory_space<vmem>>, vector<288x32xf32>
    %cst_18 = arith.constant dense<0.000000e+00> : vector<64x32xf32>
    %44 = tpu.matmul %42, %43, %cst_18 {dimension_numbers = #tpu.dot_dimension_numbers<[1], [0], [0], [1], [0, 0, 1, 1], [], []>} : vector<64x288xf32>, vector<288x32xf32>, vector<64x32xf32> -> vector<64x32xf32>
    %c0_19 = arith.constant 0 : index
    %c0_20 = arith.constant 0 : index
    %45 = vector.load %arg5[%c0_19, %c0_20] : memref<1x32xf32, #tpu.memory_space<vmem>>, vector<1x32xf32>
    %46 = vector.broadcast %45 : vector<1x32xf32> to vector<64x32xf32>
    %47 = arith.addf %44, %46 : vector<64x32xf32>
    %48 = vector.shape_cast %47 : vector<64x32xf32> to vector<8x8x32xf32>
    %c0_21 = arith.constant 0 : index
    %c0_22 = arith.constant 0 : index
    %c0_23 = arith.constant 0 : index
    %c0_24 = arith.constant 0 : index
    %49 = vector.load %arg6[%c0_21, %c0_22, %c0_23, %c0_24] : memref<1x8x8x32xf32, #tpu.memory_space<vmem>>, vector<1x8x8x32xf32>
    %50 = vector.shape_cast %49 : vector<1x8x8x32xf32> to vector<8x8x32xf32>
    %51 = arith.addf %48, %50 : vector<8x8x32xf32>
    %c0_25 = arith.constant 0 : index
    %c0_26 = arith.constant 0 : index
    %c0_27 = arith.constant 0 : index
    %c0_28 = arith.constant 0 : index
    %52 = vector.load %arg7[%c0_25, %c0_26, %c0_27, %c0_28] : memref<1x8x8x32xf32, #tpu.memory_space<vmem>>, vector<1x8x8x32xf32>
    %53 = vector.shape_cast %52 : vector<1x8x8x32xf32> to vector<8x8x32xf32>
    %54 = vector.shape_cast %51 : vector<8x8x32xf32> to vector<1x8x8x32xf32>
    tpu.vector_store %arg7[%c0_25, %c0_26, %c0_27, %c0_28], %54 {strides = array<i32>} : memref<1x8x8x32xf32, #tpu.memory_space<vmem>>, vector<1x8x8x32xf32>,
    return
  }
  func.func @transform_0(%arg0: i32) -> (i32, i32, i32, i32) {
    %c0_i32 = arith.constant 0 : i32
    %c0_i32_0 = arith.constant 0 : i32
    %c0_i32_1 = arith.constant 0 : i32
    %c0_i32_2 = arith.constant 0 : i32
    return %arg0, %c0_i32, %c0_i32_0, %c0_i32_1 : i32, i32, i32, i32
  }
  func.func @transform_1(%arg0: i32) -> (i32, i32, i32) {
    %c0_i32 = arith.constant 0 : i32
    %c0_i32_0 = arith.constant 0 : i32
    %c0_i32_1 = arith.constant 0 : i32
    %c0_i32_2 = arith.constant 0 : i32
    return %c0_i32, %c0_i32_0, %c0_i32_1 : i32, i32, i32
  }
  func.func @transform_2(%arg0: i32) -> (i32, i32, i32) {
    %c0_i32 = arith.constant 0 : i32
    %c0_i32_0 = arith.constant 0 : i32
    %c0_i32_1 = arith.constant 0 : i32
    %c0_i32_2 = arith.constant 0 : i32
    return %c0_i32, %c0_i32_0, %c0_i32_1 : i32, i32, i32
  }
  func.func @transform_3(%arg0: i32) -> (i32, i32) {
    %c0_i32 = arith.constant 0 : i32
    %c0_i32_0 = arith.constant 0 : i32
    %c0_i32_1 = arith.constant 0 : i32
    return %c0_i32, %c0_i32_0 : i32, i32
  }
  func.func @transform_4(%arg0: i32) -> (i32, i32) {
    %c0_i32 = arith.constant 0 : i32
    %c0_i32_0 = arith.constant 0 : i32
    %c0_i32_1 = arith.constant 0 : i32
    return %c0_i32, %c0_i32_0 : i32, i32
  }
  func.func @transform_5(%arg0: i32) -> (i32, i32, i32, i32) {
    %c0_i32 = arith.constant 0 : i32
    %c0_i32_0 = arith.constant 0 : i32
    %c0_i32_1 = arith.constant 0 : i32
    %c0_i32_2 = arith.constant 0 : i32
    return %arg0, %c0_i32, %c0_i32_0, %c0_i32_1 : i32, i32, i32, i32
  }
  func.func @transform_6(%arg0: i32) -> (i32, i32, i32, i32) {
    %c0_i32 = arith.constant 0 : i32
    %c0_i32_0 = arith.constant 0 : i32
    %c0_i32_1 = arith.constant 0 : i32
    %c0_i32_2 = arith.constant 0 : i32
    return %arg0, %c0_i32, %c0_i32_0, %c0_i32_1 : i32, i32, i32, i32
  }
}

module attributes {stable_mosaic.version = 11 : i64} {
  func.func @_matmul_bias_kernel(%arg0: i32, %arg1: memref<16x256xf32, #tpu.memory_space<vmem>>, %arg2: memref<256x32xf32, #tpu.memory_space<vmem>>, %arg3: memref<1x32xf32, #tpu.memory_space<vmem>>, %arg4: memref<16x32xf32, #tpu.memory_space<vmem>>) attributes {dimension_semantics = [#tpu.dimension_semantics<parallel>], iteration_bounds = array<i64: 1>, scalar_prefetch = 0 : i64, scratch_operands = 0 : i64, tpu.core_type = #tpu.core_type<tc>, window_params = [{transform_indices = @transform_0, window_bounds = array<i64: 16, 256>}, {pipeline_mode = #tpu.pipeline_mode<synchronous>, transform_indices = @transform_1, window_bounds = array<i64: 256, 32>}, {pipeline_mode = #tpu.pipeline_mode<synchronous>, transform_indices = @transform_2, window_bounds = array<i64: 1, 32>}, {transform_indices = @transform_3, window_bounds = array<i64: 16, 32>}]} {
    %c0 = arith.constant 0 : index
    %c0_0 = arith.constant 0 : index
    %0 = vector.load %arg1[%c0, %c0_0] : memref<16x256xf32, #tpu.memory_space<vmem>>, vector<16x256xf32>
    %c0_1 = arith.constant 0 : index
    %c0_2 = arith.constant 0 : index
    %1 = vector.load %arg2[%c0_1, %c0_2] : memref<256x32xf32, #tpu.memory_space<vmem>>, vector<256x32xf32>
    %cst = arith.constant dense<0.000000e+00> : vector<16x32xf32>
    %2 = tpu.matmul %0, %1, %cst {dimension_numbers = #tpu.dot_dimension_numbers<[1], [0], [0], [1], [0, 0, 1, 1], [], []>} : vector<16x256xf32>, vector<256x32xf32>, vector<16x32xf32> -> vector<16x32xf32>
    %c0_3 = arith.constant 0 : index
    %c0_4 = arith.constant 0 : index
    %3 = vector.load %arg3[%c0_3, %c0_4] : memref<1x32xf32, #tpu.memory_space<vmem>>, vector<1x32xf32>
    %4 = vector.broadcast %3 : vector<1x32xf32> to vector<16x32xf32>
    %5 = arith.addf %2, %4 : vector<16x32xf32>
    %c0_5 = arith.constant 0 : index
    %c0_6 = arith.constant 0 : index
    %6 = vector.load %arg4[%c0_5, %c0_6] : memref<16x32xf32, #tpu.memory_space<vmem>>, vector<16x32xf32>
    tpu.vector_store %arg4[%c0_5, %c0_6], %5 {strides = array<i32>} : memref<16x32xf32, #tpu.memory_space<vmem>>, vector<16x32xf32>,
    return
  }
  func.func @transform_0(%arg0: i32) -> (i32, i32) {
    %c0_i32 = arith.constant 0 : i32
    %c0_i32_0 = arith.constant 0 : i32
    return %arg0, %c0_i32 : i32, i32
  }
  func.func @transform_1(%arg0: i32) -> (i32, i32) {
    %c0_i32 = arith.constant 0 : i32
    %c0_i32_0 = arith.constant 0 : i32
    %c0_i32_1 = arith.constant 0 : i32
    return %c0_i32, %c0_i32_0 : i32, i32
  }
  func.func @transform_2(%arg0: i32) -> (i32, i32) {
    %c0_i32 = arith.constant 0 : i32
    %c0_i32_0 = arith.constant 0 : i32
    %c0_i32_1 = arith.constant 0 : i32
    return %c0_i32, %c0_i32_0 : i32, i32
  }
  func.func @transform_3(%arg0: i32) -> (i32, i32) {
    %c0_i32 = arith.constant 0 : i32
    %c0_i32_0 = arith.constant 0 : i32
    return %arg0, %c0_i32 : i32, i32
  }
}

module attributes {stable_mosaic.version = 11 : i64} {
  func.func @_bigru_kernel(%arg0: memref<8x2x32xf32, #tpu.memory_space<vmem>>, %arg1: memref<1x32xf32, #tpu.memory_space<vmem>>, %arg2: memref<1x32xf32, #tpu.memory_space<vmem>>, %arg3: memref<32x192xf32, #tpu.memory_space<vmem>>, %arg4: memref<2x32x96xf32, #tpu.memory_space<vmem>>, %arg5: memref<1x192xf32, #tpu.memory_space<vmem>>, %arg6: memref<2x1x96xf32, #tpu.memory_space<vmem>>, %arg7: memref<8x2x32xf32, #tpu.memory_space<vmem>>, %arg8: memref<8x2x32xf32, #tpu.memory_space<vmem>>, %arg9: memref<8x2x192xf32, #tpu.memory_space<vmem>>) attributes {dimension_semantics = [], scalar_prefetch = 0 : i64, scratch_operands = 1 : i64, tpu.core_type = #tpu.core_type<tc>} {
    %c0 = arith.constant 0 : index
    %c0_0 = arith.constant 0 : index
    %c0_1 = arith.constant 0 : index
    %0 = vector.load %arg0[%c0, %c0_0, %c0_1] : memref<8x2x32xf32, #tpu.memory_space<vmem>>, vector<8x2x32xf32>
    %1 = vector.shape_cast %0 : vector<8x2x32xf32> to vector<16x32xf32>
    %cst = arith.constant dense<0.000000e+00> : vector<16xf32>
    %2 = vector.multi_reduction <add>, %1, %cst [1] : vector<16x32xf32> to vector<16xf32>
    %3 = vector.shape_cast %2 : vector<16xf32> to vector<16x1xf32>
    %cst_2 = arith.constant 3.200000e+01 : f32
    %4 = vector.broadcast %cst_2 : f32 to vector<16x1xf32>
    %5 = arith.divf %3, %4 : vector<16x1xf32>
    %6 = vector.broadcast %5 : vector<16x1xf32> to vector<16x32xf32>
    %7 = arith.subf %1, %6 : vector<16x32xf32>
    %8 = arith.mulf %7, %7 : vector<16x32xf32>
    %cst_3 = arith.constant dense<0.000000e+00> : vector<16xf32>
    %9 = vector.multi_reduction <add>, %8, %cst_3 [1] : vector<16x32xf32> to vector<16xf32>
    %10 = vector.shape_cast %9 : vector<16xf32> to vector<16x1xf32>
    %cst_4 = arith.constant 3.200000e+01 : f32
    %11 = vector.broadcast %cst_4 : f32 to vector<16x1xf32>
    %12 = arith.divf %10, %11 : vector<16x1xf32>
    %13 = vector.broadcast %5 : vector<16x1xf32> to vector<16x32xf32>
    %14 = arith.subf %1, %13 : vector<16x32xf32>
    %cst_5 = arith.constant 9.99999974E-6 : f32
    %15 = vector.broadcast %cst_5 : f32 to vector<16x1xf32>
    %16 = arith.addf %12, %15 : vector<16x1xf32>
    %17 = math.rsqrt %16 : vector<16x1xf32>
    %18 = vector.broadcast %17 : vector<16x1xf32> to vector<16x32xf32>
    %19 = arith.mulf %14, %18 : vector<16x32xf32>
    %c0_6 = arith.constant 0 : index
    %c0_7 = arith.constant 0 : index
    %20 = vector.load %arg1[%c0_6, %c0_7] : memref<1x32xf32, #tpu.memory_space<vmem>>, vector<1x32xf32>
    %21 = vector.broadcast %20 : vector<1x32xf32> to vector<16x32xf32>
    %22 = arith.mulf %19, %21 : vector<16x32xf32>
    %c0_8 = arith.constant 0 : index
    %c0_9 = arith.constant 0 : index
    %23 = vector.load %arg2[%c0_8, %c0_9] : memref<1x32xf32, #tpu.memory_space<vmem>>, vector<1x32xf32>
    %24 = vector.broadcast %23 : vector<1x32xf32> to vector<16x32xf32>
    %25 = arith.addf %22, %24 : vector<16x32xf32>
    %cst_10 = arith.constant 5.000000e-01 : f32
    %26 = vector.broadcast %cst_10 : f32 to vector<16x32xf32>
    %27 = arith.mulf %26, %25 : vector<16x32xf32>
    %cst_11 = arith.constant 0.707106769 : f32
    %28 = vector.broadcast %cst_11 : f32 to vector<16x32xf32>
    %29 = arith.mulf %25, %28 : vector<16x32xf32>
    %30 = math.absf %29 : vector<16x32xf32>
    %cst_12 = arith.constant 0.327591091 : f32
    %31 = vector.broadcast %cst_12 : f32 to vector<16x32xf32>
    %32 = arith.mulf %31, %30 : vector<16x32xf32>
    %cst_13 = arith.constant 1.000000e+00 : f32
    %33 = vector.broadcast %cst_13 : f32 to vector<16x32xf32>
    %34 = arith.addf %33, %32 : vector<16x32xf32>
    %cst_14 = arith.constant 1.000000e+00 : f32
    %35 = vector.broadcast %cst_14 : f32 to vector<16x32xf32>
    %36 = arith.divf %35, %34 : vector<16x32xf32>
    %cst_15 = arith.constant 1.06140542 : f32
    %37 = vector.broadcast %cst_15 : f32 to vector<16x32xf32>
    %38 = arith.mulf %37, %36 : vector<16x32xf32>
    %cst_16 = arith.constant -1.45315206 : f32
    %39 = vector.broadcast %cst_16 : f32 to vector<16x32xf32>
    %40 = arith.addf %38, %39 : vector<16x32xf32>
    %41 = arith.mulf %40, %36 : vector<16x32xf32>
    %cst_17 = arith.constant 1.42141378 : f32
    %42 = vector.broadcast %cst_17 : f32 to vector<16x32xf32>
    %43 = arith.addf %41, %42 : vector<16x32xf32>
    %44 = arith.mulf %43, %36 : vector<16x32xf32>
    %cst_18 = arith.constant -0.284496725 : f32
    %45 = vector.broadcast %cst_18 : f32 to vector<16x32xf32>
    %46 = arith.addf %44, %45 : vector<16x32xf32>
    %47 = arith.mulf %46, %36 : vector<16x32xf32>
    %cst_19 = arith.constant 0.254829586 : f32
    %48 = vector.broadcast %cst_19 : f32 to vector<16x32xf32>
    %49 = arith.addf %47, %48 : vector<16x32xf32>
    %50 = arith.mulf %49, %36 : vector<16x32xf32>
    %cst_20 = arith.constant 0.000000e+00 : f32
    %51 = vector.broadcast %cst_20 : f32 to vector<16x32xf32>
    %52 = arith.subf %51, %30 : vector<16x32xf32>
    %53 = arith.mulf %52, %30 : vector<16x32xf32>
    %54 = math.exp %53 : vector<16x32xf32>
    %55 = arith.mulf %50, %54 : vector<16x32xf32>
    %cst_21 = arith.constant 1.000000e+00 : f32
    %56 = vector.broadcast %cst_21 : f32 to vector<16x32xf32>
    %57 = arith.subf %56, %55 : vector<16x32xf32>
    %cst_22 = arith.constant 0.000000e+00 : f32
    %58 = vector.broadcast %cst_22 : f32 to vector<16x32xf32>
    %59 = arith.cmpf oge, %29, %58 : vector<16x32xf32>
    %cst_23 = arith.constant 0.000000e+00 : f32
    %60 = vector.broadcast %cst_23 : f32 to vector<16x32xf32>
    %61 = arith.subf %60, %57 : vector<16x32xf32>
    %62 = arith.select %59, %57, %61 : vector<16x32xi1>, vector<16x32xf32>
    %cst_24 = arith.constant 1.000000e+00 : f32
    %63 = vector.broadcast %cst_24 : f32 to vector<16x32xf32>
    %64 = arith.addf %63, %62 : vector<16x32xf32>
    %65 = arith.mulf %27, %64 : vector<16x32xf32>
    %c0_25 = arith.constant 0 : index
    %c0_26 = arith.constant 0 : index
    %66 = vector.load %arg3[%c0_25, %c0_26] : memref<32x192xf32, #tpu.memory_space<vmem>>, vector<32x192xf32>
    %cst_27 = arith.constant dense<0.000000e+00> : vector<16x192xf32>
    %67 = tpu.matmul %65, %66, %cst_27 {dimension_numbers = #tpu.dot_dimension_numbers<[1], [0], [0], [1], [0, 0, 1, 1], [], []>} : vector<16x32xf32>, vector<32x192xf32>, vector<16x192xf32> -> vector<16x192xf32>
    %c0_28 = arith.constant 0 : index
    %c0_29 = arith.constant 0 : index
    %68 = vector.load %arg5[%c0_28, %c0_29] : memref<1x192xf32, #tpu.memory_space<vmem>>, vector<1x192xf32>
    %69 = vector.broadcast %68 : vector<1x192xf32> to vector<16x192xf32>
    %70 = arith.addf %67, %69 : vector<16x192xf32>
    %71 = vector.shape_cast %70 : vector<16x192xf32> to vector<8x2x192xf32>
    %c0_30 = arith.constant 0 : index
    %c0_31 = arith.constant 0 : index
    %c0_32 = arith.constant 0 : index
    %72 = vector.load %arg9[%c0_30, %c0_31, %c0_32] : memref<8x2x192xf32, #tpu.memory_space<vmem>>, vector<8x2x192xf32>
    tpu.vector_store %arg9[%c0_30, %c0_31, %c0_32], %71 {strides = array<i32>} : memref<8x2x192xf32, #tpu.memory_space<vmem>>, vector<8x2x192xf32>,
    %c0_33 = arith.constant 0 : index
    %c0_34 = arith.constant 0 : index
    %c0_35 = arith.constant 0 : index
    %73 = vector.load %arg4[%c0_33, %c0_34, %c0_35] : memref<2x32x96xf32, #tpu.memory_space<vmem>>, vector<1x32x96xf32>
    %74 = vector.shape_cast %73 : vector<1x32x96xf32> to vector<32x96xf32>
    %c1 = arith.constant 1 : index
    %c0_36 = arith.constant 0 : index
    %c0_37 = arith.constant 0 : index
    %75 = vector.load %arg4[%c1, %c0_36, %c0_37] : memref<2x32x96xf32, #tpu.memory_space<vmem>>, vector<1x32x96xf32>
    %76 = vector.shape_cast %75 : vector<1x32x96xf32> to vector<32x96xf32>
    %c0_38 = arith.constant 0 : index
    %c0_39 = arith.constant 0 : index
    %c0_40 = arith.constant 0 : index
    %77 = vector.load %arg6[%c0_38, %c0_39, %c0_40] : memref<2x1x96xf32, #tpu.memory_space<vmem>>, vector<1x1x96xf32>
    %78 = vector.shape_cast %77 : vector<1x1x96xf32> to vector<1x96xf32>
    %c1_41 = arith.constant 1 : index
    %c0_42 = arith.constant 0 : index
    %c0_43 = arith.constant 0 : index
    %79 = vector.load %arg6[%c1_41, %c0_42, %c0_43] : memref<2x1x96xf32, #tpu.memory_space<vmem>>, vector<1x1x96xf32>
    %80 = vector.shape_cast %79 : vector<1x1x96xf32> to vector<1x96xf32>
    %cst_44 = arith.constant 0.000000e+00 : f32
    %81 = vector.broadcast %cst_44 : f32 to vector<2x32xf32>
    %c0_i32 = arith.constant 0 : i32
    %c8_i32 = arith.constant 8 : i32
    %82 = arith.addi %c0_i32, %c8_i32 : i32
    %c1_i32 = arith.constant 1 : i32
    %83:2 = scf.for %arg10 = %c0_i32 to %82 step %c1_i32 iter_args(%arg11 = %81, %arg12 = %81) -> (vector<2x32xf32>, vector<2x32xf32>)  : i32 {
      %c7_i32 = arith.constant 7 : i32
      %84 = arith.subi %c7_i32, %arg10 : i32
      %85 = arith.index_cast %arg10 : i32 to index
      %c0_46 = arith.constant 0 : index
      %c0_47 = arith.constant 0 : index
      %86 = vector.load %arg9[%85, %c0_46, %c0_47] : memref<8x2x192xf32, #tpu.memory_space<vmem>>, vector<1x2x192xf32>
      %87 = vector.shape_cast %86 : vector<1x2x192xf32> to vector<2x192xf32>
      %88 = vector.extract_strided_slice %87 {offsets = [0, 0], sizes = [2, 96], strides = [1, 1]} : vector<2x192xf32> to vector<2x96xf32>
      %89 = arith.index_cast %84 : i32 to index
      %c0_48 = arith.constant 0 : index
      %c0_49 = arith.constant 0 : index
      %90 = vector.load %arg9[%89, %c0_48, %c0_49] : memref<8x2x192xf32, #tpu.memory_space<vmem>>, vector<1x2x192xf32>
      %91 = vector.shape_cast %90 : vector<1x2x192xf32> to vector<2x192xf32>
      %92 = vector.extract_strided_slice %91 {offsets = [0, 96], sizes = [2, 96], strides = [1, 1]} : vector<2x192xf32> to vector<2x96xf32>
      %cst_50 = arith.constant dense<0.000000e+00> : vector<2x96xf32>
      %93 = tpu.matmul %arg11, %74, %cst_50 {dimension_numbers = #tpu.dot_dimension_numbers<[1], [0], [0], [1], [0, 0, 1, 1], [], []>} : vector<2x32xf32>, vector<32x96xf32>, vector<2x96xf32> -> vector<2x96xf32>
      %94 = vector.broadcast %78 : vector<1x96xf32> to vector<2x96xf32>
      %95 = arith.addf %93, %94 : vector<2x96xf32>
      %96 = vector.extract_strided_slice %88 {offsets = [0, 0], sizes = [2, 32], strides = [1, 1]} : vector<2x96xf32> to vector<2x32xf32>
      %97 = vector.extract_strided_slice %95 {offsets = [0, 0], sizes = [2, 32], strides = [1, 1]} : vector<2x96xf32> to vector<2x32xf32>
      %98 = arith.addf %96, %97 : vector<2x32xf32>
      %99 = arith.negf %98 : vector<2x32xf32>
      %100 = math.exp %99 : vector<2x32xf32>
      %cst_51 = arith.constant 1.000000e+00 : f32
      %101 = vector.broadcast %cst_51 : f32 to vector<2x32xf32>
      %102 = arith.addf %101, %100 : vector<2x32xf32>
      %103 = arith.divf %101, %102 : vector<2x32xf32>
      %104 = vector.extract_strided_slice %88 {offsets = [0, 32], sizes = [2, 32], strides = [1, 1]} : vector<2x96xf32> to vector<2x32xf32>
      %105 = vector.extract_strided_slice %95 {offsets = [0, 32], sizes = [2, 32], strides = [1, 1]} : vector<2x96xf32> to vector<2x32xf32>
      %106 = arith.addf %104, %105 : vector<2x32xf32>
      %107 = arith.negf %106 : vector<2x32xf32>
      %108 = math.exp %107 : vector<2x32xf32>
      %cst_52 = arith.constant 1.000000e+00 : f32
      %109 = vector.broadcast %cst_52 : f32 to vector<2x32xf32>
      %110 = arith.addf %109, %108 : vector<2x32xf32>
      %111 = arith.divf %109, %110 : vector<2x32xf32>
      %112 = vector.extract_strided_slice %88 {offsets = [0, 64], sizes = [2, 32], strides = [1, 1]} : vector<2x96xf32> to vector<2x32xf32>
      %113 = vector.extract_strided_slice %95 {offsets = [0, 64], sizes = [2, 32], strides = [1, 1]} : vector<2x96xf32> to vector<2x32xf32>
      %114 = arith.mulf %103, %113 : vector<2x32xf32>
      %115 = arith.addf %112, %114 : vector<2x32xf32>
      %116 = math.tanh %115 : vector<2x32xf32>
      %cst_53 = arith.constant 1.000000e+00 : f32
      %117 = vector.broadcast %cst_53 : f32 to vector<2x32xf32>
      %118 = arith.subf %117, %111 : vector<2x32xf32>
      %119 = arith.mulf %118, %116 : vector<2x32xf32>
      %120 = arith.mulf %111, %arg11 : vector<2x32xf32>
      %121 = arith.addf %119, %120 : vector<2x32xf32>
      %cst_54 = arith.constant dense<0.000000e+00> : vector<2x96xf32>
      %122 = tpu.matmul %arg12, %76, %cst_54 {dimension_numbers = #tpu.dot_dimension_numbers<[1], [0], [0], [1], [0, 0, 1, 1], [], []>} : vector<2x32xf32>, vector<32x96xf32>, vector<2x96xf32> -> vector<2x96xf32>
      %123 = vector.broadcast %80 : vector<1x96xf32> to vector<2x96xf32>
      %124 = arith.addf %122, %123 : vector<2x96xf32>
      %125 = vector.extract_strided_slice %92 {offsets = [0, 0], sizes = [2, 32], strides = [1, 1]} : vector<2x96xf32> to vector<2x32xf32>
      %126 = vector.extract_strided_slice %124 {offsets = [0, 0], sizes = [2, 32], strides = [1, 1]} : vector<2x96xf32> to vector<2x32xf32>
      %127 = arith.addf %125, %126 : vector<2x32xf32>
      %128 = arith.negf %127 : vector<2x32xf32>
      %129 = math.exp %128 : vector<2x32xf32>
      %cst_55 = arith.constant 1.000000e+00 : f32
      %130 = vector.broadcast %cst_55 : f32 to vector<2x32xf32>
      %131 = arith.addf %130, %129 : vector<2x32xf32>
      %132 = arith.divf %130, %131 : vector<2x32xf32>
      %133 = vector.extract_strided_slice %92 {offsets = [0, 32], sizes = [2, 32], strides = [1, 1]} : vector<2x96xf32> to vector<2x32xf32>
      %134 = vector.extract_strided_slice %124 {offsets = [0, 32], sizes = [2, 32], strides = [1, 1]} : vector<2x96xf32> to vector<2x32xf32>
      %135 = arith.addf %133, %134 : vector<2x32xf32>
      %136 = arith.negf %135 : vector<2x32xf32>
      %137 = math.exp %136 : vector<2x32xf32>
      %cst_56 = arith.constant 1.000000e+00 : f32
      %138 = vector.broadcast %cst_56 : f32 to vector<2x32xf32>
      %139 = arith.addf %138, %137 : vector<2x32xf32>
      %140 = arith.divf %138, %139 : vector<2x32xf32>
      %141 = vector.extract_strided_slice %92 {offsets = [0, 64], sizes = [2, 32], strides = [1, 1]} : vector<2x96xf32> to vector<2x32xf32>
      %142 = vector.extract_strided_slice %124 {offsets = [0, 64], sizes = [2, 32], strides = [1, 1]} : vector<2x96xf32> to vector<2x32xf32>
      %143 = arith.mulf %132, %142 : vector<2x32xf32>
      %144 = arith.addf %141, %143 : vector<2x32xf32>
      %145 = math.tanh %144 : vector<2x32xf32>
      %cst_57 = arith.constant 1.000000e+00 : f32
      %146 = vector.broadcast %cst_57 : f32 to vector<2x32xf32>
      %147 = arith.subf %146, %140 : vector<2x32xf32>
      %148 = arith.mulf %147, %145 : vector<2x32xf32>
      %149 = arith.mulf %140, %arg12 : vector<2x32xf32>
      %150 = arith.addf %148, %149 : vector<2x32xf32>
      %151 = vector.shape_cast %121 : vector<2x32xf32> to vector<1x2x32xf32>
      %152 = arith.index_cast %arg10 : i32 to index
      %c0_58 = arith.constant 0 : index
      %c0_59 = arith.constant 0 : index
      %153 = vector.load %arg7[%152, %c0_58, %c0_59] : memref<8x2x32xf32, #tpu.memory_space<vmem>>, vector<1x2x32xf32>
      tpu.vector_store %arg7[%152, %c0_58, %c0_59], %151 {strides = array<i32>} : memref<8x2x32xf32, #tpu.memory_space<vmem>>, vector<1x2x32xf32>,
      %154 = vector.shape_cast %150 : vector<2x32xf32> to vector<1x2x32xf32>
      %155 = arith.index_cast %84 : i32 to index
      %c0_60 = arith.constant 0 : index
      %c0_61 = arith.constant 0 : index
      %156 = vector.load %arg8[%155, %c0_60, %c0_61] : memref<8x2x32xf32, #tpu.memory_space<vmem>>, vector<1x2x32xf32>
      tpu.vector_store %arg8[%155, %c0_60, %c0_61], %154 {strides = array<i32>} : memref<8x2x32xf32, #tpu.memory_space<vmem>>, vector<1x2x32xf32>,
      scf.yield %121, %150 : vector<2x32xf32>, vector<2x32xf32>
    }
    %c8_i32_45 = arith.constant 8 : i32
    return
  }
}

module attributes {stable_mosaic.version = 11 : i64} {
  func.func @_bigru_kernel(%arg0: memref<2x8x64xf32, #tpu.memory_space<vmem>>, %arg1: memref<1x64xf32, #tpu.memory_space<vmem>>, %arg2: memref<1x64xf32, #tpu.memory_space<vmem>>, %arg3: memref<64x192xf32, #tpu.memory_space<vmem>>, %arg4: memref<2x32x96xf32, #tpu.memory_space<vmem>>, %arg5: memref<1x192xf32, #tpu.memory_space<vmem>>, %arg6: memref<2x1x96xf32, #tpu.memory_space<vmem>>, %arg7: memref<2x8x32xf32, #tpu.memory_space<vmem>>, %arg8: memref<2x8x32xf32, #tpu.memory_space<vmem>>, %arg9: memref<2x8x192xf32, #tpu.memory_space<vmem>>) attributes {dimension_semantics = [], scalar_prefetch = 0 : i64, scratch_operands = 1 : i64, tpu.core_type = #tpu.core_type<tc>} {
    %c0 = arith.constant 0 : index
    %c0_0 = arith.constant 0 : index
    %c0_1 = arith.constant 0 : index
    %0 = vector.load %arg0[%c0, %c0_0, %c0_1] : memref<2x8x64xf32, #tpu.memory_space<vmem>>, vector<2x8x64xf32>
    %1 = vector.shape_cast %0 : vector<2x8x64xf32> to vector<16x64xf32>
    %cst = arith.constant dense<0.000000e+00> : vector<16xf32>
    %2 = vector.multi_reduction <add>, %1, %cst [1] : vector<16x64xf32> to vector<16xf32>
    %3 = vector.shape_cast %2 : vector<16xf32> to vector<16x1xf32>
    %cst_2 = arith.constant 6.400000e+01 : f32
    %4 = vector.broadcast %cst_2 : f32 to vector<16x1xf32>
    %5 = arith.divf %3, %4 : vector<16x1xf32>
    %6 = vector.broadcast %5 : vector<16x1xf32> to vector<16x64xf32>
    %7 = arith.subf %1, %6 : vector<16x64xf32>
    %8 = arith.mulf %7, %7 : vector<16x64xf32>
    %cst_3 = arith.constant dense<0.000000e+00> : vector<16xf32>
    %9 = vector.multi_reduction <add>, %8, %cst_3 [1] : vector<16x64xf32> to vector<16xf32>
    %10 = vector.shape_cast %9 : vector<16xf32> to vector<16x1xf32>
    %cst_4 = arith.constant 6.400000e+01 : f32
    %11 = vector.broadcast %cst_4 : f32 to vector<16x1xf32>
    %12 = arith.divf %10, %11 : vector<16x1xf32>
    %13 = vector.broadcast %5 : vector<16x1xf32> to vector<16x64xf32>
    %14 = arith.subf %1, %13 : vector<16x64xf32>
    %cst_5 = arith.constant 9.99999974E-6 : f32
    %15 = vector.broadcast %cst_5 : f32 to vector<16x1xf32>
    %16 = arith.addf %12, %15 : vector<16x1xf32>
    %17 = math.rsqrt %16 : vector<16x1xf32>
    %18 = vector.broadcast %17 : vector<16x1xf32> to vector<16x64xf32>
    %19 = arith.mulf %14, %18 : vector<16x64xf32>
    %c0_6 = arith.constant 0 : index
    %c0_7 = arith.constant 0 : index
    %20 = vector.load %arg1[%c0_6, %c0_7] : memref<1x64xf32, #tpu.memory_space<vmem>>, vector<1x64xf32>
    %21 = vector.broadcast %20 : vector<1x64xf32> to vector<16x64xf32>
    %22 = arith.mulf %19, %21 : vector<16x64xf32>
    %c0_8 = arith.constant 0 : index
    %c0_9 = arith.constant 0 : index
    %23 = vector.load %arg2[%c0_8, %c0_9] : memref<1x64xf32, #tpu.memory_space<vmem>>, vector<1x64xf32>
    %24 = vector.broadcast %23 : vector<1x64xf32> to vector<16x64xf32>
    %25 = arith.addf %22, %24 : vector<16x64xf32>
    %cst_10 = arith.constant 5.000000e-01 : f32
    %26 = vector.broadcast %cst_10 : f32 to vector<16x64xf32>
    %27 = arith.mulf %26, %25 : vector<16x64xf32>
    %cst_11 = arith.constant 0.707106769 : f32
    %28 = vector.broadcast %cst_11 : f32 to vector<16x64xf32>
    %29 = arith.mulf %25, %28 : vector<16x64xf32>
    %30 = math.absf %29 : vector<16x64xf32>
    %cst_12 = arith.constant 0.327591091 : f32
    %31 = vector.broadcast %cst_12 : f32 to vector<16x64xf32>
    %32 = arith.mulf %31, %30 : vector<16x64xf32>
    %cst_13 = arith.constant 1.000000e+00 : f32
    %33 = vector.broadcast %cst_13 : f32 to vector<16x64xf32>
    %34 = arith.addf %33, %32 : vector<16x64xf32>
    %cst_14 = arith.constant 1.000000e+00 : f32
    %35 = vector.broadcast %cst_14 : f32 to vector<16x64xf32>
    %36 = arith.divf %35, %34 : vector<16x64xf32>
    %cst_15 = arith.constant 1.06140542 : f32
    %37 = vector.broadcast %cst_15 : f32 to vector<16x64xf32>
    %38 = arith.mulf %37, %36 : vector<16x64xf32>
    %cst_16 = arith.constant -1.45315206 : f32
    %39 = vector.broadcast %cst_16 : f32 to vector<16x64xf32>
    %40 = arith.addf %38, %39 : vector<16x64xf32>
    %41 = arith.mulf %40, %36 : vector<16x64xf32>
    %cst_17 = arith.constant 1.42141378 : f32
    %42 = vector.broadcast %cst_17 : f32 to vector<16x64xf32>
    %43 = arith.addf %41, %42 : vector<16x64xf32>
    %44 = arith.mulf %43, %36 : vector<16x64xf32>
    %cst_18 = arith.constant -0.284496725 : f32
    %45 = vector.broadcast %cst_18 : f32 to vector<16x64xf32>
    %46 = arith.addf %44, %45 : vector<16x64xf32>
    %47 = arith.mulf %46, %36 : vector<16x64xf32>
    %cst_19 = arith.constant 0.254829586 : f32
    %48 = vector.broadcast %cst_19 : f32 to vector<16x64xf32>
    %49 = arith.addf %47, %48 : vector<16x64xf32>
    %50 = arith.mulf %49, %36 : vector<16x64xf32>
    %cst_20 = arith.constant 0.000000e+00 : f32
    %51 = vector.broadcast %cst_20 : f32 to vector<16x64xf32>
    %52 = arith.subf %51, %30 : vector<16x64xf32>
    %53 = arith.mulf %52, %30 : vector<16x64xf32>
    %54 = math.exp %53 : vector<16x64xf32>
    %55 = arith.mulf %50, %54 : vector<16x64xf32>
    %cst_21 = arith.constant 1.000000e+00 : f32
    %56 = vector.broadcast %cst_21 : f32 to vector<16x64xf32>
    %57 = arith.subf %56, %55 : vector<16x64xf32>
    %cst_22 = arith.constant 0.000000e+00 : f32
    %58 = vector.broadcast %cst_22 : f32 to vector<16x64xf32>
    %59 = arith.cmpf oge, %29, %58 : vector<16x64xf32>
    %cst_23 = arith.constant 0.000000e+00 : f32
    %60 = vector.broadcast %cst_23 : f32 to vector<16x64xf32>
    %61 = arith.subf %60, %57 : vector<16x64xf32>
    %62 = arith.select %59, %57, %61 : vector<16x64xi1>, vector<16x64xf32>
    %cst_24 = arith.constant 1.000000e+00 : f32
    %63 = vector.broadcast %cst_24 : f32 to vector<16x64xf32>
    %64 = arith.addf %63, %62 : vector<16x64xf32>
    %65 = arith.mulf %27, %64 : vector<16x64xf32>
    %c0_25 = arith.constant 0 : index
    %c0_26 = arith.constant 0 : index
    %66 = vector.load %arg3[%c0_25, %c0_26] : memref<64x192xf32, #tpu.memory_space<vmem>>, vector<64x192xf32>
    %cst_27 = arith.constant dense<0.000000e+00> : vector<16x192xf32>
    %67 = tpu.matmul %65, %66, %cst_27 {dimension_numbers = #tpu.dot_dimension_numbers<[1], [0], [0], [1], [0, 0, 1, 1], [], []>} : vector<16x64xf32>, vector<64x192xf32>, vector<16x192xf32> -> vector<16x192xf32>
    %c0_28 = arith.constant 0 : index
    %c0_29 = arith.constant 0 : index
    %68 = vector.load %arg5[%c0_28, %c0_29] : memref<1x192xf32, #tpu.memory_space<vmem>>, vector<1x192xf32>
    %69 = vector.broadcast %68 : vector<1x192xf32> to vector<16x192xf32>
    %70 = arith.addf %67, %69 : vector<16x192xf32>
    %71 = vector.shape_cast %70 : vector<16x192xf32> to vector<2x8x192xf32>
    %c0_30 = arith.constant 0 : index
    %c0_31 = arith.constant 0 : index
    %c0_32 = arith.constant 0 : index
    %72 = vector.load %arg9[%c0_30, %c0_31, %c0_32] : memref<2x8x192xf32, #tpu.memory_space<vmem>>, vector<2x8x192xf32>
    tpu.vector_store %arg9[%c0_30, %c0_31, %c0_32], %71 {strides = array<i32>} : memref<2x8x192xf32, #tpu.memory_space<vmem>>, vector<2x8x192xf32>,
    %c0_33 = arith.constant 0 : index
    %c0_34 = arith.constant 0 : index
    %c0_35 = arith.constant 0 : index
    %73 = vector.load %arg4[%c0_33, %c0_34, %c0_35] : memref<2x32x96xf32, #tpu.memory_space<vmem>>, vector<1x32x96xf32>
    %74 = vector.shape_cast %73 : vector<1x32x96xf32> to vector<32x96xf32>
    %c1 = arith.constant 1 : index
    %c0_36 = arith.constant 0 : index
    %c0_37 = arith.constant 0 : index
    %75 = vector.load %arg4[%c1, %c0_36, %c0_37] : memref<2x32x96xf32, #tpu.memory_space<vmem>>, vector<1x32x96xf32>
    %76 = vector.shape_cast %75 : vector<1x32x96xf32> to vector<32x96xf32>
    %c0_38 = arith.constant 0 : index
    %c0_39 = arith.constant 0 : index
    %c0_40 = arith.constant 0 : index
    %77 = vector.load %arg6[%c0_38, %c0_39, %c0_40] : memref<2x1x96xf32, #tpu.memory_space<vmem>>, vector<1x1x96xf32>
    %78 = vector.shape_cast %77 : vector<1x1x96xf32> to vector<1x96xf32>
    %c1_41 = arith.constant 1 : index
    %c0_42 = arith.constant 0 : index
    %c0_43 = arith.constant 0 : index
    %79 = vector.load %arg6[%c1_41, %c0_42, %c0_43] : memref<2x1x96xf32, #tpu.memory_space<vmem>>, vector<1x1x96xf32>
    %80 = vector.shape_cast %79 : vector<1x1x96xf32> to vector<1x96xf32>
    %cst_44 = arith.constant 0.000000e+00 : f32
    %81 = vector.broadcast %cst_44 : f32 to vector<8x32xf32>
    %c0_i32 = arith.constant 0 : i32
    %c2_i32 = arith.constant 2 : i32
    %82 = arith.addi %c0_i32, %c2_i32 : i32
    %c1_i32 = arith.constant 1 : i32
    %83:2 = scf.for %arg10 = %c0_i32 to %82 step %c1_i32 iter_args(%arg11 = %81, %arg12 = %81) -> (vector<8x32xf32>, vector<8x32xf32>)  : i32 {
      %c1_i32_46 = arith.constant 1 : i32
      %84 = arith.subi %c1_i32_46, %arg10 : i32
      %85 = arith.index_cast %arg10 : i32 to index
      %c0_47 = arith.constant 0 : index
      %c0_48 = arith.constant 0 : index
      %86 = vector.load %arg9[%85, %c0_47, %c0_48] : memref<2x8x192xf32, #tpu.memory_space<vmem>>, vector<1x8x192xf32>
      %87 = vector.shape_cast %86 : vector<1x8x192xf32> to vector<8x192xf32>
      %88 = vector.extract_strided_slice %87 {offsets = [0, 0], sizes = [8, 96], strides = [1, 1]} : vector<8x192xf32> to vector<8x96xf32>
      %89 = arith.index_cast %84 : i32 to index
      %c0_49 = arith.constant 0 : index
      %c0_50 = arith.constant 0 : index
      %90 = vector.load %arg9[%89, %c0_49, %c0_50] : memref<2x8x192xf32, #tpu.memory_space<vmem>>, vector<1x8x192xf32>
      %91 = vector.shape_cast %90 : vector<1x8x192xf32> to vector<8x192xf32>
      %92 = vector.extract_strided_slice %91 {offsets = [0, 96], sizes = [8, 96], strides = [1, 1]} : vector<8x192xf32> to vector<8x96xf32>
      %cst_51 = arith.constant dense<0.000000e+00> : vector<8x96xf32>
      %93 = tpu.matmul %arg11, %74, %cst_51 {dimension_numbers = #tpu.dot_dimension_numbers<[1], [0], [0], [1], [0, 0, 1, 1], [], []>} : vector<8x32xf32>, vector<32x96xf32>, vector<8x96xf32> -> vector<8x96xf32>
      %94 = vector.broadcast %78 : vector<1x96xf32> to vector<8x96xf32>
      %95 = arith.addf %93, %94 : vector<8x96xf32>
      %96 = vector.extract_strided_slice %88 {offsets = [0, 0], sizes = [8, 32], strides = [1, 1]} : vector<8x96xf32> to vector<8x32xf32>
      %97 = vector.extract_strided_slice %95 {offsets = [0, 0], sizes = [8, 32], strides = [1, 1]} : vector<8x96xf32> to vector<8x32xf32>
      %98 = arith.addf %96, %97 : vector<8x32xf32>
      %99 = arith.negf %98 : vector<8x32xf32>
      %100 = math.exp %99 : vector<8x32xf32>
      %cst_52 = arith.constant 1.000000e+00 : f32
      %101 = vector.broadcast %cst_52 : f32 to vector<8x32xf32>
      %102 = arith.addf %101, %100 : vector<8x32xf32>
      %103 = arith.divf %101, %102 : vector<8x32xf32>
      %104 = vector.extract_strided_slice %88 {offsets = [0, 32], sizes = [8, 32], strides = [1, 1]} : vector<8x96xf32> to vector<8x32xf32>
      %105 = vector.extract_strided_slice %95 {offsets = [0, 32], sizes = [8, 32], strides = [1, 1]} : vector<8x96xf32> to vector<8x32xf32>
      %106 = arith.addf %104, %105 : vector<8x32xf32>
      %107 = arith.negf %106 : vector<8x32xf32>
      %108 = math.exp %107 : vector<8x32xf32>
      %cst_53 = arith.constant 1.000000e+00 : f32
      %109 = vector.broadcast %cst_53 : f32 to vector<8x32xf32>
      %110 = arith.addf %109, %108 : vector<8x32xf32>
      %111 = arith.divf %109, %110 : vector<8x32xf32>
      %112 = vector.extract_strided_slice %88 {offsets = [0, 64], sizes = [8, 32], strides = [1, 1]} : vector<8x96xf32> to vector<8x32xf32>
      %113 = vector.extract_strided_slice %95 {offsets = [0, 64], sizes = [8, 32], strides = [1, 1]} : vector<8x96xf32> to vector<8x32xf32>
      %114 = arith.mulf %103, %113 : vector<8x32xf32>
      %115 = arith.addf %112, %114 : vector<8x32xf32>
      %116 = math.tanh %115 : vector<8x32xf32>
      %cst_54 = arith.constant 1.000000e+00 : f32
      %117 = vector.broadcast %cst_54 : f32 to vector<8x32xf32>
      %118 = arith.subf %117, %111 : vector<8x32xf32>
      %119 = arith.mulf %118, %116 : vector<8x32xf32>
      %120 = arith.mulf %111, %arg11 : vector<8x32xf32>
      %121 = arith.addf %119, %120 : vector<8x32xf32>
      %cst_55 = arith.constant dense<0.000000e+00> : vector<8x96xf32>
      %122 = tpu.matmul %arg12, %76, %cst_55 {dimension_numbers = #tpu.dot_dimension_numbers<[1], [0], [0], [1], [0, 0, 1, 1], [], []>} : vector<8x32xf32>, vector<32x96xf32>, vector<8x96xf32> -> vector<8x96xf32>
      %123 = vector.broadcast %80 : vector<1x96xf32> to vector<8x96xf32>
      %124 = arith.addf %122, %123 : vector<8x96xf32>
      %125 = vector.extract_strided_slice %92 {offsets = [0, 0], sizes = [8, 32], strides = [1, 1]} : vector<8x96xf32> to vector<8x32xf32>
      %126 = vector.extract_strided_slice %124 {offsets = [0, 0], sizes = [8, 32], strides = [1, 1]} : vector<8x96xf32> to vector<8x32xf32>
      %127 = arith.addf %125, %126 : vector<8x32xf32>
      %128 = arith.negf %127 : vector<8x32xf32>
      %129 = math.exp %128 : vector<8x32xf32>
      %cst_56 = arith.constant 1.000000e+00 : f32
      %130 = vector.broadcast %cst_56 : f32 to vector<8x32xf32>
      %131 = arith.addf %130, %129 : vector<8x32xf32>
      %132 = arith.divf %130, %131 : vector<8x32xf32>
      %133 = vector.extract_strided_slice %92 {offsets = [0, 32], sizes = [8, 32], strides = [1, 1]} : vector<8x96xf32> to vector<8x32xf32>
      %134 = vector.extract_strided_slice %124 {offsets = [0, 32], sizes = [8, 32], strides = [1, 1]} : vector<8x96xf32> to vector<8x32xf32>
      %135 = arith.addf %133, %134 : vector<8x32xf32>
      %136 = arith.negf %135 : vector<8x32xf32>
      %137 = math.exp %136 : vector<8x32xf32>
      %cst_57 = arith.constant 1.000000e+00 : f32
      %138 = vector.broadcast %cst_57 : f32 to vector<8x32xf32>
      %139 = arith.addf %138, %137 : vector<8x32xf32>
      %140 = arith.divf %138, %139 : vector<8x32xf32>
      %141 = vector.extract_strided_slice %92 {offsets = [0, 64], sizes = [8, 32], strides = [1, 1]} : vector<8x96xf32> to vector<8x32xf32>
      %142 = vector.extract_strided_slice %124 {offsets = [0, 64], sizes = [8, 32], strides = [1, 1]} : vector<8x96xf32> to vector<8x32xf32>
      %143 = arith.mulf %132, %142 : vector<8x32xf32>
      %144 = arith.addf %141, %143 : vector<8x32xf32>
      %145 = math.tanh %144 : vector<8x32xf32>
      %cst_58 = arith.constant 1.000000e+00 : f32
      %146 = vector.broadcast %cst_58 : f32 to vector<8x32xf32>
      %147 = arith.subf %146, %140 : vector<8x32xf32>
      %148 = arith.mulf %147, %145 : vector<8x32xf32>
      %149 = arith.mulf %140, %arg12 : vector<8x32xf32>
      %150 = arith.addf %148, %149 : vector<8x32xf32>
      %151 = vector.shape_cast %121 : vector<8x32xf32> to vector<1x8x32xf32>
      %152 = arith.index_cast %arg10 : i32 to index
      %c0_59 = arith.constant 0 : index
      %c0_60 = arith.constant 0 : index
      %153 = vector.load %arg7[%152, %c0_59, %c0_60] : memref<2x8x32xf32, #tpu.memory_space<vmem>>, vector<1x8x32xf32>
      tpu.vector_store %arg7[%152, %c0_59, %c0_60], %151 {strides = array<i32>} : memref<2x8x32xf32, #tpu.memory_space<vmem>>, vector<1x8x32xf32>,
      %154 = vector.shape_cast %150 : vector<8x32xf32> to vector<1x8x32xf32>
      %155 = arith.index_cast %84 : i32 to index
      %c0_61 = arith.constant 0 : index
      %c0_62 = arith.constant 0 : index
      %156 = vector.load %arg8[%155, %c0_61, %c0_62] : memref<2x8x32xf32, #tpu.memory_space<vmem>>, vector<1x8x32xf32>
      tpu.vector_store %arg8[%155, %c0_61, %c0_62], %154 {strides = array<i32>} : memref<2x8x32xf32, #tpu.memory_space<vmem>>, vector<1x8x32xf32>,
      scf.yield %121, %150 : vector<8x32xf32>, vector<8x32xf32>
    }
    %c2_i32_45 = arith.constant 2 : i32
    return
  }
}

module attributes {stable_mosaic.version = 11 : i64} {
  func.func @_classifier_kernel(%arg0: i32, %arg1: memref<16x64xf32, #tpu.memory_space<vmem>>, %arg2: memref<64x32xf32, #tpu.memory_space<vmem>>, %arg3: memref<1x32xf32, #tpu.memory_space<vmem>>, %arg4: memref<32x10xf32, #tpu.memory_space<vmem>>, %arg5: memref<1x10xf32, #tpu.memory_space<vmem>>, %arg6: memref<16x10xf32, #tpu.memory_space<vmem>>) attributes {dimension_semantics = [#tpu.dimension_semantics<parallel>], iteration_bounds = array<i64: 1>, scalar_prefetch = 0 : i64, scratch_operands = 0 : i64, tpu.core_type = #tpu.core_type<tc>, window_params = [{transform_indices = @transform_0, window_bounds = array<i64: 16, 64>}, {pipeline_mode = #tpu.pipeline_mode<synchronous>, transform_indices = @transform_1, window_bounds = array<i64: 64, 32>}, {pipeline_mode = #tpu.pipeline_mode<synchronous>, transform_indices = @transform_2, window_bounds = array<i64: 1, 32>}, {pipeline_mode = #tpu.pipeline_mode<synchronous>, transform_indices = @transform_3, window_bounds = array<i64: 32, 10>}, {pipeline_mode = #tpu.pipeline_mode<synchronous>, transform_indices = @transform_4, window_bounds = array<i64: 1, 10>}, {transform_indices = @transform_5, window_bounds = array<i64: 16, 10>}]} {
    %c0 = arith.constant 0 : index
    %c0_0 = arith.constant 0 : index
    %0 = vector.load %arg1[%c0, %c0_0] : memref<16x64xf32, #tpu.memory_space<vmem>>, vector<16x64xf32>
    %c0_1 = arith.constant 0 : index
    %c0_2 = arith.constant 0 : index
    %1 = vector.load %arg2[%c0_1, %c0_2] : memref<64x32xf32, #tpu.memory_space<vmem>>, vector<64x32xf32>
    %cst = arith.constant dense<0.000000e+00> : vector<16x32xf32>
    %2 = tpu.matmul %0, %1, %cst {dimension_numbers = #tpu.dot_dimension_numbers<[1], [0], [0], [1], [0, 0, 1, 1], [], []>} : vector<16x64xf32>, vector<64x32xf32>, vector<16x32xf32> -> vector<16x32xf32>
    %c0_3 = arith.constant 0 : index
    %c0_4 = arith.constant 0 : index
    %3 = vector.load %arg3[%c0_3, %c0_4] : memref<1x32xf32, #tpu.memory_space<vmem>>, vector<1x32xf32>
    %4 = vector.broadcast %3 : vector<1x32xf32> to vector<16x32xf32>
    %5 = arith.addf %2, %4 : vector<16x32xf32>
    %cst_5 = arith.constant 0.000000e+00 : f32
    %6 = vector.broadcast %cst_5 : f32 to vector<16x32xf32>
    %7 = arith.maximumf %5, %6 : vector<16x32xf32>
    %c0_6 = arith.constant 0 : index
    %c0_7 = arith.constant 0 : index
    %8 = vector.load %arg4[%c0_6, %c0_7] : memref<32x10xf32, #tpu.memory_space<vmem>>, vector<32x10xf32>
    %cst_8 = arith.constant dense<0.000000e+00> : vector<16x10xf32>
    %9 = tpu.matmul %7, %8, %cst_8 {dimension_numbers = #tpu.dot_dimension_numbers<[1], [0], [0], [1], [0, 0, 1, 1], [], []>} : vector<16x32xf32>, vector<32x10xf32>, vector<16x10xf32> -> vector<16x10xf32>
    %c0_9 = arith.constant 0 : index
    %c0_10 = arith.constant 0 : index
    %10 = vector.load %arg5[%c0_9, %c0_10] : memref<1x10xf32, #tpu.memory_space<vmem>>, vector<1x10xf32>
    %11 = vector.broadcast %10 : vector<1x10xf32> to vector<16x10xf32>
    %12 = arith.addf %9, %11 : vector<16x10xf32>
    %cst_11 = arith.constant dense<0xFF800000> : vector<16xf32>
    %13 = vector.multi_reduction <maximumf>, %12, %cst_11 [1] : vector<16x10xf32> to vector<16xf32>
    %14 = vector.shape_cast %13 : vector<16xf32> to vector<16x1xf32>
    %15 = vector.broadcast %14 : vector<16x1xf32> to vector<16x10xf32>
    %16 = arith.subf %12, %15 : vector<16x10xf32>
    %17 = math.exp %16 : vector<16x10xf32>
    %cst_12 = arith.constant dense<0.000000e+00> : vector<16xf32>
    %18 = vector.multi_reduction <add>, %17, %cst_12 [1] : vector<16x10xf32> to vector<16xf32>
    %19 = vector.shape_cast %18 : vector<16xf32> to vector<16x1xf32>
    %20 = math.log %19 : vector<16x1xf32>
    %21 = vector.broadcast %20 : vector<16x1xf32> to vector<16x10xf32>
    %22 = arith.subf %16, %21 : vector<16x10xf32>
    %c0_13 = arith.constant 0 : index
    %c0_14 = arith.constant 0 : index
    %23 = vector.load %arg6[%c0_13, %c0_14] : memref<16x10xf32, #tpu.memory_space<vmem>>, vector<16x10xf32>
    tpu.vector_store %arg6[%c0_13, %c0_14], %22 {strides = array<i32>} : memref<16x10xf32, #tpu.memory_space<vmem>>, vector<16x10xf32>,
    return
  }
  func.func @transform_0(%arg0: i32) -> (i32, i32) {
    %c0_i32 = arith.constant 0 : i32
    %c0_i32_0 = arith.constant 0 : i32
    return %arg0, %c0_i32 : i32, i32
  }
  func.func @transform_1(%arg0: i32) -> (i32, i32) {
    %c0_i32 = arith.constant 0 : i32
    %c0_i32_0 = arith.constant 0 : i32
    %c0_i32_1 = arith.constant 0 : i32
    return %c0_i32, %c0_i32_0 : i32, i32
  }
  func.func @transform_2(%arg0: i32) -> (i32, i32) {
    %c0_i32 = arith.constant 0 : i32
    %c0_i32_0 = arith.constant 0 : i32
    %c0_i32_1 = arith.constant 0 : i32
    return %c0_i32, %c0_i32_0 : i32, i32
  }
  func.func @transform_3(%arg0: i32) -> (i32, i32) {
    %c0_i32 = arith.constant 0 : i32
    %c0_i32_0 = arith.constant 0 : i32
    %c0_i32_1 = arith.constant 0 : i32
    return %c0_i32, %c0_i32_0 : i32, i32
  }
  func.func @transform_4(%arg0: i32) -> (i32, i32) {
    %c0_i32 = arith.constant 0 : i32
    %c0_i32_0 = arith.constant 0 : i32
    %c0_i32_1 = arith.constant 0 : i32
    return %c0_i32, %c0_i32_0 : i32, i32
  }
  func.func @transform_5(%arg0: i32) -> (i32, i32) {
    %c0_i32 = arith.constant 0 : i32
    %c0_i32_0 = arith.constant 0 : i32
    return %arg0, %c0_i32 : i32, i32
  }
}

</mosaic_0001>

<bundles_post_ra>
// kernel: asr_forward.9
= control target key start
LH: loop header
LB: loop body
LE: loop exit
PB: predicated region body
PF: predicated region fallthrough
CT: control target
= control target key end

     0   :  { %vm88_vm0 = vcmask 1040384   ;;  %vm39_vm1 = vcmask 72704   ;;  %vm331_vm2 = vmmov 1   ;;  %vm237_vm4 = vcmask 261120   ;;  %s489_s1 = inlined_call_operand.vmem [shape: f32[9,32], index: 1, kind: input, shape index: {}]   ;;  %s490_s0 = inlined_call_operand.vmem [shape: f32[128,9], index: 0, kind: input, shape index: {}]   ;;  %s491_s2 = inlined_call_operand.vmem [shape: f32[1,32], index: 2, kind: input, shape index: {}]   ;;  %s492_s3 = inlined_call_operand.vmem [shape: f32[128,32], index: 3, kind: output, shape index: {}]  }
   0x1   :  { %v30_v0 = vld [vmem:[%s489_s1] sm:$0xff]  ;;  %v31_v1 = vld [vmem:[%s489_s1 + $0x8] sm:$0x1]  ;;  %vm323_vm3 = vmpackc.low %vm88_vm0, %vm331_vm2 }
   0x2   :  { %v322_v2 = vpack.c.bf16 %v31_v1, %v30_v0  ;;  %v14_v3 = vld [vmem:[%s490_s0] sm:$0xff]  ;;  %v15_v5 = vld [vmem:[%s490_s0 + $0x8] sm:$0xff]  ;;  %v16_v7 = vld [vmem:[%s490_s0 + $0x10] sm:$0xff] }
   0x3   :  { %v22_v4 = vld [vmem:[%s490_s0 + $0x40] sm:$0xff]  ;;  %298 = vmatprep.mubr.msk.f32.mxu0 %vm39_vm1, %v14_v3  ;;  %v23_v6 = vld [vmem:[%s490_s0 + $0x48] sm:$0xff]  ;;  %v24_v8 = vld [vmem:[%s490_s0 + $0x50] sm:$0xff] }
   0x4   :  { %310 = vmatprep.mubr.msk.f32.mxu1 %vm39_vm1, %v22_v4  ;;  %324 = vmatprep.subr.msk.bf16.mxu0 %vm323_vm3, %v322_v2  ;;  %v17_v9 = vld [vmem:[%s490_s0 + $0x18] sm:$0xff]  ;;  %v18_v11 = vld [vmem:[%s490_s0 + $0x20] sm:$0xff]  ;;  %v19_v13 = vld [vmem:[%s490_s0 + $0x28] sm:$0xff] }
   0x5   :  { %328 = vmatprep.subr.msk.bf16.mxu1 %vm323_vm3, %v322_v2  ;;  %327 = vmatpush3.bf16.msk.msra.mxu0 %vm323_vm3, %v322_v2  ;;  %v25_v10 = vld [vmem:[%s490_s0 + $0x58] sm:$0xff]  ;;  %v26_v12 = vld [vmem:[%s490_s0 + $0x60] sm:$0xff]  ;;  %v27_v14 = vld [vmem:[%s490_s0 + $0x68] sm:$0xff] }
   0x6   :  { %329 = vmatpush3.bf16.msk.msra.mxu1 %vm323_vm3, %v322_v2  ;;  %v20_v15 = vld [vmem:[%s490_s0 + $0x30] sm:$0xff]  ;;  %v21_v17 = vld [vmem:[%s490_s0 + $0x38] sm:$0xff]  ;;  %v258_v19 = vld [vmem:[%s491_s2] ss:$0 sm:$0xff] }
   0x7   :  { %v28_v16 = vld [vmem:[%s490_s0 + $0x70] sm:$0xff]  ;;  %v29_v18 = vld [vmem:[%s490_s0 + $0x78] sm:$0xff] }
   0x8   :  { %299 = vmatmul.mubr.msk.f32.vlgmr.msra.gmra.mrb[0].mxu0 %vm39_vm1, %v15_v5 }
   0x9   :  { %311 = vmatmul.mubr.msk.f32.vlgmr.msra.gmra.mrb[0].mxu1 %vm39_vm1, %v23_v6  ;;  %301 = vmatprep.mubr.msk.f32.mxu0 %vm39_vm1, %v16_v7 }
   0xa   :  { %313 = vmatprep.mubr.msk.f32.mxu1 %vm39_vm1, %v24_v8 }
   0xc   :  { %302 = vmatmul.mubr.msk.f32.gmra.mrb[2].mxu0 %vm39_vm1, %v17_v9 }
   0xd   :  { %314 = vmatmul.mubr.msk.f32.gmra.mrb[2].mxu1 %vm39_vm1, %v25_v10  ;;  %304 = vmatprep.mubr.msk.f32.mxu0 %vm39_vm1, %v18_v11 }
   0xe   :  { %316 = vmatprep.mubr.msk.f32.mxu1 %vm39_vm1, %v26_v12 }
  0x10   :  { %305 = vmatmul.mubr.msk.f32.gmra.mrb[4].mxu0 %vm39_vm1, %v19_v13 }
  0x11   :  { %317 = vmatmul.mubr.msk.f32.gmra.mrb[4].mxu1 %vm39_vm1, %v27_v14  ;;  %307 = vmatprep.mubr.msk.f32.mxu0 %vm39_vm1, %v20_v15 }
  0x12   :  { %319 = vmatprep.mubr.msk.f32.mxu1 %vm39_vm1, %v28_v16 }
  0x14   :  { %308 = vmatmul.mubr.msk.f32.gmra.mrb[6].mxu0 %vm39_vm1, %v21_v17 }
  0x15   :  { %320 = vmatmul.mubr.msk.f32.gmra.mrb[6].mxu1 %vm39_vm1, %v29_v18 }
  0xdb   :  { %v300_v20 = vpop.f32.mrb[0].mxu0 }
  0xdc   :  { %v312_v21 = vpop.f32.mrb[0].mxu1  ;;  %v164_v22 = vadd.f32 %v300_v20, %v258_v19  ;;  %v158_v24 = vpop.f32.mrb[1].mxu0 }
  0xdd   :  { %v204_v23 = vadd.f32 %v312_v21, %v258_v19  ;;  %v198_v25 = vpop.f32.mrb[1].mxu1  ;;  %v159_v26 = vadd.f32 %v258_v19, %v158_v24 }
  0xde   :  { %v199_v27 = vadd.f32 %v258_v19, %v198_v25  ;;  %239 = vst.msk [vmem:[%s492_s3 + $0x8] sm:$0xff] %vm237_vm4, %v164_v22 }
  0xdf   :  { %247 = vst.msk [vmem:[%s492_s3 + $0x48] sm:$0xff] %vm237_vm4, %v204_v23  ;;  %238 = vst.msk [vmem:[%s492_s3] sm:$0xff] %vm237_vm4, %v159_v26  ;;  %v303_v28 = vpop.f32.mrb[2].mxu0 }
  0xe0   :  { %246 = vst.msk [vmem:[%s492_s3 + $0x40] sm:$0xff] %vm237_vm4, %v199_v27  ;;  %v315_v29 = vpop.f32.mrb[2].mxu1  ;;  %v174_v30 = vadd.f32 %v303_v28, %v258_v19  ;;  %v168_v32 = vpop.f32.mrb[3].mxu0 }
  0xe1   :  { %v214_v31 = vadd.f32 %v315_v29, %v258_v19  ;;  %v208_v33 = vpop.f32.mrb[3].mxu1  ;;  %v169_v34 = vadd.f32 %v258_v19, %v168_v32 }
  0xe2   :  { %v209_v35 = vadd.f32 %v258_v19, %v208_v33  ;;  %241 = vst.msk [vmem:[%s492_s3 + $0x18] sm:$0xff] %vm237_vm4, %v174_v30 }
  0xe3   :  { %249 = vst.msk [vmem:[%s492_s3 + $0x58] sm:$0xff] %vm237_vm4, %v214_v31  ;;  %240 = vst.msk [vmem:[%s492_s3 + $0x10] sm:$0xff] %vm237_vm4, %v169_v34  ;;  %v306_v36 = vpop.f32.mrb[4].mxu0 }
  0xe4   :  { %248 = vst.msk [vmem:[%s492_s3 + $0x50] sm:$0xff] %vm237_vm4, %v209_v35  ;;  %v318_v37 = vpop.f32.mrb[4].mxu1  ;;  %v184_v38 = vadd.f32 %v306_v36, %v258_v19  ;;  %v178_v40 = vpop.f32.mrb[5].mxu0 }
  0xe5   :  { %v224_v39 = vadd.f32 %v318_v37, %v258_v19  ;;  %v218_v41 = vpop.f32.mrb[5].mxu1  ;;  %v179_v42 = vadd.f32 %v258_v19, %v178_v40 }
  0xe6   :  { %v219_v43 = vadd.f32 %v258_v19, %v218_v41  ;;  %243 = vst.msk [vmem:[%s492_s3 + $0x28] sm:$0xff] %vm237_vm4, %v184_v38 }
  0xe7   :  { %251 = vst.msk [vmem:[%s492_s3 + $0x68] sm:$0xff] %vm237_vm4, %v224_v39  ;;  %242 = vst.msk [vmem:[%s492_s3 + $0x20] sm:$0xff] %vm237_vm4, %v179_v42  ;;  %v309_v44 = vpop.f32.mrb[6].mxu0 }
  0xe8   :  { %250 = vst.msk [vmem:[%s492_s3 + $0x60] sm:$0xff] %vm237_vm4, %v219_v43  ;;  %v321_v45 = vpop.f32.mrb[6].mxu1  ;;  %v194_v46 = vadd.f32 %v309_v44, %v258_v19  ;;  %v188_v48 = vpop.f32.mrb[7].mxu0 }
  0xe9   :  { %v234_v47 = vadd.f32 %v321_v45, %v258_v19  ;;  %v228_v49 = vpop.f32.mrb[7].mxu1  ;;  %v189_v50 = vadd.f32 %v258_v19, %v188_v48 }
  0xea   :  { %v229_v51 = vadd.f32 %v258_v19, %v228_v49  ;;  %245 = vst.msk [vmem:[%s492_s3 + $0x38] sm:$0xff] %vm237_vm4, %v194_v46 }
  0xeb   :  { %253 = vst.msk [vmem:[%s492_s3 + $0x78] sm:$0xff] %vm237_vm4, %v234_v47  ;;  %244 = vst.msk [vmem:[%s492_s3 + $0x30] sm:$0xff] %vm237_vm4, %v189_v50 }
  0xec   :  { %252 = vst.msk [vmem:[%s492_s3 + $0x70] sm:$0xff] %vm237_vm4, %v229_v51 }

// kernel: asr_forward.10
= control target key start
LH: loop header
LB: loop body
LE: loop exit
PB: predicated region body
PF: predicated region fallthrough
CT: control target
= control target key end

     0   :  { %s1441_s18 = smov 0   ;;  %s1964_s0 = inlined_call_operand.vmem [shape: f32[2,8,8,32], index: 0, kind: input, shape index: {}]   ;;  %s1965_s1 = inlined_call_operand.vmem [shape: f32[8,1,32], index: 1, kind: input, shape index: {}]   ;;  %s1966_s2 = inlined_call_operand.vmem [shape: f32[8,1,32], index: 2, kind: input, shape index: {}]   ;;  %s1967_s3 = inlined_call_operand.vmem [shape: f32[288,32], index: 3, kind: input, shape index: {}]   ;;  %s1968_s4 = inlined_call_operand.vmem [shape: f32[1,32], index: 4, kind: input, shape index: {}]   ;;  %s1969_s5 = inlined_call_operand.vmem [shape: f32[2,8,8,32], index: 5, kind: output, shape index: {}]  }
   0x1 LB: > { %s1083_s19 = sadd.s32 4294967295, %s1405_s18   ;;  %p1087_p0 = scmp.ge.s32.totalorder %s1405_s18, 1  ;;  %s1405_s18 = sphi %s1441_s18, %s15_s18  }
   0x2   : > { %p187_p1 = scmp.lt.s32.totalorder %s1405_s18, 3 }
   0x4   : > { %p188_p2 = pnand %p1087_p0, %p187_p1 }
   0x5   : > { %p215_p3 = scmp.lt.s32.totalorder (!%p188_p2), %s1083_s19, 1  ;;  %vm233_vm0 = vcmask (!%p188_p2), 261120   ;;  %v767_v10 = vld [vmem:[%s1967_s3 + $0x80] sm:$0xff] (!%p188_p2)  ;;  %v768_v13 = vld [vmem:[%s1967_s3 + $0x88] sm:$0xff] (!%p188_p2)  ;;  %v769_v21 = vld [vmem:[%s1967_s3 + $0x90] sm:$0xff] (!%p188_p2)  ;;  %vm456_vm1 = vcmask (!%p188_p2), 1040384  }
   0x6   : > { %191 = sbr.rel (%p188_p2) target bundleno = 465 (0x1d1), region = 40  ;;  %v1209_v16 = vpack.c.bf16 (!%p188_p2), %v768_v13, %v767_v10  ;;  %v751_v17 = vld [vmem:[%s1967_s3] sm:$0xff] (!%p188_p2)  ;;  %v752_v18 = vld [vmem:[%s1967_s3 + $0x8] sm:$0xff] (!%p188_p2)  ;;  %v770_v22 = vld [vmem:[%s1967_s3 + $0x98] sm:$0xff] (!%p188_p2)  ;;  %vm540_vm2 = vcmask (!%p188_p2), 1045504   ;;  %vm491_vm3 = vcmask (!%p188_p2), 1046528  }
   0x7   : > { %v1211_v20 = vpack.c.bf16 (!%p188_p2), %v752_v18, %v751_v17  ;;  %v753_v23 = vld [vmem:[%s1967_s3 + $0x10] sm:$0xff] (!%p188_p2)  ;;  %v1213_v25 = vpack.c.bf16 (!%p188_p2), %v770_v22, %v769_v21  ;;  %v754_v26 = vld [vmem:[%s1967_s3 + $0x18] sm:$0xff] (!%p188_p2)  ;;  %v771_v27 = vld [vmem:[%s1967_s3 + $0xa0] sm:$0xff] (!%p188_p2)  ;;  %v1407_v17 = vmov (!%p188_p2), 0.0   ;;  %s1408_s22 = smov (!%p188_p2), 64   ;;  %s1409_s24 = smov (!%p188_p2), 96  }
   0x8   : > { %1210 = vmatprep.subr.bf16.mxu0 (!%p188_p2), %v1209_v16  ;;  %1249 = vmatprep.subr.bf16.mxu1 (!%p188_p2), %v1209_v16  ;;  %v772_v28 = vld [vmem:[%s1967_s3 + $0xa8] sm:$0xff] (!%p188_p2)  ;;  %v1215_v31 = vpack.c.bf16 (!%p188_p2), %v754_v26, %v753_v23  ;;  %v755_v34 = vld [vmem:[%s1967_s3 + $0x20] sm:$0xff] (!%p188_p2)  ;;  %v773_v37 = vld [vmem:[%s1967_s3 + $0xb0] sm:$0xff] (!%p188_p2)  ;;  %v438_v18 = vrot.slane (!%p188_p2), %v1407_v17, 7  ;;  %s1410_s25 = smov (!%p188_p2), 32   ;;  %vm709_vm4 = vcmask (!%p188_p2), 523264  }
   0x9   : > { %1212 = vmatpush3.bf16.msra.mxu0 (!%p188_p2), %v1211_v20  ;;  %1257 = vmatpush3.bf16.msra.mxu1 (!%p188_p2), %v1211_v20  ;;  %v1217_v33 = vpack.c.bf16 (!%p188_p2), %v772_v28, %v771_v27  ;;  %v756_v35 = vld [vmem:[%s1967_s3 + $0x28] sm:$0xff] (!%p188_p2)  ;;  %v774_v38 = vld [vmem:[%s1967_s3 + $0xb8] sm:$0xff] (!%p188_p2)  ;;  %v757_v43 = vld [vmem:[%s1967_s3 + $0x30] sm:$0xff] (!%p188_p2)  ;;  %vm718_vm5 = vcmask (!%p188_p2), 785408  }
   0xa   : > { %1214 = vmatprep.subr.bf16.mxu0 (!%p188_p2), %v1213_v25  ;;  %1250 = vmatprep.subr.bf16.mxu1 (!%p188_p2), %v1213_v25  ;;  %v1219_v41 = vpack.c.bf16 (!%p188_p2), %v756_v35, %v755_v34  ;;  %v1221_v42 = vpack.c.bf16 (!%p188_p2), %v774_v38, %v773_v37  ;;  %v758_v44 = vld [vmem:[%s1967_s3 + $0x38] sm:$0xff] (!%p188_p2)  ;;  %v1539_v20 = vsel (!%p188_p2), %vm456_vm1, %v438_v18, 0.0  ;;  %v1094_v23 = vld [vmem:[%s1965_s1 + $0x2] ss:$0 sm:$0xff] (!%p188_p2)  ;;  %v1107_v27 = vld [vmem:[%s1966_s2 + $0x7] ss:$0 sm:$0xff] (!%p188_p2) }
   0xb   : > { %v1223_v47 = vpack.c.bf16 (!%p188_p2), %v758_v44, %v757_v43  ;;  %v542_v22 = vrot.slane (!%p188_p2), %v1539_v20, 2  ;;  %v1102_v26 = vld [vmem:[%s1966_s2 + $0x2] ss:$0 sm:$0xff] (!%p188_p2)  ;;  %v1093_v28 = vld [vmem:[%s1965_s1 + $0x1] ss:$0 sm:$0xff] (!%p188_p2) }
   0xc   : > { %v1092_v37 = vld [vmem:[%s1965_s1] ss:$0 sm:$0xff] (!%p188_p2)  ;;  %v1097_v38 = vld [vmem:[%s1965_s1 + $0x5] ss:$0 sm:$0xff] (!%p188_p2) }
   0xd   : > { %s1971_s19 = smov (!%p215_p3, %s1083_s19), 1  ;;  %1216 = vmatpush3.bf16.msra.mxu0 %v1215_v31  ;;  %1258 = vmatpush3.bf16.msra.mxu1 %v1215_v31  ;;  %v1095_v31 = vld [vmem:[%s1965_s1 + $0x3] ss:$0 sm:$0xff] }
   0xe   : > { %s1119_s20 = sshll.u32 %s1971_s19, 6  ;;  %1218 = vmatprep.subr.bf16.mxu0 %v1217_v33  ;;  %1251 = vmatprep.subr.bf16.mxu1 %v1217_v33 }
   0xf   : > { %s1457_s23 = scalar_lea.vmem %s1964_s0, %s1119_s20  ;;  %s1943_s28 = scalar_lea.vmem %s1969_s5, %s1119_s20 }
  0x10   : > { %v225_v0 = vld [vmem:[%s1457_s23] sm:$0xff]  ;;  %v226_v1 = vld [vmem:[%s1457_s23 + $0x8] sm:$0xff]  ;;  %v227_v2 = vld [vmem:[%s1457_s23 + $0x10] sm:$0xff] }
  0x11   : > { %v228_v3 = vld [vmem:[%s1457_s23 + $0x18] sm:$0xff]  ;;  %v234_v4 = vsel %vm233_vm0, %v225_v0, 0.0  ;;  %v235_v5 = vsel %vm233_vm0, %v226_v1, 0.0  ;;  %v237_v6 = vsel %vm233_vm0, %v227_v2, 0.0  ;;  %v229_v7 = vld [vmem:[%s1457_s23 + $0x20] sm:$0xff]  ;;  %v230_v11 = vld [vmem:[%s1457_s23 + $0x28] sm:$0xff]  ;;  %1220 = vmatpush3.bf16.msra.mxu0 %v1219_v41  ;;  %1259 = vmatpush3.bf16.msra.mxu1 %v1219_v41 }
  0x12   : > { %v236_v8 = vadd.f32 %v235_v5, %v234_v4  ;;  %v239_v9 = vsel %vm233_vm0, %v228_v3, 0.0  ;;  %v231_v14 = vld [vmem:[%s1457_s23 + $0x30] sm:$0xff]  ;;  %v241_v15 = vsel %vm233_vm0, %v229_v7, 0.0  ;;  %v243_v24 = vsel %vm233_vm0, %v230_v11, 0.0  ;;  %v232_v29 = vld [vmem:[%s1457_s23 + $0x38] sm:$0xff]  ;;  %1222 = vmatprep.subr.bf16.mxu0 %v1221_v42  ;;  %1252 = vmatprep.subr.bf16.mxu1 %v1221_v42 }
  0x13   : > { %v245_v32 = vsel %vm233_vm0, %v231_v14, 0.0  ;;  %v247_v39 = vsel %vm233_vm0, %v232_v29, 0.0  ;;  %v1106_v42 = vld [vmem:[%s1966_s2 + $0x6] ss:$0 sm:$0xff] }
  0x14   : > { %v238_v12 = vadd.f32 %v237_v6, %v236_v8 }
  0x15   : > { %1224 = vmatpush3.bf16.msra.mxu0 %v1223_v47  ;;  %1260 = vmatpush3.bf16.msra.mxu1 %v1223_v47 }
  0x16   : > { %v240_v19 = vadd.f32 %v239_v9, %v238_v12 }
  0x18   : > { %v242_v30 = vadd.f32 %v241_v15, %v240_v19  ;;  %v1536_v19 = vsel %vm456_vm1, 0.0, %v438_v18 }
  0x19   : > { %v541_v21 = vrot.slane %v1536_v19, 2 }
  0x1a   : > { %v244_v36 = vadd.f32 %v243_v24, %v242_v30  ;;  %v1099_v24 = vld [vmem:[%s1965_s1 + $0x7] ss:$0 sm:$0xff] }
  0x1b   : > { %v1560_v30 = vsel %vm540_vm2, %v541_v21, %v542_v22 }
  0x1c   : > { %v246_v40 = vadd.f32 %v245_v32, %v244_v36  ;;  %v1098_v36 = vld [vmem:[%s1965_s1 + $0x6] ss:$0 sm:$0xff] }
  0x1e   : > { %v248_v45 = vadd.f32 %v247_v39, %v246_v40  ;;  %v1101_v39 = vld [vmem:[%s1966_s2 + $0x1] ss:$0 sm:$0xff]  ;;  %v1103_v40 = vld [vmem:[%s1966_s2 + $0x3] ss:$0 sm:$0xff] }
  0x20   : > { %v250_v46 = vmul.f32 0.125, %v248_v45 }
  0x22   : > { %v1523_v48 = vsub.f32 %v225_v0, %v250_v46  ;;  %v252_v49 = vsub.f32 %v226_v1, %v250_v46  ;;  %v253_v50 = vsub.f32 %v227_v2, %v250_v46  ;;  %v254_v51 = vsub.f32 %v228_v3, %v250_v46 }
  0x23   : > { %v255_v52 = vsub.f32 %v229_v7, %v250_v46  ;;  %v256_v53 = vsub.f32 %v230_v11, %v250_v46  ;;  %v257_v58 = vsub.f32 %v231_v14, %v250_v46  ;;  %v258_v0 = vsub.f32 %v232_v29, %v250_v46 }
  0x24   : > { %v259_v54 = vmul.f32 %v1523_v48, %v1523_v48  ;;  %v260_v55 = vmul.f32 %v252_v49, %v252_v49  ;;  %v261_v56 = vmul.f32 %v253_v50, %v253_v50  ;;  %v262_v57 = vmul.f32 %v254_v51, %v254_v51 }
  0x25   : > { %v263_v59 = vmul.f32 %v255_v52, %v255_v52  ;;  %v264_v1 = vmul.f32 %v256_v53, %v256_v53  ;;  %v265_v4 = vmul.f32 %v257_v58, %v257_v58  ;;  %v266_v7 = vmul.f32 %v258_v0, %v258_v0 }
  0x26   : > { %v267_v60 = vsel %vm233_vm0, %v259_v54, 0.0  ;;  %v268_v61 = vsel %vm233_vm0, %v260_v55, 0.0  ;;  %v270_v62 = vsel %vm233_vm0, %v261_v56, 0.0  ;;  %v272_v2 = vsel %vm233_vm0, %v262_v57, 0.0  ;;  %v1105_v54 = vld [vmem:[%s1966_s2 + $0x5] ss:$0 sm:$0xff] }
  0x27   : > { %v269_v63 = vadd.f32 %v268_v61, %v267_v60  ;;  %v274_v5 = vsel %vm233_vm0, %v263_v59, 0.0  ;;  %v276_v8 = vsel %vm233_vm0, %v264_v1, 0.0  ;;  %v278_v10 = vsel %vm233_vm0, %v265_v4, 0.0  ;;  %v1096_v55 = vld [vmem:[%s1965_s1 + $0x4] ss:$0 sm:$0xff] }
  0x28   : > { %v280_v12 = vsel %vm233_vm0, %v266_v7, 0.0  ;;  %v493_v29 = vrot.slane %v1539_v20, 1 }
  0x29   : > { %v271_v3 = vadd.f32 %v270_v62, %v269_v63 }
  0x2b   : > { %v273_v6 = vadd.f32 %v272_v2, %v271_v3 }
  0x2d   : > { %v275_v9 = vadd.f32 %v274_v5, %v273_v6  ;;  %v1104_v5 = vld [vmem:[%s1966_s2 + $0x4] ss:$0 sm:$0xff] }
  0x2f   : > { %v277_v11 = vadd.f32 %v276_v8, %v275_v9 }
  0x31   : > { %v279_v13 = vadd.f32 %v278_v10, %v277_v11 }
  0x33   : > { %v281_v14 = vadd.f32 %v280_v12, %v279_v13 }
  0x35   : > { %v282_v15 = vmul.f32 0.125, %v281_v14 }
  0x37   : > { %v283_v16 = vadd.f32 1e-05, %v282_v15 }
  0x39   : > { %1397 = vrsqrt.f32 %v283_v16 }
  0x43   : > { %v1398_v25 = vpop.eup %1397 }
  0x44   : > { %v287_v32 = vmul.f32 %v1398_v25, %v253_v50  ;;  %v292_v33 = vmul.f32 %v1398_v25, %v258_v0  ;;  %v286_v34 = vmul.f32 %v1398_v25, %v252_v49  ;;  %v288_v35 = vmul.f32 %v1398_v25, %v254_v51  ;;  %v1100_v51 = vld [vmem:[%s1966_s2] ss:$0 sm:$0xff] }
  0x45   : > { %v291_v41 = vmul.f32 %v1398_v25, %v257_v58  ;;  %v285_v43 = vmul.f32 %v1398_v25, %v1523_v48  ;;  %v290_v44 = vmul.f32 %v1398_v25, %v256_v53  ;;  %v289_v45 = vmul.f32 %v1398_v25, %v255_v52 }
  0x46   : > { %v351_v46 = vmul.f32 %v1094_v23, %v287_v32  ;;  %v356_v47 = vmul.f32 %v1099_v24, %v292_v33  ;;  %v350_v49 = vmul.f32 %v1093_v28, %v286_v34  ;;  %v352_v50 = vmul.f32 %v1095_v31, %v288_v35 }
  0x47   : > { %v355_v56 = vmul.f32 %v1098_v36, %v291_v41  ;;  %v349_v48 = vmul.f32 %v1092_v37, %v285_v43  ;;  %v492_v52 = vrot.slane %v1536_v19, 1  ;;  %v354_v53 = vmul.f32 %v1097_v38, %v290_v44 }
  0x48   : > { %v415_v57 = vadd.f32 %v1102_v26, %v351_v46  ;;  %v420_v58 = vadd.f32 %v1107_v27, %v356_v47  ;;  %v414_v59 = vadd.f32 %v1101_v39, %v350_v49  ;;  %v416_v60 = vadd.f32 %v1103_v40, %v352_v50 }
  0x49   : > { %v419_v61 = vadd.f32 %v1106_v42, %v355_v56  ;;  %v413_v62 = vadd.f32 %v1100_v51, %v349_v48  ;;  %v418_v63 = vadd.f32 %v1105_v54, %v354_v53  ;;  %v353_v0 = vmul.f32 %v1096_v55, %v289_v45 }
  0x4a   : > { %v423_v1 = vmax.f32 %v415_v57, 0.0  ;;  %v428_v2 = vmax.f32 %v420_v58, 0.0  ;;  %v422_v3 = vmax.f32 %v414_v59, 0.0  ;;  %v424_v4 = vmax.f32 %v416_v60, 0.0 }
  0x4b   : > { %v427_v6 = vmax.f32 %v419_v61, 0.0  ;;  %v421_v7 = vmax.f32 %v413_v62, 0.0  ;;  %v426_v8 = vmax.f32 %v418_v63, 0.0  ;;  %v1600_v15 = vsel %vm491_vm3, %v492_v52, %v493_v29 }
  0x4c   : > { %v441_v9 = vrot.slane %v423_v1, 7  ;;  %v446_v10 = vrot.slane %v428_v2, 7  ;;  %v440_v11 = vrot.slane %v422_v3, 7  ;;  %v1597_v12 = vrot.slane %v424_v4, 7 }
  0x4d   : > { %v445_v13 = vrot.slane %v427_v6, 7  ;;  %v439_v14 = vrot.slane %v421_v7, 7  ;;  %v1602_v16 = vadd.f32 %v1104_v5, %v353_v0  ;;  %v444_v21 = vrot.slane %v426_v8, 7 }
  0x4e   : > { %v1605_v17 = vsel %vm456_vm1, 0.0, %v441_v9  ;;  %v1608_v18 = vsel %vm456_vm1, 0.0, %v446_v10  ;;  %v1611_v20 = vsel %vm456_vm1, 0.0, %v440_v11  ;;  %v1619_v24 = vsel %vm456_vm1, 0.0, %v1597_v12 }
  0x4f   : > { %v1282_v22 = vpack.i.bf16 %v1608_v18, %v1605_v17  ;;  %v1277_v23 = vpack.i.bf16 %v1560_v30, %v1611_v20  ;;  %v1622_v25 = vsel %vm456_vm1, 0.0, %v445_v13  ;;  %v1625_v26 = vsel %vm456_vm1, %v446_v10, 0.0 }
  0x50   : > { %v1292_v27 = vpack.i.bf16 %v1536_v19, %v1619_v24  ;;  %v1287_v28 = vpack.i.bf16 %v1622_v25, %v1611_v20  ;;  %v1632_v29 = vsel %vm456_vm1, 0.0, %v439_v14  ;;  %v468_v31 = vsel %vm456_vm1, %v440_v11, 0.0 }
  0x51   : > { %1283 = vrot.lane.b32.xlu1 %v1282_v22, %s1408_s22  ;;  %1278 = vrot.lane.b32.xlu0 %v1277_v23, %s1408_s22  ;;  %v498_v32 = vrot.slane %v1611_v20, 1  ;;  %v1639_v33 = vsel %vm456_vm1, %v445_v13, 0.0  ;;  %v547_v34 = vrot.slane %v1611_v20, 2  ;;  %v499_v35 = vrot.slane %v468_v31, 1  ;;  %v776_v23 = vld [vmem:[%s1967_s3 + $0xc8] sm:$0xff] }
  0x52   : > { %v548_v36 = vrot.slane %v468_v31, 2  ;;  %v562_v37 = vrot.slane %v1622_v25, 2  ;;  %v563_v38 = vrot.slane %v1639_v33, 2  ;;  %v467_v39 = vsel %vm456_vm1, %v439_v14, 0.0 }
  0x53   : > { %v544_v40 = vrot.slane %v1632_v29, 2  ;;  %v469_v41 = vsel %vm456_vm1, %v441_v9, 0.0  ;;  %v501_v42 = vrot.slane %v1605_v17, 1  ;;  %v1649_v43 = vsel %vm491_vm3, %v498_v32, %v499_v35 }
  0x54   : > { %v1652_v44 = vsel %vm540_vm2, %v547_v34, %v548_v36  ;;  %v1655_v45 = vsel %vm540_vm2, %v562_v37, %v563_v38  ;;  %v545_v46 = vrot.slane %v467_v39, 2  ;;  %v1307_v47 = vpack.i.bf16 %v1632_v29, %v1649_v43  ;;  %v778_v34 = vld [vmem:[%s1967_s3 + $0xd8] sm:$0xff] }
  0x55   : > { %1293 = vrot.lane.b32.xlu1 %v1292_v27, %s1408_s22  ;;  %1288 = vrot.lane.b32.xlu0 %v1287_v28, %s1409_s24  ;;  %v502_v49 = vrot.slane %v469_v41, 1  ;;  %v615_v50 = vrot.slane %v1608_v18, 1  ;;  %v616_v54 = vrot.slane %v1625_v26, 1  ;;  %v1665_v55 = vsel %vm456_vm1, 0.0, %v444_v21  ;;  %v760_v27 = vld [vmem:[%s1967_s3 + $0x48] sm:$0xff] }
  0x56   : > { %v546_v51 = vsel %vm540_vm2, %v544_v40, %v545_v46  ;;  %v472_v56 = vsel %vm456_vm1, %v444_v21, 0.0  ;;  %v1670_v48 = vpack.i.bf16 %v1655_v45, %v1652_v44  ;;  %v495_v53 = vrot.slane %v1632_v29, 1  ;;  %v762_v46 = vld [vmem:[%s1967_s3 + $0x58] sm:$0xff] }
  0x57   : > { %v1302_v52 = vpack.i.bf16 %v1600_v15, %v546_v51  ;;  %v496_v57 = vrot.slane %v467_v39, 1  ;;  %v1675_v58 = vsel %vm491_vm3, %v501_v42, %v502_v49  ;;  %v1678_v59 = vsel %vm491_vm3, %v615_v50, %v616_v54  ;;  %v761_v42 = vld [vmem:[%s1967_s3 + $0x50] sm:$0xff]  ;;  %v779_v49 = vld [vmem:[%s1967_s3 + $0xe0] sm:$0xff]  ;;  %v780_v50 = vld [vmem:[%s1967_s3 + $0xe8] sm:$0xff] }
  0x58   : > { %v510_v60 = vrot.slane %v1665_v55, 1  ;;  %v511_v61 = vrot.slane %v472_v56, 1  ;;  %v550_v63 = vrot.slane %v1605_v17, 2  ;;  %v551_v0 = vrot.slane %v469_v41, 2 }
  0x59   : > { %1298 = vrot.lane.b32.xlu0 %v1282_v22, %s1409_s24  ;;  %1308 = vrot.lane.b32.xlu1 %v1307_v47, %s1409_s24  ;;  %v1684_v62 = vsel %vm491_vm3, %v495_v53, %v496_v57  ;;  %v626_v1 = vrot.slane %v1608_v18, 2  ;;  %v627_v3 = vrot.slane %v1625_v26, 2  ;;  %v559_v4 = vrot.slane %v1665_v55, 2  ;;  %v775_v22 = vld [vmem:[%s1967_s3 + $0xc0] sm:$0xff] }
  0x5a   : > { %v1689_v2 = vsel %vm491_vm3, %v510_v60, %v511_v61  ;;  %v560_v5 = vrot.slane %v472_v56, 2  ;;  %v470_v6 = vsel %vm456_vm1, %v1597_v12, 0.0  ;;  %v425_v7 = vmax.f32 %v1602_v16, 0.0  ;;  %v759_v26 = vld [vmem:[%s1967_s3 + $0x40] sm:$0xff] }
  0x5b   : > { %v1327_v8 = vpack.i.bf16 %v1678_v59, %v1675_v58  ;;  %v1317_v9 = vpack.i.bf16 %v1689_v2, %v1684_v62  ;;  %v1704_v10 = vsel %vm540_vm2, %v550_v63, %v551_v0  ;;  %v504_v11 = vrot.slane %v1619_v24, 1  ;;  %v763_v61 = vld [vmem:[%s1967_s3 + $0x60] sm:$0xff]  ;;  %v781_v63 = vld [vmem:[%s1967_s3 + $0xf0] sm:$0xff]  ;;  %v782_v0 = vld [vmem:[%s1967_s3 + $0xf8] sm:$0xff] }
  0x5c   : > { %v505_v12 = vrot.slane %v470_v6, 1  ;;  %v1708_v13 = vsel %vm540_vm2, %v626_v1, %v627_v3  ;;  %v1711_v14 = vsel %vm540_vm2, %v559_v4, %v560_v5  ;;  %v513_v16 = vrot.slane %v1622_v25, 1 }
  0x5d   : > { %1313 = vrot.lane.b32.xlu1 %v1670_v48, %s1410_s25  ;;  %1303 = vrot.lane.b32.xlu0 %v1302_v52, %s1410_s25  ;;  %v514_v18 = vrot.slane %v1639_v33, 1  ;;  %v443_v21 = vrot.slane %v425_v7, 7  ;;  %v1332_v28 = vpack.i.bf16 %v1708_v13, %v1704_v10  ;;  %v1322_v31 = vpack.i.bf16 %v1711_v14, %v546_v51  ;;  %v777_v33 = vld [vmem:[%s1967_s3 + $0xd0] sm:$0xff] }
  0x5e   : > { %v1733_v32 = vsel %vm491_vm3, %v504_v11, %v505_v12  ;;  %v553_v36 = vrot.slane %v1619_v24, 2  ;;  %v554_v37 = vrot.slane %v470_v6, 2  ;;  %v1225_v38 = vpack.c.bf16 %v776_v23, %v775_v22 }
  0x5f   : > { %v1742_v35 = vsel %vm491_vm3, %v513_v16, %v514_v18  ;;  %v1746_v39 = vsel %vm456_vm1, 0.0, %v443_v21  ;;  %v471_v40 = vsel %vm456_vm1, %v443_v21, 0.0  ;;  %v1227_v41 = vpack.c.bf16 %v760_v27, %v759_v26  ;;  %v783_v16 = vld [vmem:[%s1967_s3 + $0x100] sm:$0xff]  ;;  %v784_v18 = vld [vmem:[%s1967_s3 + $0x108] sm:$0xff] }
  0x60   : > { %1226 = vmatprep.subr.bf16.mxu0 %v1225_v38  ;;  %v1229_v47 = vpack.c.bf16 %v778_v34, %v777_v33  ;;  %v1347_v51 = vpack.i.bf16 %v1600_v15, %v1733_v32  ;;  %v1337_v54 = vpack.i.bf16 %v1742_v35, %v1649_v43  ;;  %v1768_v56 = vsel %vm540_vm2, %v553_v36, %v554_v37  ;;  %v764_v15 = vld [vmem:[%s1967_s3 + $0x68] sm:$0xff] }
  0x61   : > { %1328 = vrot.lane.b32.xlu1 %v1327_v8, %s1409_s24  ;;  %1318 = vrot.lane.b32.xlu0 %v1317_v9, %s1410_s25  ;;  %v507_v52 = vrot.slane %v1746_v39, 1  ;;  %v508_v53 = vrot.slane %v471_v40, 1  ;;  %v1231_v57 = vpack.c.bf16 %v762_v46, %v761_v42  ;;  %v1233_v60 = vpack.c.bf16 %v780_v50, %v779_v49  ;;  %v765_v8 = vld [vmem:[%s1967_s3 + $0x70] sm:$0xff]  ;;  %v766_v9 = vld [vmem:[%s1967_s3 + $0x78] sm:$0xff] }
  0x62   : > { %1228 = vmatpush3.bf16.msra.mxu0 %v1227_v41  ;;  %1253 = vmatprep.subr.bf16.mxu1 %v1225_v38  ;;  %v1352_v1 = vpack.i.bf16 %v1675_v58, %v1768_v56  ;;  %v556_v4 = vrot.slane %v1746_v39, 2  ;;  %v557_v5 = vrot.slane %v471_v40, 2  ;;  %v1235_v6 = vpack.c.bf16 %v764_v15, %v763_v61 }
  0x63   : > { %1230 = vmatprep.subr.bf16.mxu0 %v1229_v47  ;;  %1261 = vmatpush3.bf16.msra.mxu1 %v1227_v41  ;;  %v1788_v3 = vsel %vm491_vm3, %v507_v52, %v508_v53  ;;  %v1237_v7 = vpack.c.bf16 %v782_v0, %v781_v63  ;;  %v1357_v11 = vpack.i.bf16 %v1704_v10, %v1746_v39 }
  0x64   : > { %1254 = vmatprep.subr.bf16.mxu1 %v1229_v47  ;;  %v1362_v12 = vpack.i.bf16 %v1619_v24, %v1788_v3  ;;  %v1811_v21 = vsel %vm540_vm2, %v556_v4, %v557_v5  ;;  %v1813_v22 = vpack.c.bf16 %v784_v18, %v783_v16  ;;  %v1372_v26 = vpack.i.bf16 %v1768_v56, %v1665_v55 }
  0x65   : > { %1333 = vrot.lane.b32.xlu1 %v1332_v28, %s1410_s25  ;;  %1323 = vrot.lane.b32.xlu0 %v1322_v31, %s1408_s22  ;;  %v1367_v23 = vpack.i.bf16 %v1733_v32, %v1811_v21  ;;  %v1377_v27 = vpack.i.bf16 %v1746_v39, %v1689_v2  ;;  %v1382_v28 = vpack.i.bf16 %v1788_v3, %v1711_v14 }
  0x66   : > { %1232 = vmatpush3.bf16.msra.mxu0 %v1231_v57  ;;  %v1387_v31 = vpack.i.bf16 %v1811_v21, %v1622_v25  ;;  %v1392_v33 = vpack.i.bf16 %v1665_v55, %v1742_v35 }
  0x67   : > { %1234 = vmatprep.subr.bf16.mxu0 %v1233_v60  ;;  %1262 = vmatpush3.bf16.msra.mxu1 %v1231_v57 }
  0x68   : > { %1255 = vmatprep.subr.bf16.mxu1 %v1233_v60 }
  0x69   : > { %1348 = vrot.lane.b32.xlu1 %v1347_v51, %s1409_s24  ;;  %1338 = vrot.lane.b32.xlu0 %v1337_v54, %s1410_s25 }
  0x6a   : > { %1236 = vmatpush3.bf16.msra.mxu0 %v1235_v6 }
  0x6b   : > { %1238 = vmatprep.subr.bf16.mxu0 %v1237_v7  ;;  %1263 = vmatpush3.bf16.msra.mxu1 %v1235_v6 }
  0x6c   : > { %1256 = vmatprep.subr.bf16.mxu1 %v1237_v7 }
  0x6d   : > { %1343 = vrot.lane.b32.xlu0 %v1670_v48, %s1408_s22  ;;  %1353 = vrot.lane.b32.xlu1 %v1352_v1, %s1410_s25  ;;  %v1239_v48 = vpack.c.bf16 %v766_v9, %v765_v8 }
  0x6f   : > { %1240 = vmatpush3.bf16.msra.mxu0 %v1239_v48  ;;  %1264 = vmatpush3.bf16.msra.mxu1 %v1239_v48 }
  0x70   : > { %1242 = vmatprep.subr.bf16.mxu1 %v1813_v22 }
  0x71   : > { %1358 = vrot.lane.b32.xlu0 %v1357_v11, %s1408_s22  ;;  %1363 = vrot.lane.b32.xlu1 %v1362_v12, %s1409_s24 }
  0x75   : > { %1368 = vrot.lane.b32.xlu0 %v1367_v23, %s1410_s25  ;;  %1373 = vrot.lane.b32.xlu1 %v1372_v26, %s1408_s22 }
  0x79   : > { %1378 = vrot.lane.b32.xlu0 %v1377_v27, %s1409_s24  ;;  %1383 = vrot.lane.b32.xlu1 %v1382_v28, %s1410_s25 }
  0x7d   : > { %1388 = vrot.lane.b32.xlu0 %v1387_v31, %s1408_s22  ;;  %1393 = vrot.lane.b32.xlu1 %v1392_v33, %s1409_s24 }
  0xc3   : > { %v1284_v34 = vpop.permute.xlu1 %1283  ;;  %v1279_v36 = vpop.permute.xlu0 %1278 }
  0xc4   : > { %v1286_v54 = vunpack.i.h.bf16 %v1284_v34  ;;  %v1285_v52 = vunpack.i.l.bf16 %v1284_v34  ;;  %v1281_v53 = vunpack.i.h.bf16 %v1279_v36  ;;  %v1280_v57 = vunpack.i.l.bf16 %v1279_v36 }
  0xc7   : > { %v1836_v37 = vpop.permute.xlu1 %1293  ;;  %v1838_v38 = vpop.permute.xlu0 %1288 }
  0xcb   : > { %v1840_v40 = vpop.permute.xlu0 %1298  ;;  %v1309_v41 = vpop.permute.xlu1 %1308 }
  0xcc   : > { %v1311_v0 = vunpack.i.h.bf16 %v1309_v41  ;;  %v1310_v1 = vunpack.i.l.bf16 %v1309_v41  ;;  %v1291_v41 = vunpack.i.h.bf16 %v1838_v38 }
  0xcf   : > { %v1314_v42 = vpop.permute.xlu1 %1313  ;;  %v1304_v46 = vpop.permute.xlu0 %1303 }
  0xd0   : > { %v1316_v47 = vunpack.i.h.bf16 %v1314_v42  ;;  %v1315_v49 = vunpack.i.l.bf16 %v1314_v42  ;;  %v1306_v50 = vunpack.i.h.bf16 %v1304_v46  ;;  %v1305_v51 = vunpack.i.l.bf16 %v1304_v46 }
  0xd1   : > { %v1290_v42 = vunpack.i.l.bf16 %v1838_v38  ;;  %v1295_v38 = vunpack.i.l.bf16 %v1836_v37 }
  0xd2   : > { %v727_v60 = vsel %vm233_vm0, %v1684_v62, %v1305_v51  ;;  %v701_v61 = vsel %vm233_vm0, %v1536_v19, %v1306_v50  ;;  %v733_v15 = vsel %vm233_vm0, %v1742_v35, %v1316_v47  ;;  %v728_v63 = vsel %vm233_vm0, %v1649_v43, %v1315_v49  ;;  %v785_v35 = vld [vmem:[%s1967_s3 + $0x110] sm:$0xff]  ;;  %v786_v43 = vld [vmem:[%s1967_s3 + $0x118] sm:$0xff] }
  0xd3   : > { %v1329_v4 = vpop.permute.xlu1 %1328  ;;  %v1319_v5 = vpop.permute.xlu0 %1318  ;;  %v735_v6 = vsel %vm709_vm4, %v727_v60, %v1280_v57  ;;  %v710_v7 = vsel %vm709_vm4, %v701_v61, %v1281_v53  ;;  %v741_v62 = vsel %vm709_vm4, %v733_v15, %v1286_v54  ;;  %v736_v19 = vsel %vm709_vm4, %v728_v63, %v1285_v52 }
  0xd4   : > { %v1331_v8 = vunpack.i.h.bf16 %v1329_v4  ;;  %v1330_v9 = vunpack.i.l.bf16 %v1329_v4  ;;  %v1321_v11 = vunpack.i.h.bf16 %v1319_v5  ;;  %v1320_v12 = vunpack.i.l.bf16 %v1319_v5 }
  0xd5   : > { %v743_v16 = vsel %vm718_vm5, %v735_v6, %v1310_v1  ;;  %v719_v18 = vsel %vm718_vm5, %v710_v7, %v1311_v0  ;;  %v1245_v28 = vpack.c.bf16 %v786_v43, %v785_v35  ;;  %v1296_v52 = vunpack.i.h.bf16 %v1836_v37 }
  0xd6   : > { %874 = vmatprep.mubr.f32.mxu0 %v743_v16  ;;  %v749_v48 = vsel %vm718_vm5, %v741_v62, %v1331_v8  ;;  %v744_v23 = vsel %vm718_vm5, %v736_v19, %v1330_v9  ;;  %v702_v46 = vsel %vm233_vm0, %v1632_v29, %v1320_v12  ;;  %v707_v47 = vsel %vm233_vm0, %v1665_v55, %v1321_v11 }
  0xd7   : > { %875 = vmatmul.mubr.f32.vlgmr.msra.gmra.mrb[0].mxu0 %v719_v18  ;;  %v1334_v26 = vpop.permute.xlu1 %1333  ;;  %904 = vmatprep.mubr.f32.mxu1 %v749_v48  ;;  %v1324_v27 = vpop.permute.xlu0 %1323  ;;  %v1301_v5 = vunpack.i.h.bf16 %v1840_v40  ;;  %v1300_v6 = vunpack.i.l.bf16 %v1840_v40 }
  0xd8   : > { %v1336_v31 = vunpack.i.h.bf16 %v1334_v26  ;;  %v1335_v33 = vunpack.i.l.bf16 %v1334_v26  ;;  %v1326_v34 = vunpack.i.h.bf16 %v1324_v27  ;;  %v1325_v36 = vunpack.i.l.bf16 %v1324_v27  ;;  %879 = vmatprep.mubr.f32.mxu0 %v744_v23 }
  0xda   : > { %v711_v49 = vsel %vm709_vm4, %v702_v46, %v1325_v36  ;;  %v716_v50 = vsel %vm709_vm4, %v707_v47, %v1326_v34  ;;  %v729_v51 = vsel %vm233_vm0, %v1675_v58, %v1335_v33  ;;  %v734_v54 = vsel %vm233_vm0, %v1678_v59, %v1336_v31 }
  0xdb   : > { %v1349_v53 = vpop.permute.xlu1 %1348  ;;  %v1339_v57 = vpop.permute.xlu0 %1338  ;;  %v720_v29 = vsel %vm718_vm5, %v711_v49, %v1290_v42  ;;  %v725_v55 = vsel %vm718_vm5, %v716_v50, %v1291_v41  ;;  %v737_v58 = vsel %vm709_vm4, %v729_v51, %v1295_v38  ;;  %v742_v59 = vsel %vm709_vm4, %v734_v54, %v1296_v52 }
  0xdc   : > { %v1351_v60 = vunpack.i.h.bf16 %v1349_v53  ;;  %v1350_v61 = vunpack.i.l.bf16 %v1349_v53  ;;  %880 = vmatmul.mubr.f32.gmra.mrb[2].mxu0 %v720_v29  ;;  %905 = vmatmul.mubr.f32.vlgmr.msra.gmra.mrb[0].mxu1 %v725_v55  ;;  %v1341_v15 = vunpack.i.h.bf16 %v1339_v57  ;;  %v1340_v63 = vunpack.i.l.bf16 %v1339_v57 }
  0xdd   : > { %1244 = vmatpush3.bf16.msra.mxu1 %v1813_v22 }
  0xde   : > { %v745_v37 = vsel %vm718_vm5, %v737_v58, %v1350_v61  ;;  %v750_v0 = vsel %vm718_vm5, %v742_v59, %v1351_v60  ;;  %1246 = vmatprep.subr.bf16.mxu1 %v1245_v28  ;;  %v703_v22 = vsel %vm233_vm0, %v1611_v20, %v1340_v63  ;;  %v708_v19 = vsel %vm233_vm0, %v1622_v25, %v1341_v15 }
  0xdf   : > { %v1344_v1 = vpop.permute.xlu0 %1343  ;;  %884 = vmatprep.mubr.f32.mxu0 %v745_v37  ;;  %909 = vmatprep.mubr.f32.mxu1 %v750_v0  ;;  %v1354_v4 = vpop.permute.xlu1 %1353 }
  0xe0   : > { %v1346_v7 = vunpack.i.h.bf16 %v1344_v1  ;;  %v1345_v8 = vunpack.i.l.bf16 %v1344_v1  ;;  %v1356_v9 = vunpack.i.h.bf16 %v1354_v4  ;;  %v1355_v62 = vunpack.i.l.bf16 %v1354_v4 }
  0xe1   : > { %1248 = vmatpush3.bf16.msra.mxu1 %v1245_v28 }
  0xe2   : > { %v712_v35 = vsel %vm709_vm4, %v703_v22, %v1345_v8  ;;  %v717_v43 = vsel %vm709_vm4, %v708_v19, %v1346_v7  ;;  %v730_v20 = vsel %vm233_vm0, %v1733_v32, %v1355_v62  ;;  %v704_v25 = vsel %vm233_vm0, %v1605_v17, %v1356_v9  ;;  %v1108_v9 = vld [vmem:[%s1968_s4] ss:$0 sm:$0xff] }
  0xe3   : > { %v1359_v11 = vpop.permute.xlu0 %1358  ;;  %v1364_v12 = vpop.permute.xlu1 %1363  ;;  %v721_v16 = vsel %vm718_vm5, %v712_v35, %v1300_v6  ;;  %v726_v40 = vsel %vm718_vm5, %v717_v43, %v1301_v5 }
  0xe4   : > { %v1361_v18 = vunpack.i.h.bf16 %v1359_v11  ;;  %v1360_v48 = vunpack.i.l.bf16 %v1359_v11  ;;  %v1366_v23 = vunpack.i.h.bf16 %v1364_v12  ;;  %v1365_v26 = vunpack.i.l.bf16 %v1364_v12  ;;  %885 = vmatmul.mubr.f32.gmra.mrb[4].mxu0 %v721_v16  ;;  %910 = vmatmul.mubr.f32.gmra.mrb[2].mxu1 %v726_v40 }
  0xe5   : > { %1197 = vmatprep.mubr.msk.f32.mxu1 %vm233_vm0, %v1652_v44 }
  0xe6   : > { %v738_v27 = vsel %vm709_vm4, %v730_v20, %v1360_v48  ;;  %v713_v28 = vsel %vm709_vm4, %v704_v25, %v1361_v18 }
  0xe7   : > { %v1369_v31 = vpop.permute.xlu0 %1368  ;;  %v1374_v33 = vpop.permute.xlu1 %1373  ;;  %v746_v34 = vsel %vm718_vm5, %v738_v27, %v1365_v26  ;;  %v722_v36 = vsel %vm718_vm5, %v713_v28, %v1366_v23 }
  0xe8   : > { %v1371_v41 = vunpack.i.h.bf16 %v1369_v31  ;;  %v1370_v42 = vunpack.i.l.bf16 %v1369_v31  ;;  %889 = vmatprep.mubr.f32.mxu0 %v746_v34  ;;  %1198 = vmatmul.mubr.msk.f32.vlgmr.msra.gmra.mrb[4].mxu1 %vm233_vm0, %v1704_v10  ;;  %v1376_v44 = vunpack.i.h.bf16 %v1374_v33  ;;  %v1375_v32 = vunpack.i.l.bf16 %v1374_v33 }
  0xe9   : > { %890 = vmatmul.mubr.f32.gmra.mrb[6].mxu0 %v722_v36  ;;  %1200 = vmatprep.mubr.msk.f32.mxu1 %vm233_vm0, %v1768_v56 }
  0xea   : > { %v731_v17 = vsel %vm233_vm0, %v1788_v3, %v1370_v42  ;;  %v705_v46 = vsel %vm233_vm0, %v1619_v24, %v1371_v41 }
  0xeb   : > { %v1379_v47 = vpop.permute.xlu0 %1378  ;;  %v1384_v49 = vpop.permute.xlu1 %1383  ;;  %v739_v52 = vsel %vm709_vm4, %v731_v17, %v1375_v32  ;;  %v714_v56 = vsel %vm709_vm4, %v705_v46, %v1376_v44 }
  0xec   : > { %v1381_v50 = vunpack.i.h.bf16 %v1379_v47  ;;  %v1380_v51 = vunpack.i.l.bf16 %v1379_v47  ;;  %1201 = vmatmul.mubr.msk.f32.gmra.mrb[6].mxu1 %vm233_vm0, %v1811_v21  ;;  %v1386_v10 = vunpack.i.h.bf16 %v1384_v49  ;;  %v1385_v54 = vunpack.i.l.bf16 %v1384_v49 }
  0xed   : > { %1203 = vmatprep.mubr.msk.f32.mxu1 %vm233_vm0, %v1711_v14 }
  0xee   : > { %v747_v3 = vsel %vm718_vm5, %v739_v52, %v1380_v51  ;;  %v723_v24 = vsel %vm718_vm5, %v714_v56, %v1381_v50  ;;  %v732_v14 = vsel %vm233_vm0, %v1689_v2, %v1385_v54  ;;  %v706_v60 = vsel %vm233_vm0, %v1746_v39, %v1386_v10 }
  0xef   : > { %v1389_v38 = vpop.permute.xlu0 %1388  ;;  %894 = vmatprep.mubr.f32.mxu0 %v747_v3  ;;  %v1394_v53 = vpop.permute.xlu1 %1393 }
  0xf0   : > { %v1391_v57 = vunpack.i.h.bf16 %v1389_v38  ;;  %v1390_v29 = vunpack.i.l.bf16 %v1389_v38  ;;  %v1396_v55 = vunpack.i.h.bf16 %v1394_v53  ;;  %v1395_v21 = vunpack.i.l.bf16 %v1394_v53  ;;  %895 = vmatmul.mubr.f32.gmra.mrb[8].mxu0 %v723_v24  ;;  %1204 = vmatmul.mubr.msk.f32.gmra.mrb[8].mxu1 %vm233_vm0, %v1655_v45 }
  0xf1   : > { %1206 = vmatprep.mubr.msk.f32.mxu1 %vm233_vm0, %v1708_v13 }
  0xf2   : > { %v740_v61 = vsel %vm709_vm4, %v732_v14, %v1390_v29  ;;  %v715_v15 = vsel %vm709_vm4, %v706_v60, %v1391_v57 }
  0xf3   : > { %v748_v63 = vsel %vm718_vm5, %v740_v61, %v1395_v21  ;;  %v724_v58 = vsel %vm718_vm5, %v715_v15, %v1396_v55 }
  0xf4   : > { %899 = vmatprep.mubr.f32.mxu0 %v748_v63  ;;  %1207 = vmatmul.mubr.msk.f32.gmra.mrb[10].mxu1 %vm233_vm0, %v1560_v30 }
  0xf5   : > { %900 = vmatmul.mubr.f32.gmra.mrb[10].mxu0 %v724_v58 }
 0x1aa   : > { %v1153_v45 = vpop.f32.mrb[0].mxu0 }
 0x1ab   : > { %v1154_v13 = vpop.f32.mrb[1].mxu0 }
 0x1ac   : > { %v1155_v2 = vadd.f32 %v1154_v13, %v1153_v45 }
 0x1ae   : > { %v877_v35 = vadd.f32 %v1155_v2, %v1108_v9 }
 0x1af   : > { %v1156_v59 = vpop.f32.mrb[2].mxu0  ;;  %v1171_v37 = vpop.f32.mrb[0].mxu1 }
 0x1b0   : > { %v1157_v39 = vpop.f32.mrb[3].mxu0  ;;  %v1172_v0 = vpop.f32.mrb[1].mxu1 }
 0x1b1   : > { %v1158_v1 = vadd.f32 %v1157_v39, %v1156_v59  ;;  %v1173_v4 = vadd.f32 %v1172_v0, %v1171_v37 }
 0x1b3   : > { %v882_v22 = vadd.f32 %v1158_v1, %v1108_v9  ;;  %v907_v32 = vadd.f32 %v1173_v4, %v1108_v9 }
 0x1b7   : > { %v1159_v5 = vpop.f32.mrb[4].mxu0  ;;  %v1174_v6 = vpop.f32.mrb[2].mxu1 }
 0x1b8   : > { %v1160_v7 = vpop.f32.mrb[5].mxu0  ;;  %v1175_v8 = vpop.f32.mrb[3].mxu1 }
 0x1b9   : > { %v1161_v30 = vadd.f32 %v1160_v7, %v1159_v5  ;;  %v1176_v62 = vadd.f32 %v1175_v8, %v1174_v6 }
 0x1bb   : > { %v1199_v19 = vpop.f32.mrb[4].mxu1  ;;  %v887_v23 = vadd.f32 %v1161_v30, %v1108_v9  ;;  %v912_v41 = vadd.f32 %v1176_v62, %v1108_v9 }
 0x1bc   : > { %v987_v43 = vadd.f32 %v1199_v19, %v882_v22  ;;  %v1162_v11 = vpop.f32.mrb[6].mxu0  ;;  %v981_v12 = vpop.f32.mrb[5].mxu1 }
 0x1bd   : > { %v982_v16 = vadd.f32 %v981_v12, %v877_v35  ;;  %v1163_v40 = vpop.f32.mrb[7].mxu0 }
 0x1be   : > { %1021 = vst.msk [vmem:[%s1943_s28 + $0x8] sm:$0xff] %vm233_vm0, %v987_v43  ;;  %v1164_v18 = vadd.f32 %v1163_v40, %v1162_v11 }
 0x1bf   : > { %1020 = vst.msk [vmem:[%s1943_s28] sm:$0xff] %vm233_vm0, %v982_v16  ;;  %v1202_v48 = vpop.f32.mrb[6].mxu1 }
 0x1c0   : > { %v892_v26 = vadd.f32 %v1164_v18, %v1108_v9  ;;  %v991_v20 = vpop.f32.mrb[7].mxu1 }
 0x1c1   : > { %v992_v25 = vadd.f32 %v991_v20, %v887_v23 }
 0x1c2   : > { %v997_v27 = vadd.f32 %v1202_v48, %v892_v26 }
 0x1c3   : > { %1022 = vst.msk [vmem:[%s1943_s28 + $0x10] sm:$0xff] %vm233_vm0, %v992_v25  ;;  %v1165_v28 = vpop.f32.mrb[8].mxu0  ;;  %v1205_v31 = vpop.f32.mrb[8].mxu1 }
 0x1c4   : > { %1023 = vst.msk [vmem:[%s1943_s28 + $0x18] sm:$0xff] %vm233_vm0, %v997_v27  ;;  %v1166_v33 = vpop.f32.mrb[9].mxu0  ;;  %v1001_v34 = vpop.f32.mrb[9].mxu1 }
 0x1c5   : > { %v1167_v36 = vadd.f32 %v1166_v33, %v1165_v28 }
 0x1c7   : > { %v897_v42 = vadd.f32 %v1167_v36, %v1108_v9  ;;  %v1208_v44 = vpop.f32.mrb[10].mxu1 }
 0x1c8   : > { %v1017_v17 = vadd.f32 %v1208_v44, %v912_v41  ;;  %v1168_v46 = vpop.f32.mrb[10].mxu0  ;;  %v1011_v47 = vpop.f32.mrb[11].mxu1 }
 0x1c9   : > { %v1002_v49 = vadd.f32 %v1001_v34, %v897_v42  ;;  %v1012_v50 = vadd.f32 %v1011_v47, %v907_v32  ;;  %v1169_v51 = vpop.f32.mrb[11].mxu0 }
 0x1ca   : > { %1027 = vst.msk [vmem:[%s1943_s28 + $0x38] sm:$0xff] %vm233_vm0, %v1017_v17  ;;  %v1170_v10 = vadd.f32 %v1169_v51, %v1168_v46 }
 0x1cb   : > { %1024 = vst.msk [vmem:[%s1943_s28 + $0x20] sm:$0xff] %vm233_vm0, %v1002_v49  ;;  %1026 = vst.msk [vmem:[%s1943_s28 + $0x30] sm:$0xff] %vm233_vm0, %v1012_v50 }
 0x1cc   : > { %v902_v54 = vadd.f32 %v1170_v10, %v1108_v9 }
 0x1ce   : > { %v1007_v52 = vadd.f32 %v1205_v31, %v902_v54 }
 0x1d0   : > { %1025 = vst.msk [vmem:[%s1943_s28 + $0x28] sm:$0xff] %vm233_vm0, %v1007_v52 }
 0x1d1 PF: > { %s15_s18 = sadd.s32 1, %s1405_s18  }
 0x1d2   : > { %p12_p4 = scmp.ge.s32.totalorder %s15_s18, 4  }
 0x1d4   :  { %14 = sbr.rel (!%p12_p4) target bundleno = 1 (0x1), region = 70 }

// kernel: asr_forward.14
= control target key start
LH: loop header
LB: loop body
LE: loop exit
PB: predicated region body
PF: predicated region fallthrough
CT: control target
= control target key end

     0   :  { %vm132_vm0 = vcmask 261120   ;;  %s363_s1 = inlined_call_operand.vmem [shape: f32[256,32], index: 1, kind: input, shape index: {}]   ;;  %s364_s0 = inlined_call_operand.vmem [shape: f32[16,256], index: 0, kind: input, shape index: {}]   ;;  %s365_s2 = inlined_call_operand.vmem [shape: f32[1,32], index: 2, kind: input, shape index: {}]   ;;  %s366_s3 = inlined_call_operand.vmem [shape: f32[16,32], index: 3, kind: output, shape index: {}]  }
   0x1   :  { %v34_v0 = vld [vmem:[%s363_s1 + $0x80] sm:$0xff]  ;;  %v35_v1 = vld [vmem:[%s363_s1 + $0x88] sm:$0xff]  ;;  %v36_v5 = vld [vmem:[%s363_s1 + $0x90] sm:$0xff] }
   0x2   :  { %v18_v2 = vld [vmem:[%s363_s1] sm:$0xff]  ;;  %v178_v3 = vpack.c.bf16 %v35_v1, %v34_v0  ;;  %v19_v4 = vld [vmem:[%s363_s1 + $0x8] sm:$0xff]  ;;  %v37_v6 = vld [vmem:[%s363_s1 + $0x98] sm:$0xff] }
   0x3   :  { %v180_v7 = vpack.c.bf16 %v19_v4, %v18_v2  ;;  %v182_v8 = vpack.c.bf16 %v37_v6, %v36_v5  ;;  %v20_v9 = vld [vmem:[%s363_s1 + $0x10] sm:$0xff]  ;;  %v21_v10 = vld [vmem:[%s363_s1 + $0x18] sm:$0xff]  ;;  %v38_v11 = vld [vmem:[%s363_s1 + $0xa0] sm:$0xff] }
   0x4   :  { %179 = vmatprep.subr.bf16.mxu0 %v178_v3  ;;  %210 = vmatprep.subr.bf16.mxu1 %v178_v3  ;;  %v39_v12 = vld [vmem:[%s363_s1 + $0xa8] sm:$0xff]  ;;  %v184_v13 = vpack.c.bf16 %v21_v10, %v20_v9  ;;  %v22_v15 = vld [vmem:[%s363_s1 + $0x20] sm:$0xff]  ;;  %v40_v17 = vld [vmem:[%s363_s1 + $0xb0] sm:$0xff] }
   0x5   :  { %181 = vmatpush3.bf16.msra.mxu0 %v180_v7  ;;  %218 = vmatpush3.bf16.msra.mxu1 %v180_v7  ;;  %v186_v14 = vpack.c.bf16 %v39_v12, %v38_v11  ;;  %v23_v16 = vld [vmem:[%s363_s1 + $0x28] sm:$0xff]  ;;  %v41_v18 = vld [vmem:[%s363_s1 + $0xb8] sm:$0xff]  ;;  %v24_v21 = vld [vmem:[%s363_s1 + $0x30] sm:$0xff] }
   0x6   :  { %183 = vmatprep.subr.bf16.mxu0 %v182_v8  ;;  %211 = vmatprep.subr.bf16.mxu1 %v182_v8  ;;  %v188_v19 = vpack.c.bf16 %v23_v16, %v22_v15  ;;  %v190_v20 = vpack.c.bf16 %v41_v18, %v40_v17  ;;  %v25_v22 = vld [vmem:[%s363_s1 + $0x38] sm:$0xff]  ;;  %v42_v23 = vld [vmem:[%s363_s1 + $0xc0] sm:$0xff]  ;;  %v43_v24 = vld [vmem:[%s363_s1 + $0xc8] sm:$0xff] }
   0x7   :  { %v15_v25 = vld [vmem:[%s364_s0 + $0x8] sm:$0xff]  ;;  %v17_v26 = vld [vmem:[%s364_s0 + $0x18] sm:$0xff]  ;;  %v192_v27 = vpack.c.bf16 %v25_v22, %v24_v21  ;;  %v194_v28 = vpack.c.bf16 %v43_v24, %v42_v23  ;;  %v26_v29 = vld [vmem:[%s363_s1 + $0x40] sm:$0xff] }
   0x8   :  { %121 = vmatprep.mubr.f32.mxu0 %v15_v25  ;;  %v27_v30 = vld [vmem:[%s363_s1 + $0x48] sm:$0xff]  ;;  %v44_v31 = vld [vmem:[%s363_s1 + $0xd0] sm:$0xff]  ;;  %v45_v32 = vld [vmem:[%s363_s1 + $0xd8] sm:$0xff]  ;;  %126 = vmatprep.mubr.f32.mxu1 %v17_v26 }
   0x9   :  { %185 = vmatpush3.bf16.msra.mxu0 %v184_v13  ;;  %219 = vmatpush3.bf16.msra.mxu1 %v184_v13  ;;  %v196_v33 = vpack.c.bf16 %v27_v30, %v26_v29  ;;  %v198_v34 = vpack.c.bf16 %v45_v32, %v44_v31  ;;  %v28_v35 = vld [vmem:[%s363_s1 + $0x50] sm:$0xff]  ;;  %v29_v36 = vld [vmem:[%s363_s1 + $0x58] sm:$0xff]  ;;  %v46_v37 = vld [vmem:[%s363_s1 + $0xe0] sm:$0xff] }
   0xa   :  { %187 = vmatprep.subr.bf16.mxu0 %v186_v14  ;;  %212 = vmatprep.subr.bf16.mxu1 %v186_v14  ;;  %v47_v38 = vld [vmem:[%s363_s1 + $0xe8] sm:$0xff]  ;;  %v200_v39 = vpack.c.bf16 %v29_v36, %v28_v35  ;;  %v30_v41 = vld [vmem:[%s363_s1 + $0x60] sm:$0xff]  ;;  %v48_v43 = vld [vmem:[%s363_s1 + $0xf0] sm:$0xff] }
   0xb   :  { %v202_v40 = vpack.c.bf16 %v47_v38, %v46_v37  ;;  %v31_v42 = vld [vmem:[%s363_s1 + $0x68] sm:$0xff]  ;;  %v49_v44 = vld [vmem:[%s363_s1 + $0xf8] sm:$0xff]  ;;  %v32_v47 = vld [vmem:[%s363_s1 + $0x70] sm:$0xff] }
   0xc   :  { %v204_v45 = vpack.c.bf16 %v31_v42, %v30_v41  ;;  %v206_v46 = vpack.c.bf16 %v49_v44, %v48_v43  ;;  %v33_v48 = vld [vmem:[%s363_s1 + $0x78] sm:$0xff]  ;;  %v14_v50 = vld [vmem:[%s364_s0] sm:$0xff]  ;;  %v16_v51 = vld [vmem:[%s364_s0 + $0x10] sm:$0xff] }
   0xd   :  { %189 = vmatpush3.bf16.msra.mxu0 %v188_v19  ;;  %220 = vmatpush3.bf16.msra.mxu1 %v188_v19  ;;  %v208_v49 = vpack.c.bf16 %v33_v48, %v32_v47  ;;  %v139_v54 = vld [vmem:[%s365_s2] ss:$0 sm:$0xff] }
   0xe   :  { %191 = vmatprep.subr.bf16.mxu0 %v190_v20  ;;  %213 = vmatprep.subr.bf16.mxu1 %v190_v20 }
  0x11   :  { %193 = vmatpush3.bf16.msra.mxu0 %v192_v27  ;;  %221 = vmatpush3.bf16.msra.mxu1 %v192_v27 }
  0x12   :  { %195 = vmatprep.subr.bf16.mxu0 %v194_v28  ;;  %214 = vmatprep.subr.bf16.mxu1 %v194_v28 }
  0x15   :  { %197 = vmatpush3.bf16.msra.mxu0 %v196_v33  ;;  %222 = vmatpush3.bf16.msra.mxu1 %v196_v33 }
  0x16   :  { %199 = vmatprep.subr.bf16.mxu0 %v198_v34  ;;  %215 = vmatprep.subr.bf16.mxu1 %v198_v34 }
  0x19   :  { %201 = vmatpush3.bf16.msra.mxu0 %v200_v39  ;;  %223 = vmatpush3.bf16.msra.mxu1 %v200_v39 }
  0x1a   :  { %203 = vmatprep.subr.bf16.mxu0 %v202_v40  ;;  %216 = vmatprep.subr.bf16.mxu1 %v202_v40 }
  0x1d   :  { %205 = vmatpush3.bf16.msra.mxu0 %v204_v45  ;;  %224 = vmatpush3.bf16.msra.mxu1 %v204_v45 }
  0x1e   :  { %207 = vmatprep.subr.bf16.mxu0 %v206_v46  ;;  %217 = vmatprep.subr.bf16.mxu1 %v206_v46 }
  0x21   :  { %209 = vmatpush3.bf16.msra.mxu0 %v208_v49  ;;  %225 = vmatpush3.bf16.msra.mxu1 %v208_v49 }
  0x24   :  { %122 = vmatmul.mubr.f32.vlgmr.msra.gmra.mrb[0].mxu0 %v14_v50  ;;  %127 = vmatmul.mubr.f32.vlgmr.msra.gmra.mrb[0].mxu1 %v16_v51 }
  0xf7   :  { %v172_v52 = vpop.f32.mrb[0].mxu0  ;;  %v175_v53 = vpop.f32.mrb[0].mxu1 }
  0xf8   :  { %v173_v55 = vpop.f32.mrb[1].mxu0  ;;  %v176_v56 = vpop.f32.mrb[1].mxu1 }
  0xf9   :  { %v174_v57 = vadd.f32 %v173_v55, %v172_v52  ;;  %v177_v58 = vadd.f32 %v176_v56, %v175_v53 }
  0xfb   :  { %v124_v59 = vadd.f32 %v174_v57, %v139_v54  ;;  %v129_v60 = vadd.f32 %v177_v58, %v139_v54 }
  0xfd   :  { %133 = vst.msk [vmem:[%s366_s3] sm:$0xff] %vm132_vm0, %v124_v59  ;;  %134 = vst.msk [vmem:[%s366_s3 + $0x8] sm:$0xff] %vm132_vm0, %v129_v60 }

// kernel: asr_forward.11
= control target key start
LH: loop header
LB: loop body
LE: loop exit
PB: predicated region body
PF: predicated region fallthrough
CT: control target
= control target key end

     0   :  { %s1524_s21 = smov 0   ;;  %s2058_s0 = inlined_call_operand.vmem [shape: f32[2,8,8,32], index: 0, kind: input, shape index: {}]   ;;  %s2059_s1 = inlined_call_operand.vmem [shape: f32[8,1,32], index: 1, kind: input, shape index: {}]   ;;  %s2060_s2 = inlined_call_operand.vmem [shape: f32[8,1,32], index: 2, kind: input, shape index: {}]   ;;  %s2061_s3 = inlined_call_operand.vmem [shape: f32[288,32], index: 3, kind: input, shape index: {}]   ;;  %s2062_s4 = inlined_call_operand.vmem [shape: f32[1,32], index: 4, kind: input, shape index: {}]   ;;  %s2063_s5 = inlined_call_operand.vmem [shape: f32[2,8,8,32], index: 5, kind: input, shape index: {}]   ;;  %s2064_s6 = inlined_call_operand.vmem [shape: f32[2,8,8,32], index: 6, kind: output, shape index: {}]  }
   0x1 LB: > { %s1158_s22 = sadd.s32 4294967295, %s1483_s21   ;;  %p1162_p0 = scmp.ge.s32.totalorder %s1483_s21, 1  ;;  %s1483_s21 = sphi %s1524_s21, %s16_s21  }
   0x2   : > { %p222_p1 = scmp.lt.s32.totalorder %s1483_s21, 3 }
   0x4   : > { %p223_p2 = pnand %p1162_p0, %p222_p1 }
   0x5   : > { %p257_p3 = scmp.lt.s32.totalorder (!%p223_p2), %s1158_s22, 1  ;;  %vm280_vm0 = vcmask (!%p223_p2), 261120   ;;  %v814_v10 = vld [vmem:[%s2061_s3 + $0x80] sm:$0xff] (!%p223_p2)  ;;  %v815_v13 = vld [vmem:[%s2061_s3 + $0x88] sm:$0xff] (!%p223_p2)  ;;  %v816_v21 = vld [vmem:[%s2061_s3 + $0x90] sm:$0xff] (!%p223_p2)  ;;  %vm503_vm1 = vcmask (!%p223_p2), 1040384  }
   0x6   : > { %226 = sbr.rel (%p223_p2) target bundleno = 467 (0x1d3), region = 44  ;;  %v1287_v16 = vpack.c.bf16 (!%p223_p2), %v815_v13, %v814_v10  ;;  %v798_v17 = vld [vmem:[%s2061_s3] sm:$0xff] (!%p223_p2)  ;;  %v799_v18 = vld [vmem:[%s2061_s3 + $0x8] sm:$0xff] (!%p223_p2)  ;;  %v817_v22 = vld [vmem:[%s2061_s3 + $0x98] sm:$0xff] (!%p223_p2)  ;;  %vm587_vm2 = vcmask (!%p223_p2), 1045504   ;;  %vm538_vm3 = vcmask (!%p223_p2), 1046528  }
   0x7   : > { %v1289_v20 = vpack.c.bf16 (!%p223_p2), %v799_v18, %v798_v17  ;;  %v800_v23 = vld [vmem:[%s2061_s3 + $0x10] sm:$0xff] (!%p223_p2)  ;;  %v1291_v25 = vpack.c.bf16 (!%p223_p2), %v817_v22, %v816_v21  ;;  %v801_v26 = vld [vmem:[%s2061_s3 + $0x18] sm:$0xff] (!%p223_p2)  ;;  %v818_v27 = vld [vmem:[%s2061_s3 + $0xa0] sm:$0xff] (!%p223_p2)  ;;  %v1485_v17 = vmov (!%p223_p2), 0.0   ;;  %s1486_s25 = smov (!%p223_p2), 64   ;;  %s1487_s27 = smov (!%p223_p2), 96  }
   0x8   : > { %1288 = vmatprep.subr.bf16.mxu0 (!%p223_p2), %v1287_v16  ;;  %1327 = vmatprep.subr.bf16.mxu1 (!%p223_p2), %v1287_v16  ;;  %v819_v28 = vld [vmem:[%s2061_s3 + $0xa8] sm:$0xff] (!%p223_p2)  ;;  %v1293_v31 = vpack.c.bf16 (!%p223_p2), %v801_v26, %v800_v23  ;;  %v802_v34 = vld [vmem:[%s2061_s3 + $0x20] sm:$0xff] (!%p223_p2)  ;;  %v820_v37 = vld [vmem:[%s2061_s3 + $0xb0] sm:$0xff] (!%p223_p2)  ;;  %v485_v18 = vrot.slane (!%p223_p2), %v1485_v17, 7  ;;  %s1488_s28 = smov (!%p223_p2), 32   ;;  %vm756_vm4 = vcmask (!%p223_p2), 523264  }
   0x9   : > { %1290 = vmatpush3.bf16.msra.mxu0 (!%p223_p2), %v1289_v20  ;;  %1335 = vmatpush3.bf16.msra.mxu1 (!%p223_p2), %v1289_v20  ;;  %v1295_v33 = vpack.c.bf16 (!%p223_p2), %v819_v28, %v818_v27  ;;  %v803_v35 = vld [vmem:[%s2061_s3 + $0x28] sm:$0xff] (!%p223_p2)  ;;  %v821_v38 = vld [vmem:[%s2061_s3 + $0xb8] sm:$0xff] (!%p223_p2)  ;;  %v804_v43 = vld [vmem:[%s2061_s3 + $0x30] sm:$0xff] (!%p223_p2)  ;;  %vm765_vm5 = vcmask (!%p223_p2), 785408  }
   0xa   : > { %1292 = vmatprep.subr.bf16.mxu0 (!%p223_p2), %v1291_v25  ;;  %1328 = vmatprep.subr.bf16.mxu1 (!%p223_p2), %v1291_v25  ;;  %v1297_v41 = vpack.c.bf16 (!%p223_p2), %v803_v35, %v802_v34  ;;  %v1299_v42 = vpack.c.bf16 (!%p223_p2), %v821_v38, %v820_v37  ;;  %v805_v44 = vld [vmem:[%s2061_s3 + $0x38] sm:$0xff] (!%p223_p2)  ;;  %v1620_v20 = vsel (!%p223_p2), %vm503_vm1, %v485_v18, 0.0  ;;  %v1171_v23 = vld [vmem:[%s2059_s1 + $0x2] ss:$0 sm:$0xff] (!%p223_p2)  ;;  %v1184_v27 = vld [vmem:[%s2060_s2 + $0x7] ss:$0 sm:$0xff] (!%p223_p2) }
   0xb   : > { %v1301_v47 = vpack.c.bf16 (!%p223_p2), %v805_v44, %v804_v43  ;;  %v589_v22 = vrot.slane (!%p223_p2), %v1620_v20, 2  ;;  %v1179_v26 = vld [vmem:[%s2060_s2 + $0x2] ss:$0 sm:$0xff] (!%p223_p2)  ;;  %v1170_v28 = vld [vmem:[%s2059_s1 + $0x1] ss:$0 sm:$0xff] (!%p223_p2) }
   0xc   : > { %v1169_v37 = vld [vmem:[%s2059_s1] ss:$0 sm:$0xff] (!%p223_p2)  ;;  %v1174_v38 = vld [vmem:[%s2059_s1 + $0x5] ss:$0 sm:$0xff] (!%p223_p2) }
   0xd   : > { %s2066_s22 = smov (!%p257_p3, %s1158_s22), 1  ;;  %1294 = vmatpush3.bf16.msra.mxu0 %v1293_v31  ;;  %1336 = vmatpush3.bf16.msra.mxu1 %v1293_v31  ;;  %v1172_v31 = vld [vmem:[%s2059_s1 + $0x3] ss:$0 sm:$0xff] }
   0xe   : > { %s1532_s23 = sshll.u32 %s2066_s22, 6  ;;  %1296 = vmatprep.subr.bf16.mxu0 %v1295_v33  ;;  %1329 = vmatprep.subr.bf16.mxu1 %v1295_v33 }
   0xf   : > { %s1538_s26 = scalar_lea.vmem %s2058_s0, %s1532_s23  ;;  %s2020_s30 = scalar_lea.vmem %s2063_s5, %s1532_s23 }
  0x10   : > { %v272_v0 = vld [vmem:[%s1538_s26] sm:$0xff]  ;;  %v273_v1 = vld [vmem:[%s1538_s26 + $0x8] sm:$0xff]  ;;  %v274_v2 = vld [vmem:[%s1538_s26 + $0x10] sm:$0xff]  ;;  %s2031_s10 = scalar_lea.vmem %s2064_s6, %s1532_s23 }
  0x11   : > { %v275_v3 = vld [vmem:[%s1538_s26 + $0x18] sm:$0xff]  ;;  %v281_v4 = vsel %vm280_vm0, %v272_v0, 0.0  ;;  %v282_v5 = vsel %vm280_vm0, %v273_v1, 0.0  ;;  %v284_v6 = vsel %vm280_vm0, %v274_v2, 0.0  ;;  %v276_v7 = vld [vmem:[%s1538_s26 + $0x20] sm:$0xff]  ;;  %v277_v11 = vld [vmem:[%s1538_s26 + $0x28] sm:$0xff]  ;;  %1298 = vmatpush3.bf16.msra.mxu0 %v1297_v41  ;;  %1337 = vmatpush3.bf16.msra.mxu1 %v1297_v41 }
  0x12   : > { %v283_v8 = vadd.f32 %v282_v5, %v281_v4  ;;  %v286_v9 = vsel %vm280_vm0, %v275_v3, 0.0  ;;  %v278_v14 = vld [vmem:[%s1538_s26 + $0x30] sm:$0xff]  ;;  %v288_v15 = vsel %vm280_vm0, %v276_v7, 0.0  ;;  %v290_v24 = vsel %vm280_vm0, %v277_v11, 0.0  ;;  %v279_v29 = vld [vmem:[%s1538_s26 + $0x38] sm:$0xff]  ;;  %1300 = vmatprep.subr.bf16.mxu0 %v1299_v42  ;;  %1330 = vmatprep.subr.bf16.mxu1 %v1299_v42 }
  0x13   : > { %v292_v32 = vsel %vm280_vm0, %v278_v14, 0.0  ;;  %v294_v39 = vsel %vm280_vm0, %v279_v29, 0.0  ;;  %v1183_v42 = vld [vmem:[%s2060_s2 + $0x6] ss:$0 sm:$0xff] }
  0x14   : > { %v285_v12 = vadd.f32 %v284_v6, %v283_v8 }
  0x15   : > { %1302 = vmatpush3.bf16.msra.mxu0 %v1301_v47  ;;  %1338 = vmatpush3.bf16.msra.mxu1 %v1301_v47 }
  0x16   : > { %v287_v19 = vadd.f32 %v286_v9, %v285_v12 }
  0x18   : > { %v289_v30 = vadd.f32 %v288_v15, %v287_v19  ;;  %v1617_v19 = vsel %vm503_vm1, 0.0, %v485_v18 }
  0x19   : > { %v588_v21 = vrot.slane %v1617_v19, 2 }
  0x1a   : > { %v291_v36 = vadd.f32 %v290_v24, %v289_v30  ;;  %v1176_v24 = vld [vmem:[%s2059_s1 + $0x7] ss:$0 sm:$0xff] }
  0x1b   : > { %v1641_v30 = vsel %vm587_vm2, %v588_v21, %v589_v22 }
  0x1c   : > { %v293_v40 = vadd.f32 %v292_v32, %v291_v36  ;;  %v1175_v36 = vld [vmem:[%s2059_s1 + $0x6] ss:$0 sm:$0xff] }
  0x1e   : > { %v295_v45 = vadd.f32 %v294_v39, %v293_v40  ;;  %v1178_v39 = vld [vmem:[%s2060_s2 + $0x1] ss:$0 sm:$0xff]  ;;  %v1180_v40 = vld [vmem:[%s2060_s2 + $0x3] ss:$0 sm:$0xff] }
  0x20   : > { %v297_v46 = vmul.f32 0.125, %v295_v45 }
  0x22   : > { %v1604_v48 = vsub.f32 %v272_v0, %v297_v46  ;;  %v299_v49 = vsub.f32 %v273_v1, %v297_v46  ;;  %v300_v50 = vsub.f32 %v274_v2, %v297_v46  ;;  %v301_v51 = vsub.f32 %v275_v3, %v297_v46 }
  0x23   : > { %v302_v52 = vsub.f32 %v276_v7, %v297_v46  ;;  %v303_v53 = vsub.f32 %v277_v11, %v297_v46  ;;  %v304_v58 = vsub.f32 %v278_v14, %v297_v46  ;;  %v305_v0 = vsub.f32 %v279_v29, %v297_v46 }
  0x24   : > { %v306_v54 = vmul.f32 %v1604_v48, %v1604_v48  ;;  %v307_v55 = vmul.f32 %v299_v49, %v299_v49  ;;  %v308_v56 = vmul.f32 %v300_v50, %v300_v50  ;;  %v309_v57 = vmul.f32 %v301_v51, %v301_v51 }
  0x25   : > { %v310_v59 = vmul.f32 %v302_v52, %v302_v52  ;;  %v311_v1 = vmul.f32 %v303_v53, %v303_v53  ;;  %v312_v4 = vmul.f32 %v304_v58, %v304_v58  ;;  %v313_v7 = vmul.f32 %v305_v0, %v305_v0 }
  0x26   : > { %v314_v60 = vsel %vm280_vm0, %v306_v54, 0.0  ;;  %v315_v61 = vsel %vm280_vm0, %v307_v55, 0.0  ;;  %v317_v62 = vsel %vm280_vm0, %v308_v56, 0.0  ;;  %v319_v2 = vsel %vm280_vm0, %v309_v57, 0.0  ;;  %v1182_v54 = vld [vmem:[%s2060_s2 + $0x5] ss:$0 sm:$0xff] }
  0x27   : > { %v316_v63 = vadd.f32 %v315_v61, %v314_v60  ;;  %v321_v5 = vsel %vm280_vm0, %v310_v59, 0.0  ;;  %v323_v8 = vsel %vm280_vm0, %v311_v1, 0.0  ;;  %v325_v10 = vsel %vm280_vm0, %v312_v4, 0.0  ;;  %v1173_v55 = vld [vmem:[%s2059_s1 + $0x4] ss:$0 sm:$0xff] }
  0x28   : > { %v327_v12 = vsel %vm280_vm0, %v313_v7, 0.0  ;;  %v540_v29 = vrot.slane %v1620_v20, 1 }
  0x29   : > { %v318_v3 = vadd.f32 %v317_v62, %v316_v63 }
  0x2b   : > { %v320_v6 = vadd.f32 %v319_v2, %v318_v3 }
  0x2d   : > { %v322_v9 = vadd.f32 %v321_v5, %v320_v6  ;;  %v1181_v5 = vld [vmem:[%s2060_s2 + $0x4] ss:$0 sm:$0xff] }
  0x2f   : > { %v324_v11 = vadd.f32 %v323_v8, %v322_v9 }
  0x31   : > { %v326_v13 = vadd.f32 %v325_v10, %v324_v11 }
  0x33   : > { %v328_v14 = vadd.f32 %v327_v12, %v326_v13 }
  0x35   : > { %v329_v15 = vmul.f32 0.125, %v328_v14 }
  0x37   : > { %v330_v16 = vadd.f32 1e-05, %v329_v15 }
  0x39   : > { %1475 = vrsqrt.f32 %v330_v16 }
  0x43   : > { %v1476_v25 = vpop.eup %1475 }
  0x44   : > { %v334_v32 = vmul.f32 %v1476_v25, %v300_v50  ;;  %v339_v33 = vmul.f32 %v1476_v25, %v305_v0  ;;  %v333_v34 = vmul.f32 %v1476_v25, %v299_v49  ;;  %v335_v35 = vmul.f32 %v1476_v25, %v301_v51  ;;  %v1177_v51 = vld [vmem:[%s2060_s2] ss:$0 sm:$0xff] }
  0x45   : > { %v338_v41 = vmul.f32 %v1476_v25, %v304_v58  ;;  %v332_v43 = vmul.f32 %v1476_v25, %v1604_v48  ;;  %v337_v44 = vmul.f32 %v1476_v25, %v303_v53  ;;  %v336_v45 = vmul.f32 %v1476_v25, %v302_v52 }
  0x46   : > { %v398_v46 = vmul.f32 %v1171_v23, %v334_v32  ;;  %v403_v47 = vmul.f32 %v1176_v24, %v339_v33  ;;  %v397_v49 = vmul.f32 %v1170_v28, %v333_v34  ;;  %v399_v50 = vmul.f32 %v1172_v31, %v335_v35 }
  0x47   : > { %v402_v56 = vmul.f32 %v1175_v36, %v338_v41  ;;  %v396_v48 = vmul.f32 %v1169_v37, %v332_v43  ;;  %v539_v52 = vrot.slane %v1617_v19, 1  ;;  %v401_v53 = vmul.f32 %v1174_v38, %v337_v44 }
  0x48   : > { %v462_v57 = vadd.f32 %v1179_v26, %v398_v46  ;;  %v467_v58 = vadd.f32 %v1184_v27, %v403_v47  ;;  %v461_v59 = vadd.f32 %v1178_v39, %v397_v49  ;;  %v463_v60 = vadd.f32 %v1180_v40, %v399_v50 }
  0x49   : > { %v466_v61 = vadd.f32 %v1183_v42, %v402_v56  ;;  %v460_v62 = vadd.f32 %v1177_v51, %v396_v48  ;;  %v465_v63 = vadd.f32 %v1182_v54, %v401_v53  ;;  %v400_v0 = vmul.f32 %v1173_v55, %v336_v45 }
  0x4a   : > { %v470_v1 = vmax.f32 %v462_v57, 0.0  ;;  %v475_v2 = vmax.f32 %v467_v58, 0.0  ;;  %v469_v3 = vmax.f32 %v461_v59, 0.0  ;;  %v471_v4 = vmax.f32 %v463_v60, 0.0 }
  0x4b   : > { %v474_v6 = vmax.f32 %v466_v61, 0.0  ;;  %v468_v7 = vmax.f32 %v460_v62, 0.0  ;;  %v473_v8 = vmax.f32 %v465_v63, 0.0  ;;  %v1681_v15 = vsel %vm538_vm3, %v539_v52, %v540_v29 }
  0x4c   : > { %v488_v9 = vrot.slane %v470_v1, 7  ;;  %v493_v10 = vrot.slane %v475_v2, 7  ;;  %v487_v11 = vrot.slane %v469_v3, 7  ;;  %v1678_v12 = vrot.slane %v471_v4, 7 }
  0x4d   : > { %v492_v13 = vrot.slane %v474_v6, 7  ;;  %v486_v14 = vrot.slane %v468_v7, 7  ;;  %v1683_v16 = vadd.f32 %v1181_v5, %v400_v0  ;;  %v491_v21 = vrot.slane %v473_v8, 7 }
  0x4e   : > { %v1686_v17 = vsel %vm503_vm1, 0.0, %v488_v9  ;;  %v1689_v18 = vsel %vm503_vm1, 0.0, %v493_v10  ;;  %v1692_v20 = vsel %vm503_vm1, 0.0, %v487_v11  ;;  %v1700_v24 = vsel %vm503_vm1, 0.0, %v1678_v12 }
  0x4f   : > { %v1360_v22 = vpack.i.bf16 %v1689_v18, %v1686_v17  ;;  %v1355_v23 = vpack.i.bf16 %v1641_v30, %v1692_v20  ;;  %v1703_v25 = vsel %vm503_vm1, 0.0, %v492_v13  ;;  %v1706_v26 = vsel %vm503_vm1, %v493_v10, 0.0 }
  0x50   : > { %v1370_v27 = vpack.i.bf16 %v1617_v19, %v1700_v24  ;;  %v1365_v28 = vpack.i.bf16 %v1703_v25, %v1692_v20  ;;  %v1713_v29 = vsel %vm503_vm1, 0.0, %v486_v14  ;;  %v515_v31 = vsel %vm503_vm1, %v487_v11, 0.0 }
  0x51   : > { %1361 = vrot.lane.b32.xlu1 %v1360_v22, %s1486_s25  ;;  %1356 = vrot.lane.b32.xlu0 %v1355_v23, %s1486_s25  ;;  %v545_v32 = vrot.slane %v1692_v20, 1  ;;  %v1720_v33 = vsel %vm503_vm1, %v492_v13, 0.0  ;;  %v594_v34 = vrot.slane %v1692_v20, 2  ;;  %v546_v35 = vrot.slane %v515_v31, 1  ;;  %v823_v23 = vld [vmem:[%s2061_s3 + $0xc8] sm:$0xff] }
  0x52   : > { %v595_v36 = vrot.slane %v515_v31, 2  ;;  %v609_v37 = vrot.slane %v1703_v25, 2  ;;  %v610_v38 = vrot.slane %v1720_v33, 2  ;;  %v514_v39 = vsel %vm503_vm1, %v486_v14, 0.0 }
  0x53   : > { %v591_v40 = vrot.slane %v1713_v29, 2  ;;  %v516_v41 = vsel %vm503_vm1, %v488_v9, 0.0  ;;  %v548_v42 = vrot.slane %v1686_v17, 1  ;;  %v1730_v43 = vsel %vm538_vm3, %v545_v32, %v546_v35 }
  0x54   : > { %v1733_v44 = vsel %vm587_vm2, %v594_v34, %v595_v36  ;;  %v1736_v45 = vsel %vm587_vm2, %v609_v37, %v610_v38  ;;  %v592_v46 = vrot.slane %v514_v39, 2  ;;  %v1385_v47 = vpack.i.bf16 %v1713_v29, %v1730_v43  ;;  %v825_v34 = vld [vmem:[%s2061_s3 + $0xd8] sm:$0xff] }
  0x55   : > { %1371 = vrot.lane.b32.xlu1 %v1370_v27, %s1486_s25  ;;  %1366 = vrot.lane.b32.xlu0 %v1365_v28, %s1487_s27  ;;  %v549_v49 = vrot.slane %v516_v41, 1  ;;  %v662_v50 = vrot.slane %v1689_v18, 1  ;;  %v663_v54 = vrot.slane %v1706_v26, 1  ;;  %v1746_v55 = vsel %vm503_vm1, 0.0, %v491_v21  ;;  %v807_v27 = vld [vmem:[%s2061_s3 + $0x48] sm:$0xff] }
  0x56   : > { %v593_v51 = vsel %vm587_vm2, %v591_v40, %v592_v46  ;;  %v519_v56 = vsel %vm503_vm1, %v491_v21, 0.0  ;;  %v1751_v48 = vpack.i.bf16 %v1736_v45, %v1733_v44  ;;  %v542_v53 = vrot.slane %v1713_v29, 1  ;;  %v809_v46 = vld [vmem:[%s2061_s3 + $0x58] sm:$0xff] }
  0x57   : > { %v1380_v52 = vpack.i.bf16 %v1681_v15, %v593_v51  ;;  %v543_v57 = vrot.slane %v514_v39, 1  ;;  %v1756_v58 = vsel %vm538_vm3, %v548_v42, %v549_v49  ;;  %v1759_v59 = vsel %vm538_vm3, %v662_v50, %v663_v54  ;;  %v808_v42 = vld [vmem:[%s2061_s3 + $0x50] sm:$0xff]  ;;  %v826_v49 = vld [vmem:[%s2061_s3 + $0xe0] sm:$0xff]  ;;  %v827_v50 = vld [vmem:[%s2061_s3 + $0xe8] sm:$0xff] }
  0x58   : > { %v557_v60 = vrot.slane %v1746_v55, 1  ;;  %v558_v61 = vrot.slane %v519_v56, 1  ;;  %v597_v63 = vrot.slane %v1686_v17, 2  ;;  %v598_v0 = vrot.slane %v516_v41, 2 }
  0x59   : > { %1376 = vrot.lane.b32.xlu0 %v1360_v22, %s1487_s27  ;;  %1386 = vrot.lane.b32.xlu1 %v1385_v47, %s1487_s27  ;;  %v1765_v62 = vsel %vm538_vm3, %v542_v53, %v543_v57  ;;  %v673_v1 = vrot.slane %v1689_v18, 2  ;;  %v674_v3 = vrot.slane %v1706_v26, 2  ;;  %v606_v4 = vrot.slane %v1746_v55, 2  ;;  %v822_v22 = vld [vmem:[%s2061_s3 + $0xc0] sm:$0xff] }
  0x5a   : > { %v1770_v2 = vsel %vm538_vm3, %v557_v60, %v558_v61  ;;  %v607_v5 = vrot.slane %v519_v56, 2  ;;  %v517_v6 = vsel %vm503_vm1, %v1678_v12, 0.0  ;;  %v472_v7 = vmax.f32 %v1683_v16, 0.0  ;;  %v806_v26 = vld [vmem:[%s2061_s3 + $0x40] sm:$0xff] }
  0x5b   : > { %v1405_v8 = vpack.i.bf16 %v1759_v59, %v1756_v58  ;;  %v1395_v9 = vpack.i.bf16 %v1770_v2, %v1765_v62  ;;  %v1785_v10 = vsel %vm587_vm2, %v597_v63, %v598_v0  ;;  %v551_v11 = vrot.slane %v1700_v24, 1  ;;  %v810_v61 = vld [vmem:[%s2061_s3 + $0x60] sm:$0xff]  ;;  %v828_v63 = vld [vmem:[%s2061_s3 + $0xf0] sm:$0xff]  ;;  %v829_v0 = vld [vmem:[%s2061_s3 + $0xf8] sm:$0xff] }
  0x5c   : > { %v552_v12 = vrot.slane %v517_v6, 1  ;;  %v1789_v13 = vsel %vm587_vm2, %v673_v1, %v674_v3  ;;  %v1792_v14 = vsel %vm587_vm2, %v606_v4, %v607_v5  ;;  %v560_v16 = vrot.slane %v1703_v25, 1 }
  0x5d   : > { %1391 = vrot.lane.b32.xlu1 %v1751_v48, %s1488_s28  ;;  %1381 = vrot.lane.b32.xlu0 %v1380_v52, %s1488_s28  ;;  %v561_v18 = vrot.slane %v1720_v33, 1  ;;  %v490_v21 = vrot.slane %v472_v7, 7  ;;  %v1410_v28 = vpack.i.bf16 %v1789_v13, %v1785_v10  ;;  %v1400_v31 = vpack.i.bf16 %v1792_v14, %v593_v51  ;;  %v824_v33 = vld [vmem:[%s2061_s3 + $0xd0] sm:$0xff] }
  0x5e   : > { %v1814_v32 = vsel %vm538_vm3, %v551_v11, %v552_v12  ;;  %v600_v36 = vrot.slane %v1700_v24, 2  ;;  %v601_v37 = vrot.slane %v517_v6, 2  ;;  %v1303_v38 = vpack.c.bf16 %v823_v23, %v822_v22 }
  0x5f   : > { %v1823_v35 = vsel %vm538_vm3, %v560_v16, %v561_v18  ;;  %v1827_v39 = vsel %vm503_vm1, 0.0, %v490_v21  ;;  %v518_v40 = vsel %vm503_vm1, %v490_v21, 0.0  ;;  %v1305_v41 = vpack.c.bf16 %v807_v27, %v806_v26  ;;  %v830_v16 = vld [vmem:[%s2061_s3 + $0x100] sm:$0xff]  ;;  %v831_v18 = vld [vmem:[%s2061_s3 + $0x108] sm:$0xff] }
  0x60   : > { %1304 = vmatprep.subr.bf16.mxu0 %v1303_v38  ;;  %v1307_v47 = vpack.c.bf16 %v825_v34, %v824_v33  ;;  %v1425_v51 = vpack.i.bf16 %v1681_v15, %v1814_v32  ;;  %v1415_v54 = vpack.i.bf16 %v1823_v35, %v1730_v43  ;;  %v1849_v56 = vsel %vm587_vm2, %v600_v36, %v601_v37  ;;  %v811_v15 = vld [vmem:[%s2061_s3 + $0x68] sm:$0xff] }
  0x61   : > { %1406 = vrot.lane.b32.xlu1 %v1405_v8, %s1487_s27  ;;  %1396 = vrot.lane.b32.xlu0 %v1395_v9, %s1488_s28  ;;  %v554_v52 = vrot.slane %v1827_v39, 1  ;;  %v555_v53 = vrot.slane %v518_v40, 1  ;;  %v1309_v57 = vpack.c.bf16 %v809_v46, %v808_v42  ;;  %v1311_v60 = vpack.c.bf16 %v827_v50, %v826_v49  ;;  %v812_v8 = vld [vmem:[%s2061_s3 + $0x70] sm:$0xff]  ;;  %v813_v9 = vld [vmem:[%s2061_s3 + $0x78] sm:$0xff] }
  0x62   : > { %1306 = vmatpush3.bf16.msra.mxu0 %v1305_v41  ;;  %1331 = vmatprep.subr.bf16.mxu1 %v1303_v38  ;;  %v1430_v1 = vpack.i.bf16 %v1756_v58, %v1849_v56  ;;  %v603_v4 = vrot.slane %v1827_v39, 2  ;;  %v604_v5 = vrot.slane %v518_v40, 2  ;;  %v1313_v6 = vpack.c.bf16 %v811_v15, %v810_v61 }
  0x63   : > { %1308 = vmatprep.subr.bf16.mxu0 %v1307_v47  ;;  %1339 = vmatpush3.bf16.msra.mxu1 %v1305_v41  ;;  %v1869_v3 = vsel %vm538_vm3, %v554_v52, %v555_v53  ;;  %v1315_v7 = vpack.c.bf16 %v829_v0, %v828_v63  ;;  %v1435_v11 = vpack.i.bf16 %v1785_v10, %v1827_v39 }
  0x64   : > { %1332 = vmatprep.subr.bf16.mxu1 %v1307_v47  ;;  %v1440_v12 = vpack.i.bf16 %v1700_v24, %v1869_v3  ;;  %v1892_v21 = vsel %vm587_vm2, %v603_v4, %v604_v5  ;;  %v1894_v22 = vpack.c.bf16 %v831_v18, %v830_v16  ;;  %v1450_v26 = vpack.i.bf16 %v1849_v56, %v1746_v55 }
  0x65   : > { %1411 = vrot.lane.b32.xlu1 %v1410_v28, %s1488_s28  ;;  %1401 = vrot.lane.b32.xlu0 %v1400_v31, %s1486_s25  ;;  %v1445_v23 = vpack.i.bf16 %v1814_v32, %v1892_v21  ;;  %v1455_v27 = vpack.i.bf16 %v1827_v39, %v1770_v2  ;;  %v1460_v28 = vpack.i.bf16 %v1869_v3, %v1792_v14 }
  0x66   : > { %1310 = vmatpush3.bf16.msra.mxu0 %v1309_v57  ;;  %v1465_v31 = vpack.i.bf16 %v1892_v21, %v1703_v25  ;;  %v1470_v33 = vpack.i.bf16 %v1746_v55, %v1823_v35 }
  0x67   : > { %1312 = vmatprep.subr.bf16.mxu0 %v1311_v60  ;;  %1340 = vmatpush3.bf16.msra.mxu1 %v1309_v57 }
  0x68   : > { %1333 = vmatprep.subr.bf16.mxu1 %v1311_v60 }
  0x69   : > { %1426 = vrot.lane.b32.xlu1 %v1425_v51, %s1487_s27  ;;  %1416 = vrot.lane.b32.xlu0 %v1415_v54, %s1488_s28 }
  0x6a   : > { %1314 = vmatpush3.bf16.msra.mxu0 %v1313_v6 }
  0x6b   : > { %1316 = vmatprep.subr.bf16.mxu0 %v1315_v7  ;;  %1341 = vmatpush3.bf16.msra.mxu1 %v1313_v6 }
  0x6c   : > { %1334 = vmatprep.subr.bf16.mxu1 %v1315_v7 }
  0x6d   : > { %1421 = vrot.lane.b32.xlu0 %v1751_v48, %s1486_s25  ;;  %1431 = vrot.lane.b32.xlu1 %v1430_v1, %s1488_s28  ;;  %v1317_v48 = vpack.c.bf16 %v813_v9, %v812_v8 }
  0x6f   : > { %1318 = vmatpush3.bf16.msra.mxu0 %v1317_v48  ;;  %1342 = vmatpush3.bf16.msra.mxu1 %v1317_v48 }
  0x70   : > { %1320 = vmatprep.subr.bf16.mxu1 %v1894_v22 }
  0x71   : > { %1436 = vrot.lane.b32.xlu0 %v1435_v11, %s1486_s25  ;;  %1441 = vrot.lane.b32.xlu1 %v1440_v12, %s1487_s27 }
  0x75   : > { %1446 = vrot.lane.b32.xlu0 %v1445_v23, %s1488_s28  ;;  %1451 = vrot.lane.b32.xlu1 %v1450_v26, %s1486_s25 }
  0x79   : > { %1456 = vrot.lane.b32.xlu0 %v1455_v27, %s1487_s27  ;;  %1461 = vrot.lane.b32.xlu1 %v1460_v28, %s1488_s28 }
  0x7d   : > { %1466 = vrot.lane.b32.xlu0 %v1465_v31, %s1486_s25  ;;  %1471 = vrot.lane.b32.xlu1 %v1470_v33, %s1487_s27 }
  0xc3   : > { %v1362_v34 = vpop.permute.xlu1 %1361  ;;  %v1357_v36 = vpop.permute.xlu0 %1356 }
  0xc4   : > { %v1364_v54 = vunpack.i.h.bf16 %v1362_v34  ;;  %v1363_v52 = vunpack.i.l.bf16 %v1362_v34  ;;  %v1359_v53 = vunpack.i.h.bf16 %v1357_v36  ;;  %v1358_v57 = vunpack.i.l.bf16 %v1357_v36 }
  0xc7   : > { %v1917_v37 = vpop.permute.xlu1 %1371  ;;  %v1919_v38 = vpop.permute.xlu0 %1366 }
  0xcb   : > { %v1921_v40 = vpop.permute.xlu0 %1376  ;;  %v1387_v41 = vpop.permute.xlu1 %1386 }
  0xcc   : > { %v1389_v0 = vunpack.i.h.bf16 %v1387_v41  ;;  %v1388_v1 = vunpack.i.l.bf16 %v1387_v41  ;;  %v1369_v41 = vunpack.i.h.bf16 %v1919_v38 }
  0xcf   : > { %v1392_v42 = vpop.permute.xlu1 %1391  ;;  %v1382_v46 = vpop.permute.xlu0 %1381 }
  0xd0   : > { %v1394_v47 = vunpack.i.h.bf16 %v1392_v42  ;;  %v1393_v49 = vunpack.i.l.bf16 %v1392_v42  ;;  %v1384_v50 = vunpack.i.h.bf16 %v1382_v46  ;;  %v1383_v51 = vunpack.i.l.bf16 %v1382_v46 }
  0xd1   : > { %v1368_v42 = vunpack.i.l.bf16 %v1919_v38  ;;  %v1373_v38 = vunpack.i.l.bf16 %v1917_v37 }
  0xd2   : > { %v774_v60 = vsel %vm280_vm0, %v1765_v62, %v1383_v51  ;;  %v748_v61 = vsel %vm280_vm0, %v1617_v19, %v1384_v50  ;;  %v780_v15 = vsel %vm280_vm0, %v1823_v35, %v1394_v47  ;;  %v775_v63 = vsel %vm280_vm0, %v1730_v43, %v1393_v49  ;;  %v832_v35 = vld [vmem:[%s2061_s3 + $0x110] sm:$0xff]  ;;  %v833_v43 = vld [vmem:[%s2061_s3 + $0x118] sm:$0xff] }
  0xd3   : > { %v1407_v4 = vpop.permute.xlu1 %1406  ;;  %v1397_v5 = vpop.permute.xlu0 %1396  ;;  %v782_v6 = vsel %vm756_vm4, %v774_v60, %v1358_v57  ;;  %v757_v7 = vsel %vm756_vm4, %v748_v61, %v1359_v53  ;;  %v788_v62 = vsel %vm756_vm4, %v780_v15, %v1364_v54  ;;  %v783_v19 = vsel %vm756_vm4, %v775_v63, %v1363_v52 }
  0xd4   : > { %v1409_v8 = vunpack.i.h.bf16 %v1407_v4  ;;  %v1408_v9 = vunpack.i.l.bf16 %v1407_v4  ;;  %v1399_v11 = vunpack.i.h.bf16 %v1397_v5  ;;  %v1398_v12 = vunpack.i.l.bf16 %v1397_v5 }
  0xd5   : > { %v790_v16 = vsel %vm765_vm5, %v782_v6, %v1388_v1  ;;  %v766_v18 = vsel %vm765_vm5, %v757_v7, %v1389_v0  ;;  %v1323_v28 = vpack.c.bf16 %v833_v43, %v832_v35  ;;  %v1374_v52 = vunpack.i.h.bf16 %v1917_v37 }
  0xd6   : > { %921 = vmatprep.mubr.f32.mxu0 %v790_v16  ;;  %v796_v48 = vsel %vm765_vm5, %v788_v62, %v1409_v8  ;;  %v791_v23 = vsel %vm765_vm5, %v783_v19, %v1408_v9  ;;  %v749_v46 = vsel %vm280_vm0, %v1713_v29, %v1398_v12  ;;  %v754_v47 = vsel %vm280_vm0, %v1746_v55, %v1399_v11 }
  0xd7   : > { %922 = vmatmul.mubr.f32.vlgmr.msra.gmra.mrb[0].mxu0 %v766_v18  ;;  %v1412_v26 = vpop.permute.xlu1 %1411  ;;  %951 = vmatprep.mubr.f32.mxu1 %v796_v48  ;;  %v1402_v27 = vpop.permute.xlu0 %1401  ;;  %v1379_v5 = vunpack.i.h.bf16 %v1921_v40  ;;  %v1378_v6 = vunpack.i.l.bf16 %v1921_v40 }
  0xd8   : > { %v1414_v31 = vunpack.i.h.bf16 %v1412_v26  ;;  %v1413_v33 = vunpack.i.l.bf16 %v1412_v26  ;;  %v1404_v34 = vunpack.i.h.bf16 %v1402_v27  ;;  %v1403_v36 = vunpack.i.l.bf16 %v1402_v27  ;;  %926 = vmatprep.mubr.f32.mxu0 %v791_v23 }
  0xda   : > { %v758_v49 = vsel %vm756_vm4, %v749_v46, %v1403_v36  ;;  %v763_v50 = vsel %vm756_vm4, %v754_v47, %v1404_v34  ;;  %v776_v51 = vsel %vm280_vm0, %v1756_v58, %v1413_v33  ;;  %v781_v54 = vsel %vm280_vm0, %v1759_v59, %v1414_v31 }
  0xdb   : > { %v1427_v53 = vpop.permute.xlu1 %1426  ;;  %v1417_v57 = vpop.permute.xlu0 %1416  ;;  %v767_v29 = vsel %vm765_vm5, %v758_v49, %v1368_v42  ;;  %v772_v55 = vsel %vm765_vm5, %v763_v50, %v1369_v41  ;;  %v784_v58 = vsel %vm756_vm4, %v776_v51, %v1373_v38  ;;  %v789_v59 = vsel %vm756_vm4, %v781_v54, %v1374_v52 }
  0xdc   : > { %v1429_v60 = vunpack.i.h.bf16 %v1427_v53  ;;  %v1428_v61 = vunpack.i.l.bf16 %v1427_v53  ;;  %927 = vmatmul.mubr.f32.gmra.mrb[2].mxu0 %v767_v29  ;;  %952 = vmatmul.mubr.f32.vlgmr.msra.gmra.mrb[0].mxu1 %v772_v55  ;;  %v1419_v15 = vunpack.i.h.bf16 %v1417_v57  ;;  %v1418_v63 = vunpack.i.l.bf16 %v1417_v57 }
  0xdd   : > { %1322 = vmatpush3.bf16.msra.mxu1 %v1894_v22 }
  0xde   : > { %v792_v37 = vsel %vm765_vm5, %v784_v58, %v1428_v61  ;;  %v797_v0 = vsel %vm765_vm5, %v789_v59, %v1429_v60  ;;  %1324 = vmatprep.subr.bf16.mxu1 %v1323_v28  ;;  %v750_v22 = vsel %vm280_vm0, %v1692_v20, %v1418_v63  ;;  %v755_v19 = vsel %vm280_vm0, %v1703_v25, %v1419_v15 }
  0xdf   : > { %v1422_v1 = vpop.permute.xlu0 %1421  ;;  %931 = vmatprep.mubr.f32.mxu0 %v792_v37  ;;  %956 = vmatprep.mubr.f32.mxu1 %v797_v0  ;;  %v1432_v4 = vpop.permute.xlu1 %1431 }
  0xe0   : > { %v1424_v7 = vunpack.i.h.bf16 %v1422_v1  ;;  %v1423_v8 = vunpack.i.l.bf16 %v1422_v1  ;;  %v1434_v9 = vunpack.i.h.bf16 %v1432_v4  ;;  %v1433_v62 = vunpack.i.l.bf16 %v1432_v4 }
  0xe1   : > { %1326 = vmatpush3.bf16.msra.mxu1 %v1323_v28 }
  0xe2   : > { %v759_v35 = vsel %vm756_vm4, %v750_v22, %v1423_v8  ;;  %v764_v43 = vsel %vm756_vm4, %v755_v19, %v1424_v7  ;;  %v777_v20 = vsel %vm280_vm0, %v1814_v32, %v1433_v62  ;;  %v751_v25 = vsel %vm280_vm0, %v1686_v17, %v1434_v9 }
  0xe3   : > { %v1437_v11 = vpop.permute.xlu0 %1436  ;;  %v1442_v12 = vpop.permute.xlu1 %1441  ;;  %v768_v16 = vsel %vm765_vm5, %v759_v35, %v1378_v6  ;;  %v773_v40 = vsel %vm765_vm5, %v764_v43, %v1379_v5  ;;  %v1068_v35 = vld [vmem:[%s2020_s30 + $0x8] sm:$0xff] }
  0xe4   : > { %v1439_v18 = vunpack.i.h.bf16 %v1437_v11  ;;  %v1438_v48 = vunpack.i.l.bf16 %v1437_v11  ;;  %v1444_v23 = vunpack.i.h.bf16 %v1442_v12  ;;  %v1443_v26 = vunpack.i.l.bf16 %v1442_v12  ;;  %932 = vmatmul.mubr.f32.gmra.mrb[4].mxu0 %v768_v16  ;;  %957 = vmatmul.mubr.f32.gmra.mrb[2].mxu1 %v773_v40  ;;  %v1067_v40 = vld [vmem:[%s2020_s30] sm:$0xff] }
  0xe5   : > { %1275 = vmatprep.mubr.msk.f32.mxu1 %vm280_vm0, %v1733_v44 }
  0xe6   : > { %v785_v27 = vsel %vm756_vm4, %v777_v20, %v1438_v48  ;;  %v760_v28 = vsel %vm756_vm4, %v751_v25, %v1439_v18 }
  0xe7   : > { %v1447_v31 = vpop.permute.xlu0 %1446  ;;  %v1452_v33 = vpop.permute.xlu1 %1451  ;;  %v793_v34 = vsel %vm765_vm5, %v785_v27, %v1443_v26  ;;  %v769_v36 = vsel %vm765_vm5, %v760_v28, %v1444_v23 }
  0xe8   : > { %v1449_v41 = vunpack.i.h.bf16 %v1447_v31  ;;  %v1448_v42 = vunpack.i.l.bf16 %v1447_v31  ;;  %936 = vmatprep.mubr.f32.mxu0 %v793_v34  ;;  %1276 = vmatmul.mubr.msk.f32.vlgmr.msra.gmra.mrb[4].mxu1 %vm280_vm0, %v1785_v10  ;;  %v1454_v44 = vunpack.i.h.bf16 %v1452_v33  ;;  %v1453_v32 = vunpack.i.l.bf16 %v1452_v33  ;;  %v1069_v33 = vld [vmem:[%s2020_s30 + $0x10] sm:$0xff]  ;;  %v1070_v34 = vld [vmem:[%s2020_s30 + $0x18] sm:$0xff] }
  0xe9   : > { %937 = vmatmul.mubr.f32.gmra.mrb[6].mxu0 %v769_v36  ;;  %1278 = vmatprep.mubr.msk.f32.mxu1 %vm280_vm0, %v1849_v56 }
  0xea   : > { %v778_v17 = vsel %vm280_vm0, %v1869_v3, %v1448_v42  ;;  %v752_v46 = vsel %vm280_vm0, %v1700_v24, %v1449_v41 }
  0xeb   : > { %v1457_v47 = vpop.permute.xlu0 %1456  ;;  %v1462_v49 = vpop.permute.xlu1 %1461  ;;  %v786_v52 = vsel %vm756_vm4, %v778_v17, %v1453_v32  ;;  %v761_v56 = vsel %vm756_vm4, %v752_v46, %v1454_v44 }
  0xec   : > { %v1459_v50 = vunpack.i.h.bf16 %v1457_v47  ;;  %v1458_v51 = vunpack.i.l.bf16 %v1457_v47  ;;  %1279 = vmatmul.mubr.msk.f32.gmra.mrb[6].mxu1 %vm280_vm0, %v1892_v21  ;;  %v1464_v10 = vunpack.i.h.bf16 %v1462_v49  ;;  %v1463_v54 = vunpack.i.l.bf16 %v1462_v49 }
  0xed   : > { %1281 = vmatprep.mubr.msk.f32.mxu1 %vm280_vm0, %v1792_v14 }
  0xee   : > { %v794_v3 = vsel %vm765_vm5, %v786_v52, %v1458_v51  ;;  %v770_v24 = vsel %vm765_vm5, %v761_v56, %v1459_v50  ;;  %v779_v14 = vsel %vm280_vm0, %v1770_v2, %v1463_v54  ;;  %v753_v60 = vsel %vm280_vm0, %v1827_v39, %v1464_v10  ;;  %v1074_v54 = vld [vmem:[%s2020_s30 + $0x38] sm:$0xff]  ;;  %v1071_v56 = vld [vmem:[%s2020_s30 + $0x20] sm:$0xff] }
  0xef   : > { %v1467_v38 = vpop.permute.xlu0 %1466  ;;  %941 = vmatprep.mubr.f32.mxu0 %v794_v3  ;;  %v1472_v53 = vpop.permute.xlu1 %1471 }
  0xf0   : > { %v1469_v57 = vunpack.i.h.bf16 %v1467_v38  ;;  %v1468_v29 = vunpack.i.l.bf16 %v1467_v38  ;;  %v1474_v55 = vunpack.i.h.bf16 %v1472_v53  ;;  %v1473_v21 = vunpack.i.l.bf16 %v1472_v53  ;;  %942 = vmatmul.mubr.f32.gmra.mrb[8].mxu0 %v770_v24  ;;  %1282 = vmatmul.mubr.msk.f32.gmra.mrb[8].mxu1 %vm280_vm0, %v1736_v45  ;;  %v1073_v53 = vld [vmem:[%s2020_s30 + $0x30] sm:$0xff] }
  0xf1   : > { %1284 = vmatprep.mubr.msk.f32.mxu1 %vm280_vm0, %v1789_v13 }
  0xf2   : > { %v787_v61 = vsel %vm756_vm4, %v779_v14, %v1468_v29  ;;  %v762_v15 = vsel %vm756_vm4, %v753_v60, %v1469_v57 }
  0xf3   : > { %v795_v63 = vsel %vm765_vm5, %v787_v61, %v1473_v21  ;;  %v771_v58 = vsel %vm765_vm5, %v762_v15, %v1474_v55 }
  0xf4   : > { %946 = vmatprep.mubr.f32.mxu0 %v795_v63  ;;  %1285 = vmatmul.mubr.msk.f32.gmra.mrb[10].mxu1 %vm280_vm0, %v1641_v30  ;;  %v1185_v30 = vld [vmem:[%s2062_s4] ss:$0 sm:$0xff]  ;;  %v1072_v63 = vld [vmem:[%s2020_s30 + $0x28] sm:$0xff] }
  0xf5   : > { %947 = vmatmul.mubr.f32.gmra.mrb[10].mxu0 %v771_v58 }
 0x1aa   : > { %v1231_v45 = vpop.f32.mrb[0].mxu0 }
 0x1ab   : > { %v1232_v13 = vpop.f32.mrb[1].mxu0 }
 0x1ac   : > { %v1233_v2 = vadd.f32 %v1232_v13, %v1231_v45 }
 0x1ae   : > { %v924_v43 = vadd.f32 %v1233_v2, %v1185_v30 }
 0x1af   : > { %v1234_v59 = vpop.f32.mrb[2].mxu0  ;;  %v1249_v37 = vpop.f32.mrb[0].mxu1 }
 0x1b0   : > { %v1235_v39 = vpop.f32.mrb[3].mxu0  ;;  %v1250_v0 = vpop.f32.mrb[1].mxu1 }
 0x1b1   : > { %v1236_v1 = vadd.f32 %v1235_v39, %v1234_v59  ;;  %v1251_v4 = vadd.f32 %v1250_v0, %v1249_v37 }
 0x1b3   : > { %v929_v22 = vadd.f32 %v1236_v1, %v1185_v30  ;;  %v954_v52 = vadd.f32 %v1251_v4, %v1185_v30 }
 0x1b7   : > { %v1237_v5 = vpop.f32.mrb[4].mxu0  ;;  %v1252_v6 = vpop.f32.mrb[2].mxu1 }
 0x1b8   : > { %v1238_v7 = vpop.f32.mrb[5].mxu0  ;;  %v1253_v8 = vpop.f32.mrb[3].mxu1 }
 0x1b9   : > { %v1239_v9 = vadd.f32 %v1238_v7, %v1237_v5  ;;  %v1254_v62 = vadd.f32 %v1253_v8, %v1252_v6 }
 0x1bb   : > { %v1277_v19 = vpop.f32.mrb[4].mxu1  ;;  %v934_v27 = vadd.f32 %v1239_v9, %v1185_v30  ;;  %v959_v50 = vadd.f32 %v1254_v62, %v1185_v30 }
 0x1bc   : > { %v1034_v11 = vadd.f32 %v1277_v19, %v929_v22  ;;  %v1240_v12 = vpop.f32.mrb[6].mxu0  ;;  %v1028_v16 = vpop.f32.mrb[5].mxu1 }
 0x1bd   : > { %v1029_v18 = vadd.f32 %v1028_v16, %v924_v43  ;;  %v1241_v48 = vpop.f32.mrb[7].mxu0 }
 0x1be   : > { %v1076_v23 = vadd.f32 %v1068_v35, %v1034_v11  ;;  %v1242_v26 = vadd.f32 %v1241_v48, %v1240_v12 }
 0x1bf   : > { %v1075_v20 = vadd.f32 %v1067_v40, %v1029_v18  ;;  %v1280_v25 = vpop.f32.mrb[6].mxu1 }
 0x1c0   : > { %1084 = vst.msk [vmem:[%s2031_s10 + $0x8] sm:$0xff] %vm280_vm0, %v1076_v23  ;;  %v939_v28 = vadd.f32 %v1242_v26, %v1185_v30  ;;  %v1038_v31 = vpop.f32.mrb[7].mxu1 }
 0x1c1   : > { %1083 = vst.msk [vmem:[%s2031_s10] sm:$0xff] %vm280_vm0, %v1075_v20  ;;  %v1039_v36 = vadd.f32 %v1038_v31, %v934_v27 }
 0x1c2   : > { %v1044_v41 = vadd.f32 %v1280_v25, %v939_v28 }
 0x1c3   : > { %v1077_v42 = vadd.f32 %v1069_v33, %v1039_v36  ;;  %v1243_v44 = vpop.f32.mrb[8].mxu0  ;;  %v1283_v32 = vpop.f32.mrb[8].mxu1 }
 0x1c4   : > { %v1078_v17 = vadd.f32 %v1070_v34, %v1044_v41  ;;  %v1244_v46 = vpop.f32.mrb[9].mxu0  ;;  %v1048_v47 = vpop.f32.mrb[9].mxu1 }
 0x1c5   : > { %1085 = vst.msk [vmem:[%s2031_s10 + $0x10] sm:$0xff] %vm280_vm0, %v1077_v42  ;;  %v1245_v49 = vadd.f32 %v1244_v46, %v1243_v44 }
 0x1c6   : > { %1086 = vst.msk [vmem:[%s2031_s10 + $0x18] sm:$0xff] %vm280_vm0, %v1078_v17 }
 0x1c7   : > { %v944_v51 = vadd.f32 %v1245_v49, %v1185_v30  ;;  %v1286_v10 = vpop.f32.mrb[10].mxu1 }
 0x1c8   : > { %v1064_v3 = vadd.f32 %v1286_v10, %v959_v50  ;;  %v1246_v24 = vpop.f32.mrb[10].mxu0  ;;  %v1058_v38 = vpop.f32.mrb[11].mxu1 }
 0x1c9   : > { %v1049_v57 = vadd.f32 %v1048_v47, %v944_v51  ;;  %v1059_v29 = vadd.f32 %v1058_v38, %v954_v52  ;;  %v1247_v55 = vpop.f32.mrb[11].mxu0 }
 0x1ca   : > { %v1082_v21 = vadd.f32 %v1074_v54, %v1064_v3  ;;  %v1248_v14 = vadd.f32 %v1247_v55, %v1246_v24 }
 0x1cb   : > { %v1079_v60 = vadd.f32 %v1071_v56, %v1049_v57  ;;  %v1081_v61 = vadd.f32 %v1073_v53, %v1059_v29 }
 0x1cc   : > { %1090 = vst.msk [vmem:[%s2031_s10 + $0x38] sm:$0xff] %vm280_vm0, %v1082_v21  ;;  %v949_v15 = vadd.f32 %v1248_v14, %v1185_v30 }
 0x1cd   : > { %1087 = vst.msk [vmem:[%s2031_s10 + $0x20] sm:$0xff] %vm280_vm0, %v1079_v60  ;;  %1089 = vst.msk [vmem:[%s2031_s10 + $0x30] sm:$0xff] %vm280_vm0, %v1081_v61 }
 0x1ce   : > { %v1054_v58 = vadd.f32 %v1283_v32, %v949_v15 }
 0x1d0   : > { %v1080_v45 = vadd.f32 %v1072_v63, %v1054_v58 }
 0x1d2   : > { %1088 = vst.msk [vmem:[%s2031_s10 + $0x28] sm:$0xff] %vm280_vm0, %v1080_v45 }
 0x1d3 PF: > { %s16_s21 = sadd.s32 1, %s1483_s21  }
 0x1d4   : > { %p13_p4 = scmp.ge.s32.totalorder %s16_s21, 4  }
 0x1d6   :  { %15 = sbr.rel (!%p13_p4) target bundleno = 1 (0x1), region = 77 }

// kernel: asr_forward.16
= control target key start
LH: loop header
LB: loop body
LE: loop exit
PB: predicated region body
PF: predicated region fallthrough
CT: control target
= control target key end

     0   :  { %vm30_vm0 = vcmask 523264   ;;  %v710_v17 = vmov 0.0   ;;  %s954_s0 = inlined_call_operand.vmem [shape: f32[2,8,64], index: 0, kind: input, shape index: {}]   ;;  %s955_s3 = inlined_call_operand.vmem [shape: f32[64,192], index: 3, kind: input, shape index: {}]   ;;  %s956_s7 = inlined_call_operand.vmem [shape: f32[2,8,32], index: 7, kind: output, shape index: {0}]   ;;  %s957_s8 = inlined_call_operand.vmem [shape: f32[2,8,32], index: 8, kind: output, shape index: {1}]   ;;  %s958_s1 = inlined_call_operand.vmem [shape: f32[1,64], index: 1, kind: input, shape index: {}]   ;;  %s959_s2 = inlined_call_operand.vmem [shape: f32[1,64], index: 2, kind: input, shape index: {}]   ;;  %s960_s4 = inlined_call_operand.vmem [shape: f32[2,32,96], index: 4, kind: input, shape index: {}]   ;;  %s961_s6 = inlined_call_operand.vmem [shape: f32[2,1,96], index: 6, kind: input, shape index: {}]   ;;  %s962_s5 = inlined_call_operand.vmem [shape: f32[1,192], index: 5, kind: input, shape index: {}]  }
   0x1   :  { %v28_v0 = vld [vmem:[%s954_s0] sm:$0xff]  ;;  %v29_v1 = vld [vmem:[%s954_s0 + $0x8] sm:$0xff]  ;;  %v133_v15 = vld [vmem:[%s955_s3 + $0x18] sm:$0xff]  ;;  %228 = vmatprep.mubr.f32.mxu0 %v710_v17  ;;  %234 = vmatprep.mubr.f32.mxu1 %v710_v17 }
   0x2   :  { %v31_v2 = vsel %vm30_vm0, %v28_v0, 0.0  ;;  %v34_v3 = vsel %vm30_vm0, %v29_v1, 0.0  ;;  %v131_v14 = vld [vmem:[%s955_s3 + $0x8] sm:$0xff]  ;;  %v130_v16 = vld [vmem:[%s955_s3] sm:$0xff]  ;;  %v132_v19 = vld [vmem:[%s955_s3 + $0x10] sm:$0xff] }
   0x3   :  { %32 = vadd.xlane.f32.xlu0 %v31_v2  ;;  %v591_v18 = vpack.c.bf16 %v133_v15, %v131_v14  ;;  %v135_v20 = vld [vmem:[%s955_s3 + $0x28] sm:$0xff]  ;;  %v137_v21 = vld [vmem:[%s955_s3 + $0x38] sm:$0xff]  ;;  %v593_v22 = vpack.c.bf16 %v132_v19, %v130_v16  ;;  %v134_v24 = vld [vmem:[%s955_s3 + $0x20] sm:$0xff] }
   0x4   :  { %v595_v23 = vpack.c.bf16 %v137_v21, %v135_v20  ;;  %v136_v25 = vld [vmem:[%s955_s3 + $0x30] sm:$0xff]  ;;  %v139_v26 = vld [vmem:[%s955_s3 + $0x48] sm:$0xff]  ;;  %v141_v27 = vld [vmem:[%s955_s3 + $0x58] sm:$0xff] }
   0x5   :  { %592 = vmatprep.subr.bf16.mxu0 %v591_v18  ;;  %619 = vmatprep.subr.bf16.mxu1 %v591_v18  ;;  %v597_v28 = vpack.c.bf16 %v136_v25, %v134_v24  ;;  %v599_v29 = vpack.c.bf16 %v141_v27, %v139_v26  ;;  %v138_v30 = vld [vmem:[%s955_s3 + $0x40] sm:$0xff]  ;;  %v140_v31 = vld [vmem:[%s955_s3 + $0x50] sm:$0xff]  ;;  %v143_v32 = vld [vmem:[%s955_s3 + $0x68] sm:$0xff] }
   0x6   :  { %594 = vmatpush1.bf16.msra.mxu0 %v593_v22  ;;  %623 = vmatpush1.bf16.msra.mxu1 %v593_v22  ;;  %v145_v33 = vld [vmem:[%s955_s3 + $0x78] sm:$0xff]  ;;  %v601_v34 = vpack.c.bf16 %v140_v31, %v138_v30  ;;  %v142_v36 = vld [vmem:[%s955_s3 + $0x60] sm:$0xff]  ;;  %v144_v37 = vld [vmem:[%s955_s3 + $0x70] sm:$0xff] }
   0x7   :  { %35 = vadd.xlane.f32.xlu0 %v34_v3  ;;  %596 = vmatprep.subr.bf16.mxu0 %v595_v23  ;;  %v603_v35 = vpack.c.bf16 %v145_v33, %v143_v32  ;;  %v605_v38 = vpack.c.bf16 %v144_v37, %v142_v36  ;;  %v535_v46 = vld [vmem:[%s958_s1] ss:$0 sm:$0xff] }
   0x8   :  { %620 = vmatprep.subr.bf16.mxu1 %v595_v23  ;;  %v536_v48 = vld [vmem:[%s959_s2] ss:$0 sm:$0xff] }
   0xa   :  { %598 = vmatpush1.bf16.msra.mxu0 %v597_v28  ;;  %624 = vmatpush1.bf16.msra.mxu1 %v597_v28 }
   0xb   :  { %600 = vmatprep.subr.bf16.mxu0 %v599_v29  ;;  %621 = vmatprep.subr.bf16.mxu1 %v599_v29 }
   0xe   :  { %602 = vmatpush1.bf16.msra.mxu0 %v601_v34  ;;  %625 = vmatpush1.bf16.msra.mxu1 %v601_v34 }
   0xf   :  { %604 = vmatprep.subr.bf16.mxu0 %v603_v35  ;;  %622 = vmatprep.subr.bf16.mxu1 %v603_v35 }
  0x12   :  { %606 = vmatpush1.bf16.msra.mxu0 %v605_v38  ;;  %626 = vmatpush1.bf16.msra.mxu1 %v605_v38 }
  0x90   :  { %v33_v4 = vpop.xlane.xlu0 %32 }
  0x91   :  { %v38_v5 = vmul.f32 0.015625, %v33_v4 }
  0x93   :  { %v770_v6 = vsub.f32 %v28_v0, %v38_v5 }
  0x94   :  { %v36_v7 = vpop.xlane.xlu0 %35 }
  0x95   :  { %v39_v8 = vmul.f32 0.015625, %v36_v7  ;;  %v42_v9 = vmul.f32 %v770_v6, %v770_v6 }
  0x97   :  { %v774_v10 = vsub.f32 %v29_v1, %v39_v8  ;;  %v44_v11 = vsel %vm30_vm0, %v42_v9, 0.0 }
  0x98   :  { %45 = vadd.xlane.f32.xlu1 %v44_v11 }
  0x99   :  { %v43_v12 = vmul.f32 %v774_v10, %v774_v10 }
  0x9b   :  { %v47_v13 = vsel %vm30_vm0, %v43_v12, 0.0 }
  0x9c   :  { %48 = vadd.xlane.f32.xlu1 %v47_v13 }
 0x125   :  { %v46_v39 = vpop.xlane.xlu1 %45 }
 0x126   :  { %v50_v40 = vmul.f32 0.015625, %v46_v39 }
 0x128   :  { %v52_v41 = vadd.f32 1e-05, %v50_v40 }
 0x129   :  { %v49_v42 = vpop.xlane.xlu1 %48 }
 0x12a   :  { %658 = vrsqrt.f32 %v52_v41  ;;  %v51_v43 = vmul.f32 0.015625, %v49_v42  ;;  %v841_v41 = vld [vmem:[%s960_s4] sm:$0xff]  ;;  %v846_v42 = vld [vmem:[%s960_s4 + $0x8] sm:$0xff] }
 0x12c   :  { %v53_v44 = vadd.f32 1e-05, %v51_v43  ;;  %v851_v43 = vld [vmem:[%s960_s4 + $0x10] sm:$0xff] }
 0x12e   :  { %660 = vrsqrt.f32 %v53_v44  ;;  %v856_v44 = vld [vmem:[%s960_s4 + $0x18] sm:$0xff] }
 0x134   :  { %v659_v45 = vpop.eup %658 }
 0x135   :  { %v56_v47 = vmul.f32 %v659_v45, %v770_v6  ;;  %v861_v45 = vld [vmem:[%s960_s4 + $0x20] sm:$0xff] }
 0x137   :  { %v65_v49 = vmul.f32 %v535_v46, %v56_v47  ;;  %v871_v47 = vld [vmem:[%s960_s4 + $0x30] sm:$0xff] }
 0x138   :  { %v661_v50 = vpop.eup %660 }
 0x139   :  { %v57_v51 = vmul.f32 %v661_v50, %v774_v10  ;;  %v74_v52 = vadd.f32 %v536_v48, %v65_v49  ;;  %v881_v49 = vld [vmem:[%s961_s6] ss:$0 sm:$0xff]  ;;  %v886_v50 = vld [vmem:[%s961_s6 + $0x1] ss:$0 sm:$0xff] }
 0x13b   :  { %v78_v53 = vmul.f32 0.70710677, %v74_v52  ;;  %v66_v54 = vmul.f32 %v535_v46, %v57_v51  ;;  %v76_v33 = vmul.f32 0.5, %v74_v52  ;;  %v866_v46 = vld [vmem:[%s960_s4 + $0x28] sm:$0xff]  ;;  %v148_v51 = vlaneseq }
 0x13d   :  { %v80_v55 = vand.u32 2147483647, %v78_v53  ;;  %v75_v56 = vadd.f32 %v536_v48, %v66_v54  ;;  %vm120_vm1 = vcmp.ge.f32.partialorder %v78_v53, 0.0  ;;  %v876_v48 = vld [vmem:[%s960_s4 + $0x38] sm:$0xff]  ;;  %v149_v52 = vshrl.u32 %v148_v51, 7  ;;  %s897_s4 = smov 0  }
 0x13e   :  { %v146_v54 = vld [vmem:[%s962_s5] sm:$0x3] }
 0x13f   :  { %v82_v57 = vmul.f32 0.3275911, %v80_v55  ;;  %v79_v58 = vmul.f32 0.70710677, %v75_v56  ;;  %v108_v63 = vsub.f32 0.0, %v80_v55  ;;  %v77_v38 = vmul.f32 0.5, %v75_v56 }
 0x140   :  { %v150_v53 = vsub.s32 0, %v149_v52 }
 0x141   :  { %v84_v59 = vadd.f32 1.0, %v82_v57  ;;  %v81_v60 = vand.u32 2147483647, %v79_v58  ;;  %v110_v1 = vmul.f32 %v108_v63, %v80_v55  ;;  %vm121_vm2 = vcmp.ge.f32.partialorder %v79_v58, 0.0 }
 0x142   :  { %v154_v55 = vsub.s32 1, %v149_v52  ;;  %v151_v56 = vrot.slane %v146_v54, %v150_v53 }
 0x143   :  { %662 = vrcp.f32 %v84_v59  ;;  %v83_v61 = vmul.f32 0.3275911, %v81_v60  ;;  %v109_v2 = vsub.f32 0.0, %v81_v60  ;;  %v112_v6 = vmul.f32 1.442695, %v110_v1 }
 0x144   :  { %v155_v57 = vrot.slane %v146_v54, %v154_v55 }
 0x145   :  { %v85_v62 = vadd.f32 1.0, %v83_v61  ;;  %v111_v7 = vmul.f32 %v109_v2, %v81_v60  ;;  %v893_v2 = vmov 0.0  }
 0x147   :  { %664 = vrcp.f32 %v85_v62  ;;  %v114_v12 = vmul.f32 1.442695, %v111_v7 }
 0x148   :  { %666 = vpow2.f32 %v112_v6 }
 0x149   :  { %668 = vpow2.f32 %v114_v12 }
 0x14d   :  { %v663_v0 = vpop.eup %662 }
 0x14e   :  { %v90_v3 = vmul.f32 1.0614054, %v663_v0 }
 0x150   :  { %v92_v4 = vadd.f32 -1.4531521, %v90_v3  ;;  %v895_v3 = vmov 0.0  }
 0x151   :  { %v665_v5 = vpop.eup %664 }
 0x152   :  { %v94_v8 = vmul.f32 %v663_v0, %v92_v4  ;;  %v91_v9 = vmul.f32 1.0614054, %v665_v5  ;;  %v667_v23 = vpop.eup %666 }
 0x153   :  { %v669_v28 = vpop.eup %668 }
 0x154   :  { %v96_v10 = vadd.f32 1.4214138, %v94_v8  ;;  %v93_v11 = vadd.f32 -1.4531521, %v91_v9 }
 0x156   :  { %v98_v13 = vmul.f32 %v663_v0, %v96_v10  ;;  %v95_v14 = vmul.f32 %v665_v5, %v93_v11 }
 0x158   :  { %v100_v15 = vadd.f32 -0.28449672, %v98_v13  ;;  %v97_v16 = vadd.f32 1.4214138, %v95_v14 }
 0x15a   :  { %v102_v17 = vmul.f32 %v663_v0, %v100_v15  ;;  %v99_v18 = vmul.f32 %v665_v5, %v97_v16 }
 0x15c   :  { %v104_v19 = vadd.f32 0.2548296, %v102_v17  ;;  %v101_v20 = vadd.f32 -0.28449672, %v99_v18 }
 0x15e   :  { %v106_v21 = vmul.f32 %v663_v0, %v104_v19  ;;  %v103_v22 = vmul.f32 %v665_v5, %v101_v20 }
 0x160   :  { %v116_v24 = vmul.f32 %v667_v23, %v106_v21  ;;  %v105_v25 = vadd.f32 0.2548296, %v103_v22 }
 0x162   :  { %v118_v26 = vsub.f32 1.0, %v116_v24  ;;  %v107_v27 = vmul.f32 %v665_v5, %v105_v25 }
 0x164   :  { %v122_v29 = vsub.f32 0.0, %v118_v26  ;;  %v117_v30 = vmul.f32 %v669_v28, %v107_v27 }
 0x166   :  { %v124_v31 = vsel %vm120_vm1, %v118_v26, %v122_v29  ;;  %v119_v32 = vsub.f32 1.0, %v117_v30 }
 0x167   :  { %v126_v34 = vadd.f32 1.0, %v124_v31 }
 0x168   :  { %v123_v35 = vsub.f32 0.0, %v119_v32 }
 0x169   :  { %v128_v36 = vmul.f32 %v126_v34, %v76_v33 }
 0x16a   :  { %v125_v37 = vsel %vm121_vm2, %v119_v32, %v123_v35 }
 0x16b   :  { %537 = vmatmul.mubr.msk.f32.vlgmr.msra.gmra.mrb[0].mxu0 %vm30_vm0, %v128_v36  ;;  %v127_v39 = vadd.f32 1.0, %v125_v37 }
 0x16d   :  { %v129_v40 = vmul.f32 %v127_v39, %v77_v38 }
 0x16f   :  { %538 = vmatmul.mubr.msk.f32.vlgmr.msra.gmra.mrb[0].mxu1 %vm30_vm0, %v129_v40 }
 0x23e   :  { %v230_v58 = vpop.f32.mrb[0].mxu0 }
 0x23f   :  { %v231_v59 = vadd.f32 %v230_v58, %v151_v56  ;;  %v232_v60 = vpop.f32.mrb[1].mxu0 }
 0x240   :  { %v233_v61 = vadd.f32 %v232_v60, %v155_v57 }
 0x241   :  { %241 = vst [vmem:[#allocation2] sm:$0xff] %v231_v59 }
 0x242   :  { %242 = vst.msk [vmem:[#allocation2 + $0x8] sm:$0xff] %vm30_vm0, %v233_v61  ;;  %v236_v62 = vpop.f32.mrb[0].mxu1 }
 0x243   :  { %v237_v63 = vadd.f32 %v236_v62, %v151_v56  ;;  %v238_v0 = vpop.f32.mrb[1].mxu1 }
 0x244   :  { %v239_v1 = vadd.f32 %v238_v0, %v155_v57 }
 0x245   :  { %243 = vst [vmem:[#allocation2 + $0x10] sm:$0xff] %v237_v63 }
 0x246   :  { %244 = vst.msk [vmem:[#allocation2 + $0x18] sm:$0xff] %vm30_vm0, %v239_v1 }
 0x247 LB: > { %v614_v4 = vpack.c.bf16 %v866_v46, %v861_v45  ;;  %v711_v5 = vmov 0.0|0.0   ;;  %s712_s5 = smov 96   ;;  %v617_v6 = vpack.c.bf16 %v876_v48, %v871_v47  ;;  %v608_v7 = vpack.c.bf16 %v846_v42, %v841_v41  ;;  %s715_s6 = smov 32   ;;  %s708_s4 = sphi %s897_s4, %s262_s4   ;;  %v704_v3 = vphi %v895_v3, %v382_v3   ;;  %v700_v2 = vphi %v893_v2, %v497_v2  }
 0x248   : > { %613 = vmatprep.subr.bf16.mxu1 %v711_v5  ;;  %607 = vmatprep.subr.bf16.mxu0 %v711_v5  ;;  %vm713_vm3 = vmmov 0   ;;  %v714_v8 = vmov 0.0   ;;  %v611_v9 = vpack.c.bf16 %v856_v44, %v851_v43  ;;  %vm284_vm4 = vcmask 261120   ;;  %s265_s17 = ssub.s32 1, %s708_s4  ;;  %s716_s3 = smov 64  }
 0x249   : > { %615 = vmatpush3.bf16.msra.mxu1 %v614_v4  ;;  %282 = vrot.lane.b32.xlu0 %v704_v3, %s712_s5  ;;  %s927_s18 = sshll.u32 %s265_s17, 4  ;;  %s557_s1 = sshll.u32 %s708_s4, 4 }
 0x24a   : > { %616 = vmatprep.subr.bf16.mxu1 %v711_v5  ;;  %588 = vmatprep.mubr.msk.f32.mxu1 %vm713_vm3, %v714_v8  ;;  %s272_s19 = scalar_lea.vmem [#allocation2], %s927_s18  ;;  %s268_s2 = scalar_lea.vmem [#allocation2], %s557_s1 }
 0x24b   : > { %609 = vmatpush3.bf16.msra.mxu0 %v608_v7  ;;  %577 = vmatprep.mubr.msk.f32.mxu0 %vm713_vm3, %v714_v8  ;;  %s556_s20 = sshll.u32 %s265_s17, 3  ;;  %s555_s24 = sshll.u32 %s708_s4, 3 }
 0x24c   : > { %610 = vmatprep.subr.bf16.mxu0 %v711_v5  ;;  %s506_s23 = scalar_lea.vmem %s957_s8, %s556_s20  ;;  %s503_s27 = scalar_lea.vmem %s956_s7, %s555_s24 }
 0x24d   : > { %618 = vmatpush3.bf16.msra.mxu1 %v617_v6  ;;  %v273_v17 = vld [vmem:[%s272_s19] sm:$0xff]  ;;  %v274_v34 = vld [vmem:[%s272_s19 + $0x8] sm:$0xff]  ;;  %s262_s4 = sadd.s32 1, %s708_s4  }
 0x24e   : > { %v269_v26 = vld [vmem:[%s268_s2] sm:$0xff]  ;;  %p259_p0 = scmp.ge.s32.totalorder %s262_s4, 2  }
 0x24f   : > { %612 = vmatpush3.bf16.msra.mxu0 %v611_v9 }
 0x250   : > { %589 = vmatmul.mubr.msk.f32.vlgmr.msra.gmra.mrb[0].mxu1 %vm284_vm4, %v700_v2 }
 0x2bb   : > { %v283_v10 = vpop.permute.xlu0 %282 }
 0x2bc   : > { %578 = vmatmul.mubr.msk.f32.vlgmr.msra.gmra.mrb[0].mxu0 %vm284_vm4, %v283_v10 }
 0x323   : > { %v458_v11 = vpop.f32.mrb[0].mxu1 }
 0x324   : > { %v459_v12 = vadd.f32 %v886_v50, %v458_v11  ;;  %v590_v13 = vpop.f32.mrb[1].mxu1 }
 0x326   : > { %463 = vrot.lane.b32.xlu1 %v459_v12, %s712_s5 }
 0x32a   : > { %480 = vrot.lane.b32.xlu1 %v459_v12, %s715_s6 }
 0x38f   : > { %v353_v14 = vpop.f32.mrb[0].mxu0 }
 0x390   : > { %v354_v15 = vadd.f32 %v881_v49, %v353_v14  ;;  %v579_v16 = vpop.f32.mrb[1].mxu0 }
 0x392   : > { %365 = vrot.lane.b32.xlu0 %v354_v15, %s716_s3  ;;  %v357_v27 = vadd.f32 %v354_v15, %v269_v26 }
 0x394   : > { %v550_v28 = vmul.f32 -1.442695, %v357_v27 }
 0x398   : > { %v464_v18 = vpop.permute.xlu1 %463 }
 0x399   : > { %v466_v19 = vadd.f32 %v464_v18, %v273_v17  ;;  %v473_v40 = vadd.f32 %v464_v18, %v274_v34 }
 0x39b   : > { %v553_v20 = vmul.f32 -1.442695, %v466_v19  ;;  %v554_v52 = vmul.f32 -1.442695, %v473_v40 }
 0x39c   : > { %v481_v23 = vpop.permute.xlu1 %480 }
 0x39d   : > { %670 = vpow2.f32 %v553_v20 }
 0x3a7   : > { %v671_v21 = vpop.eup %670 }
 0x3a8   : > { %v470_v22 = vadd.f32 1.0, %v671_v21 }
 0x3aa   : > { %672 = vrcp.f32 %v470_v22 }
 0x3ab   : > { %674 = vpow2.f32 %v550_v28 }
 0x3b4   : > { %v673_v24 = vpop.eup %672 }
 0x3b5   : > { %v483_v25 = vmul.f32 %v673_v24, %v481_v23  ;;  %v675_v29 = vpop.eup %674 }
 0x3b6   : > { %v361_v30 = vadd.f32 1.0, %v675_v29 }
 0x3b7   : > { %485 = vrot.lane.b32.xlu1 %v483_v25, %s716_s3 }
 0x3b8   : > { %676 = vrcp.f32 %v361_v30 }
 0x3c2   : > { %v677_v31 = vpop.eup %676 }
 0x3c3   : > { %v375_v60 = vsub.f32 1.0, %v677_v31  ;;  %v381_v62 = vmul.f32 %v704_v3, %v677_v31 }
 0x404   : > { %v366_v32 = vpop.permute.xlu0 %365 }
 0x405   : > { %v368_v33 = vmul.f32 %v677_v31, %v366_v32 }
 0x407   : > { %370 = vrot.lane.b32.xlu0 %v368_v33, %s716_s3 }
 0x429   : > { %v486_v35 = vpop.permute.xlu1 %485 }
 0x42a   : > { %v488_v36 = vadd.f32 %v486_v35, %v274_v34 }
 0x42c   : > { %678 = vtanh.f32 %v488_v36 }
 0x436   : > { %v679_v37 = vpop.eup %678 }
 0x437   : > { %492 = vrot.lane.b32.xlu1 %v679_v37, %s712_s5 }
 0x479   : > { %v371_v38 = vpop.permute.xlu0 %370 }
 0x47a   : > { %v373_v39 = vadd.f32 %v371_v38, %v269_v26 }
 0x47c   : > { %680 = vtanh.f32 %v373_v39 }
 0x47d   : > { %682 = vpow2.f32 %v554_v52 }
 0x486   : > { %v681_v51 = vpop.eup %680 }
 0x487   : > { %377 = vrot.lane.b32.xlu0 %v681_v51, %s712_s5  ;;  %v683_v53 = vpop.eup %682 }
 0x488   : > { %v477_v54 = vadd.f32 1.0, %v683_v53 }
 0x48a   : > { %684 = vrcp.f32 %v477_v54 }
 0x494   : > { %v685_v55 = vpop.eup %684 }
 0x495   : > { %v490_v56 = vsub.f32 1.0, %v685_v55  ;;  %v496_v58 = vmul.f32 %v700_v2, %v685_v55 }
 0x4a9   : > { %v493_v57 = vpop.permute.xlu1 %492 }
 0x4aa   : > { %v495_v59 = vmul.f32 %v493_v57, %v490_v56 }
 0x4ac   : > { %v497_v2 = vadd.f32 %v496_v58, %v495_v59  }
 0x4ae   : > { %507 = vst.msk [vmem:[%s506_s23] sm:$0xff] %vm284_vm4, %v497_v2 }
 0x4f9   : > { %v378_v61 = vpop.permute.xlu0 %377 }
 0x4fa   : > { %v380_v63 = vmul.f32 %v378_v61, %v375_v60 }
 0x4fc   : > { %v382_v3 = vadd.f32 %v381_v62, %v380_v63  }
 0x4fe   : > { %499 = vrot.lane.b32.xlu0 %v382_v3, %s712_s5 }
 0x56b   :  { %261 = sbr.rel (!%p259_p0) target bundleno = 583 (0x247), region = 69 }
 0x570   : > { %v500_v0 = vpop.permute.xlu0 %499 }
 0x571   : > { %504 = vst.msk [vmem:[%s503_s27] sm:$0xff] %vm284_vm4, %v500_v0 }

// kernel: asr_forward.17
= control target key start
LH: loop header
LB: loop body
LE: loop exit
PB: predicated region body
PF: predicated region fallthrough
CT: control target
= control target key end

     0   :  { %vm38_vm0 = vcmask 523264   ;;  %s470_s0 = inlined_call_operand.vmem [shape: f32[16,64], index: 0, kind: input, shape index: {}]   ;;  %s471_s1 = inlined_call_operand.vmem [shape: f32[64,32], index: 1, kind: input, shape index: {}]   ;;  %s472_s2 = inlined_call_operand.vmem [shape: f32[1,32], index: 2, kind: input, shape index: {}]   ;;  %s473_s3 = inlined_call_operand.vmem [shape: f32[32,10], index: 3, kind: input, shape index: {}]   ;;  %s474_s4 = inlined_call_operand.vmem [shape: f32[1,10], index: 4, kind: input, shape index: {}]   ;;  %s475_s5 = inlined_call_operand.hbm [shape: f32[16,10], index: 5, kind: output, shape index: {}]  }
   0x1   :  { %v23_v0 = vld [vmem:[%s471_s1] sm:$0xff]  ;;  %v24_v1 = vld [vmem:[%s471_s1 + $0x8] sm:$0xff]  ;;  %v25_v2 = vld [vmem:[%s471_s1 + $0x10] sm:$0xff] }
   0x2   :  { %v310_v3 = vpack.c.bf16 %v24_v1, %v23_v0  ;;  %v26_v4 = vld [vmem:[%s471_s1 + $0x18] sm:$0xff]  ;;  %v27_v6 = vld [vmem:[%s471_s1 + $0x20] sm:$0xff]  ;;  %v28_v7 = vld [vmem:[%s471_s1 + $0x28] sm:$0xff] }
   0x3   :  { %v314_v5 = vpack.c.bf16 %v26_v4, %v25_v2  ;;  %v21_v8 = vld [vmem:[%s470_s0] sm:$0xff]  ;;  %v123_v10 = vld [vmem:[%s473_s3 + $0x8] sm:$0xff] }
   0x4   :  { %311 = vmatprep.subr.bf16.mxu0 %v310_v3  ;;  %296 = vmatprep.mubr.msk.f32.mxu0 %vm38_vm0, %v21_v8  ;;  %v122_v9 = vld [vmem:[%s473_s3] sm:$0xff] }
   0x5   :  { %313 = vmatpush3.bf16.msra.mxu0 %v310_v3  ;;  %v326_v11 = vpack.c.bf16 %v123_v10, %v122_v9 }
   0x6   :  { %10 = vsyncpa [#allocation3], 0  ;;  %315 = vmatprep.subr.bf16.mxu0 %v314_v5  ;;  %v318_v12 = vpack.c.bf16 %v28_v7, %v27_v6  ;;  %v29_v13 = vld [vmem:[%s471_s1 + $0x30] sm:$0xff]  ;;  %v30_v14 = vld [vmem:[%s471_s1 + $0x38] sm:$0xff]  ;;  %vm133_vm1 = vcmask 261120   ;;  %vm215_vm2 = vcmask 80896  }
   0x7   :  { %327 = vmatprep.subr.bf16.mxu1 %v326_v11  ;;  %v322_v15 = vpack.c.bf16 %v30_v14, %v29_v13  ;;  %v22_v16 = vld [vmem:[%s470_s0 + $0x8] sm:$0xff]  ;;  %v124_v17 = vld [vmem:[%s473_s3 + $0x10] sm:$0xff]  ;;  %v125_v18 = vld [vmem:[%s473_s3 + $0x18] sm:$0xff] }
   0x8   :  { %329 = vmatpush3.bf16.msra.mxu1 %v326_v11  ;;  %v330_v19 = vpack.c.bf16 %v125_v18, %v124_v17  ;;  %v258_v20 = vld [vmem:[%s472_s2] ss:$0 sm:$0xff]  ;;  %s369_s2 = smov [#allocation2]  }
   0x9   :  { %317 = vmatpush3.bf16.msra.mxu0 %v314_v5  ;;  %v261_v27 = vld [vmem:[%s474_s4] ss:$0 sm:$0xff]  ;;  %s247_s3 = sshll.u32 %s369_s2, 4  ;;  %s248_s3 = int_to_ptr.vmem [resolvable:$true] %s247_s3 }
   0xa   :  { %319 = vmatprep.subr.bf16.mxu0 %v318_v12  ;;  %331 = vmatprep.subr.bf16.mxu1 %v330_v19  ;;  %s345_s4 = scalar_lea.vmem %s248_s3, 256  ;;  %p350_p1 = scmp.lt.s32.totalorder %s248_s3, %s248_s3 }
   0xb   :  { %p346_p0 = scmp.ne.s32.totalorder %s248_s3, %s345_s4  ;;  %p351_p2 = scmp.lt.s32.totalorder %s345_s4, %s345_s4 }
   0xc   :  { %333 = vmatpush3.bf16.msra.mxu1 %v330_v19 }
   0xd   :  { %321 = vmatpush3.bf16.msra.mxu0 %v318_v12  ;;  %p352_p3 = por %p351_p2, %p350_p1 }
   0xe   :  { %323 = vmatprep.subr.bf16.mxu0 %v322_v15 }
   0xf   :  { %p353_p4 = pnand %p352_p3, %p346_p0 }
  0x11   :  { %325 = vmatpush3.bf16.msra.mxu0 %v322_v15 }
  0x14   :  { %297 = vmatmul.mubr.msk.f32.vlgmr.msra.gmra.mrb[0].mxu0 %vm38_vm0, %v22_v16 }
  0xe7   :  { %v298_v21 = vpop.f32.mrb[0].mxu0 }
  0xe8   :  { %v117_v22 = vadd.f32 %v298_v21, %v258_v20  ;;  %v111_v23 = vpop.f32.mrb[1].mxu0 }
  0xe9   :  { %v112_v24 = vadd.f32 %v258_v20, %v111_v23 }
  0xea   :  { %v121_v26 = vmax.f32 %v117_v22, 0.0 }
  0xeb   :  { %v120_v25 = vmax.f32 %v112_v24, 0.0 }
  0xed   :  { %307 = vmatprep.mubr.msk.f32.mxu1 %vm133_vm1, %v120_v25 }
  0xee   :  { %308 = vmatmul.mubr.msk.f32.vlgmr.msra.gmra.mrb[0].mxu1 %vm133_vm1, %v121_v26 }
 0x1c1   :  { %v309_v28 = vpop.f32.mrb[0].mxu1 }
 0x1c2   :  { %v206_v29 = vpop.f32.mrb[1].mxu1  ;;  %v212_v31 = vadd.f32 %v309_v28, %v261_v27 }
 0x1c3   :  { %v207_v30 = vadd.f32 %v261_v27, %v206_v29 }
 0x1c4   :  { %v219_v33 = vsel %vm215_vm2, %v212_v31, -inf }
 0x1c5   :  { %v216_v32 = vsel %vm215_vm2, %v207_v30, -inf }
 0x1c6   :  { %217 = vmax.xlane.f32.xlu0 %v216_v32 }
 0x1ca   :  { %220 = vmax.xlane.f32.xlu0 %v219_v33 }
 0x253   :  { %v218_v34 = vpop.xlane.xlu0 %217 }
 0x254   :  { %v222_v35 = vsub.f32 %v207_v30, %v218_v34 }
 0x256   :  { %v224_v36 = vmul.f32 1.442695, %v222_v35 }
 0x257   :  { %v221_v37 = vpop.xlane.xlu0 %220 }
 0x258   :  { %337 = vpow2.f32 %v224_v36  ;;  %v223_v38 = vsub.f32 %v212_v31, %v221_v37 }
 0x25a   :  { %v226_v39 = vmul.f32 1.442695, %v223_v38 }
 0x25c   :  { %339 = vpow2.f32 %v226_v39 }
 0x262   :  { %v338_v40 = vpop.eup %337 }
 0x263   :  { %v228_v41 = vsel %vm215_vm2, %v338_v40, 0.0 }
 0x264   :  { %229 = vadd.xlane.f32.xlu1 %v228_v41 }
 0x266   :  { %v340_v42 = vpop.eup %339 }
 0x267   :  { %v231_v43 = vsel %vm215_vm2, %v340_v42, 0.0 }
 0x268   :  { %232 = vadd.xlane.f32.xlu1 %v231_v43 }
 0x2f1   :  { %v230_v44 = vpop.xlane.xlu1 %229 }
 0x2f2   :  { %341 = vlog2.f32 %v230_v44 }
 0x2f5   :  { %v233_v45 = vpop.xlane.xlu1 %232 }
 0x2f6   :  { %343 = vlog2.f32 %v233_v45 }
 0x2fc   :  { %v342_v46 = vpop.eup %341 }
 0x2fd   :  { %v235_v47 = vmul.f32 0.6931472, %v342_v46 }
 0x2ff   :  { %v238_v48 = vsub.f32 %v222_v35, %v235_v47 }
 0x300   :  { %v344_v49 = vpop.eup %343 }
 0x301   :  { %240 = vst.msk [vmem:[#allocation2] sm:$0xff] %vm215_vm2, %v238_v48  ;;  %v237_v50 = vmul.f32 0.6931472, %v344_v49 }
 0x303   :  { %v239_v51 = vsub.f32 %v223_v38, %v237_v50 }
 0x305   :  { %241 = vst.msk [vmem:[#allocation2 + $0x8] sm:$0xff] %vm215_vm2, %v239_v51 }
 0x306   :  { %356 = shalt.err (!%p353_p4)
}
 0x307   :  { %s357_s25 = scalar_lea.hbm %s475_s5, 256 }
 0x308   :  { %p358_p5 = scmp.ne.s32.totalorder %s475_s5, %s357_s25  ;;  %p361_p6 = scmp.lt.u32.totalorder %s357_s25, %s475_s5 }
 0x30a   :  { %p363_p7 = pnand %p361_p6, %p358_p5 }
 0x30c   :  { %366 = shalt.err (!%p363_p7)
}
 0x30d   :  { %s370_s30 = smov 128   ;;  %s371_s6 = smov 8  }
 0x30e   :  { %253 = dma.vmem_to_hbm [thread:$0]  %s248_s3, 256, %s475_s5, [#allocation3], %s370_s30, %s370_s30, %s371_s6  }
 0x30f   :  { %367 = dma.done.wait [#allocation3], 256  }
 0x310   :  { %368 = vsyncadd [#allocation3], 4294967040 }
 0x311   :  { %257 = vsyncpa [#allocation3], 1 }

// kernel: asr_forward.15
= control target key start
LH: loop header
LB: loop body
LE: loop exit
PB: predicated region body
PF: predicated region fallthrough
CT: control target
= control target key end

     0   :  { %v49_v0 = vlaneseq  ;;  %v1298_v4 = vmov 1983009808   ;;  %vm80_vm0 = vcmask 261120   ;;  %v1299_v26 = vmov 269488144   ;;  %s1777_s0 = inlined_call_operand.vmem [shape: f32[8,2,32], index: 0, kind: input, shape index: {}]   ;;  %s1778_s3 = inlined_call_operand.vmem [shape: f32[32,192], index: 3, kind: input, shape index: {}]   ;;  %s1779_s7 = inlined_call_operand.vmem [shape: f32[8,2,32], index: 7, kind: output, shape index: {0}]   ;;  %s1780_s8 = inlined_call_operand.vmem [shape: f32[8,2,32], index: 8, kind: output, shape index: {1}]   ;;  %s1781_s1 = inlined_call_operand.vmem [shape: f32[1,32], index: 1, kind: input, shape index: {}]   ;;  %s1782_s2 = inlined_call_operand.vmem [shape: f32[1,32], index: 2, kind: input, shape index: {}]   ;;  %s1783_s4 = inlined_call_operand.vmem [shape: f32[2,32,96], index: 4, kind: input, shape index: {}]   ;;  %s1784_s6 = inlined_call_operand.vmem [shape: f32[2,1,96], index: 6, kind: input, shape index: {}]   ;;  %s1785_s5 = inlined_call_operand.vmem [shape: f32[1,192], index: 5, kind: input, shape index: {}]  }
   0x1   :  { %v28_v1 = vld [vmem:[%s1777_s0] sm:$0x3]  ;;  %v29_v2 = vld [vmem:[%s1777_s0 + $0x2] sm:$0x3]  ;;  %v30_v3 = vld [vmem:[%s1777_s0 + $0x4] sm:$0x3]  ;;  %v47_v5 = vunpack.c.l.s4 %v1298_v4  ;;  %v93_v27 = vunpack.c.l.s4 %v1299_v26 }
   0x2   :  { %v31_v6 = vld [vmem:[%s1777_s0 + $0x6] sm:$0x3]  ;;  %v1367_v7 = vshrl.u32 %v49_v0, 7  ;;  %v32_v8 = vld [vmem:[%s1777_s0 + $0x8] sm:$0x3]  ;;  %v44_v9 = vcombine.low %v28_v1, %v29_v2  ;;  %vm779_vm9 = vcmask 1041408  }
   0x3   :  { %v45_v10 = vcombine.low %v30_v3, %v31_v6  ;;  %v48_v11 = vunpack.c.0.s8 %v47_v5  ;;  %v33_v12 = vld [vmem:[%s1777_s0 + $0xa] sm:$0x3]  ;;  %v34_v13 = vld [vmem:[%s1777_s0 + $0xc] sm:$0x3]  ;;  %v35_v14 = vld [vmem:[%s1777_s0 + $0xe] sm:$0x3]  ;;  %v94_v34 = vunpack.c.0.s8 %v93_v27 }
   0x4   :  { %v61_v15 = vcombine.low %v32_v8, %v33_v12  ;;  %v62_v16 = vcombine.low %v34_v13, %v35_v14  ;;  %v1300_v28 = vmov 842150450   ;;  %v1301_v30 = vmov 1414812756   ;;  %v593_v26 = vld [vmem:[%s1778_s3 + $0x28] sm:$0xff]  ;;  %v595_v27 = vld [vmem:[%s1778_s3 + $0x38] sm:$0xff] }
   0x5   :  { %v1382_v17 = vsub.s32 %v48_v11, %v1367_v7  ;;  %v100_v29 = vunpack.c.l.s4 %v1300_v28  ;;  %v107_v31 = vunpack.c.l.s4 %v1301_v30  ;;  %v1302_v32 = vmov 1987475062   ;;  %v592_v30 = vld [vmem:[%s1778_s3 + $0x20] sm:$0xff] }
   0x6   :  { %v114_v33 = vunpack.c.l.s4 %v1302_v32  ;;  %v1391_v38 = vsub.s32 %v94_v34, %v1367_v7  ;;  %vm780_vm10 = vcmask 519170  }
   0x7   :  { %v52_v18 = vrot.slane %v44_v9, %v1382_v17  ;;  %v59_v19 = vrot.slane %v45_v10, %v1382_v17  ;;  %v69_v20 = vrot.slane %v61_v15, %v1382_v17  ;;  %v76_v21 = vrot.slane %v62_v16, %v1382_v17  ;;  %vm1691_vm11 = vmor %vm780_vm10, %vm779_vm9 }
   0x8   :  { %v101_v35 = vunpack.c.0.s8 %v100_v29  ;;  %v108_v36 = vunpack.c.0.s8 %v107_v31  ;;  %v115_v37 = vunpack.c.0.s8 %v114_v33  ;;  %v1166_v29 = vpack.c.bf16 %v595_v27, %v593_v26  ;;  %v594_v31 = vld [vmem:[%s1778_s3 + $0x30] sm:$0xff] }
   0x9   :  { %v60_v22 = vcombine.low %v52_v18, %v59_v19  ;;  %v77_v23 = vcombine.low %v69_v20, %v76_v21  ;;  %v589_v20 = vld [vmem:[%s1778_s3 + $0x8] sm:$0xff]  ;;  %v591_v21 = vld [vmem:[%s1778_s3 + $0x18] sm:$0xff]  ;;  %v1168_v32 = vpack.c.bf16 %v594_v31, %v592_v30 }
   0xa   :  { %v1394_v39 = vsub.s32 %v101_v35, %v1367_v7  ;;  %v1397_v40 = vsub.s32 %v108_v36, %v1367_v7  ;;  %v1400_v41 = vsub.s32 %v115_v37, %v1367_v7  ;;  %v1108_v37 = vld [vmem:[%s1781_s1] ss:$0 sm:$0xff] }
   0xb   :  { %v81_v24 = vsel %vm80_vm0, %v60_v22, 0.0  ;;  %v84_v25 = vsel %vm80_vm0, %v77_v23, 0.0  ;;  %v588_v22 = vld [vmem:[%s1778_s3] sm:$0xff]  ;;  %v1303_v23 = vmov 0.0  }
   0xc   :  { %82 = vadd.xlane.f32.xlu0 %v81_v24  ;;  %718 = vmatprep.mubr.f32.mxu0 %v1303_v23  ;;  %v1162_v24 = vpack.c.bf16 %v591_v21, %v589_v20 }
   0xd   :  { %724 = vmatprep.mubr.f32.mxu1 %v1303_v23 }
   0xe   :  { %1163 = vmatprep.subr.bf16.mxu0 %v1162_v24  ;;  %1182 = vmatprep.subr.bf16.mxu1 %v1162_v24 }
  0x10   :  { %85 = vadd.xlane.f32.xlu0 %v84_v25  ;;  %v590_v25 = vld [vmem:[%s1778_s3 + $0x10] sm:$0xff] }
  0x11   :  { %v1164_v28 = vpack.c.bf16 %v590_v25, %v588_v22 }
  0x13   :  { %1165 = vmatpush1.bf16.msra.mxu0 %v1164_v28  ;;  %1184 = vmatpush1.bf16.msra.mxu1 %v1164_v28 }
  0x14   :  { %1167 = vmatprep.subr.bf16.mxu0 %v1166_v29  ;;  %1183 = vmatprep.subr.bf16.mxu1 %v1166_v29 }
  0x17   :  { %1169 = vmatpush1.bf16.msra.mxu0 %v1168_v32  ;;  %1185 = vmatpush1.bf16.msra.mxu1 %v1168_v32 }
  0x99   :  { %v83_v42 = vpop.xlane.xlu0 %82 }
  0x9a   :  { %v88_v43 = vmul.f32 0.03125, %v83_v42 }
  0x9c   :  { %v98_v44 = vrot.slane %v88_v43, %v1391_v38  ;;  %v105_v45 = vrot.slane %v88_v43, %v1394_v39  ;;  %v112_v46 = vrot.slane %v88_v43, %v1397_v40  ;;  %v119_v47 = vrot.slane %v88_v43, %v1400_v41  ;;  %v1109_v43 = vld [vmem:[%s1782_s2] ss:$0 sm:$0xff] }
  0x9d   :  { %v86_v48 = vpop.xlane.xlu0 %85 }
  0x9e   :  { %v89_v49 = vmul.f32 0.03125, %v86_v48  ;;  %v1406_v50 = vsub.f32 %v28_v1, %v98_v44  ;;  %v1408_v51 = vsub.f32 %v29_v2, %v105_v45  ;;  %v1410_v52 = vsub.f32 %v30_v3, %v112_v46 }
  0x9f   :  { %v1412_v53 = vsub.f32 %v31_v6, %v119_v47  ;;  %v308_v45 = vcombine.high %v1108_v37, %v1108_v37  ;;  %v343_v46 = vcombine.high %v1109_v43, %v1109_v43  ;;  %v315_v47 = vrot.slane %v1108_v37, %v1382_v17 }
  0xa0   :  { %v126_v54 = vrot.slane %v89_v49, %v1391_v38  ;;  %v133_v55 = vrot.slane %v89_v49, %v1394_v39  ;;  %v140_v56 = vrot.slane %v89_v49, %v1397_v40  ;;  %v147_v57 = vrot.slane %v89_v49, %v1400_v41 }
  0xa1   :  { %v164_v58 = vmul.f32 %v1406_v50, %v1406_v50  ;;  %v165_v59 = vmul.f32 %v1408_v51, %v1408_v51  ;;  %v166_v60 = vmul.f32 %v1410_v52, %v1410_v52  ;;  %v167_v61 = vmul.f32 %v1412_v53, %v1412_v53 }
  0xa2   :  { %v1426_v62 = vsub.f32 %v32_v8, %v126_v54  ;;  %v1428_v63 = vsub.f32 %v33_v12, %v133_v55  ;;  %v1430_v0 = vsub.f32 %v34_v13, %v140_v56  ;;  %v1432_v1 = vsub.f32 %v35_v14, %v147_v57 }
  0xa3   :  { %v180_v2 = vcombine.low %v164_v58, %v165_v59  ;;  %v181_v3 = vcombine.low %v166_v60, %v167_v61  ;;  %v322_v48 = vrot.slane %v308_v45, %v1382_v17  ;;  %v350_v49 = vrot.slane %v1109_v43, %v1382_v17 }
  0xa4   :  { %v168_v4 = vmul.f32 %v1426_v62, %v1426_v62  ;;  %v169_v5 = vmul.f32 %v1428_v63, %v1428_v63  ;;  %v170_v6 = vmul.f32 %v1430_v0, %v1430_v0  ;;  %v171_v8 = vmul.f32 %v1432_v1, %v1432_v1 }
  0xa5   :  { %v188_v9 = vrot.slane %v180_v2, %v1382_v17  ;;  %v195_v10 = vrot.slane %v181_v3, %v1382_v17  ;;  %v357_v54 = vrot.slane %v343_v46, %v1382_v17  ;;  %v323_v56 = vcombine.high %v315_v47, %v315_v47 }
  0xa6   :  { %v197_v11 = vcombine.low %v168_v4, %v169_v5  ;;  %v198_v12 = vcombine.low %v170_v6, %v171_v8  ;;  %v324_v57 = vcombine.high %v322_v48, %v322_v48  ;;  %v358_v2 = vcombine.high %v350_v49, %v350_v49 }
  0xa7   :  { %v196_v13 = vcombine.low %v188_v9, %v195_v10  ;;  %v359_v3 = vcombine.high %v357_v54, %v357_v54 }
  0xa8   :  { %v205_v14 = vrot.slane %v197_v11, %v1382_v17  ;;  %v212_v15 = vrot.slane %v198_v12, %v1382_v17 }
  0xa9   :  { %v216_v16 = vsel %vm80_vm0, %v196_v13, 0.0 }
  0xaa   :  { %217 = vadd.xlane.f32.xlu1 %v216_v16  ;;  %v213_v18 = vcombine.low %v205_v14, %v212_v15 }
  0xac   :  { %v219_v19 = vsel %vm80_vm0, %v213_v18, 0.0 }
  0xae   :  { %220 = vadd.xlane.f32.xlu1 %v219_v19 }
 0x137   :  { %v218_v33 = vpop.xlane.xlu1 %217 }
 0x138   :  { %v222_v34 = vmul.f32 0.03125, %v218_v33 }
 0x13a   :  { %v224_v35 = vadd.f32 1e-05, %v222_v34 }
 0x13b   :  { %v221_v36 = vpop.xlane.xlu1 %220 }
 0x13c   :  { %1222 = vrsqrt.f32 %v224_v35  ;;  %v223_v42 = vmul.f32 0.03125, %v221_v36 }
 0x13e   :  { %v225_v44 = vadd.f32 1e-05, %v223_v42 }
 0x140   :  { %1224 = vrsqrt.f32 %v225_v44 }
 0x146   :  { %v1223_v55 = vpop.eup %1222 }
 0x147   :  { %v236_v58 = vrot.slane %v1223_v55, %v1391_v38  ;;  %v243_v59 = vrot.slane %v1223_v55, %v1394_v39  ;;  %v250_v60 = vrot.slane %v1223_v55, %v1397_v40  ;;  %v257_v61 = vrot.slane %v1223_v55, %v1400_v41 }
 0x149   :  { %v294_v4 = vmul.f32 %v236_v58, %v1406_v50  ;;  %v295_v5 = vmul.f32 %v243_v59, %v1408_v51  ;;  %v296_v6 = vmul.f32 %v250_v60, %v1410_v52  ;;  %v297_v8 = vmul.f32 %v257_v61, %v1412_v53 }
 0x14a   :  { %v1225_v9 = vpop.eup %1224 }
 0x14b   :  { %v329_v10 = vmul.f32 %v315_v47, %v294_v4  ;;  %v330_v11 = vmul.f32 %v323_v56, %v295_v5  ;;  %v331_v12 = vmul.f32 %v322_v48, %v296_v6  ;;  %v332_v13 = vmul.f32 %v324_v57, %v297_v8 }
 0x14c   :  { %v264_v14 = vrot.slane %v1225_v9, %v1391_v38  ;;  %v271_v15 = vrot.slane %v1225_v9, %v1394_v39  ;;  %v278_v16 = vrot.slane %v1225_v9, %v1397_v40  ;;  %v285_v52 = vrot.slane %v1225_v9, %v1400_v41 }
 0x14d   :  { %v364_v18 = vadd.f32 %v350_v49, %v329_v10  ;;  %v365_v19 = vadd.f32 %v358_v2, %v330_v11  ;;  %v1493_v50 = vadd.f32 %v357_v54, %v331_v12  ;;  %v1495_v51 = vadd.f32 %v359_v3, %v332_v13 }
 0x14e   :  { %v298_v53 = vmul.f32 %v264_v14, %v1426_v62  ;;  %v299_v20 = vmul.f32 %v271_v15, %v1428_v63  ;;  %v300_v39 = vmul.f32 %v278_v16, %v1430_v0  ;;  %v301_v63 = vmul.f32 %v285_v52, %v1432_v1 }
 0x14f   :  { %v1500_v21 = vmul.f32 0.70710677, %v364_v18  ;;  %v1502_v22 = vmul.f32 0.70710677, %v365_v19  ;;  %v1505_v38 = vmul.f32 0.70710677, %v1493_v50 }
 0x150   :  { %v1509_v40 = vmul.f32 0.70710677, %v1495_v51  ;;  %v333_v25 = vmul.f32 %v315_v47, %v298_v53  ;;  %v334_v26 = vmul.f32 %v323_v56, %v299_v20  ;;  %v335_v30 = vmul.f32 %v322_v48, %v300_v39 }
 0x151   :  { %v388_v23 = vand.u32 2147483647, %v1500_v21  ;;  %v389_v41 = vand.u32 2147483647, %v1502_v22  ;;  %v390_v62 = vand.u32 2147483647, %v1505_v38  ;;  %v336_v34 = vmul.f32 %v324_v57, %v301_v63 }
 0x152   :  { %v391_v24 = vand.u32 2147483647, %v1509_v40  ;;  %v1516_v36 = vadd.f32 %v350_v49, %v333_v25  ;;  %v1518_v37 = vadd.f32 %v358_v2, %v334_v26  ;;  %v1520_v1 = vadd.f32 %v357_v54, %v335_v30 }
 0x153   :  { %v396_v27 = vmul.f32 0.3275911, %v388_v23  ;;  %v397_v28 = vmul.f32 0.3275911, %v389_v41  ;;  %v398_v29 = vmul.f32 0.3275911, %v390_v62  ;;  %v1522_v44 = vadd.f32 %v359_v3, %v336_v34 }
 0x154   :  { %v399_v0 = vmul.f32 0.3275911, %v391_v24  ;;  %v500_v42 = vsub.f32 0.0, %v388_v23  ;;  %v501_v43 = vsub.f32 0.0, %v389_v41  ;;  %v502_v45 = vsub.f32 0.0, %v390_v62 }
 0x155   :  { %v404_v31 = vadd.f32 1.0, %v396_v27  ;;  %v405_v32 = vadd.f32 1.0, %v397_v28  ;;  %v406_v33 = vadd.f32 1.0, %v398_v29  ;;  %v1525_v46 = vmul.f32 0.70710677, %v1516_v36 }
 0x156   :  { %v407_v35 = vadd.f32 1.0, %v399_v0  ;;  %v503_v47 = vsub.f32 0.0, %v391_v24  ;;  %v1528_v48 = vmul.f32 0.70710677, %v1518_v37  ;;  %v1531_v49 = vmul.f32 0.70710677, %v1520_v1 }
 0x157   :  { %1226 = vrcp.f32 %v404_v31  ;;  %v508_v54 = vmul.f32 %v500_v42, %v388_v23  ;;  %v1534_v55 = vmul.f32 0.70710677, %v1522_v44  ;;  %v392_v56 = vand.u32 2147483647, %v1525_v46 }
 0x158   :  { %1228 = vrcp.f32 %v405_v32  ;;  %v1537_v57 = vmul.f32 0.5, %v364_v18  ;;  %v509_v58 = vmul.f32 %v501_v43, %v389_v41  ;;  %v393_v59 = vand.u32 2147483647, %v1528_v48 }
 0x159   :  { %1230 = vrcp.f32 %v406_v33  ;;  %v394_v60 = vand.u32 2147483647, %v1531_v49  ;;  %v1541_v61 = vmul.f32 0.5, %v365_v19  ;;  %v510_v2 = vmul.f32 %v502_v45, %v390_v62 }
 0x15a   :  { %1232 = vrcp.f32 %v407_v35  ;;  %v395_v3 = vand.u32 2147483647, %v1534_v55  ;;  %v400_v4 = vmul.f32 0.3275911, %v392_v56  ;;  %v511_v5 = vmul.f32 %v503_v47, %v391_v24 }
 0x15b   :  { %v401_v6 = vmul.f32 0.3275911, %v393_v59  ;;  %v402_v8 = vmul.f32 0.3275911, %v394_v60  ;;  %v504_v9 = vsub.f32 0.0, %v392_v56  ;;  %v505_v13 = vsub.f32 0.0, %v393_v59 }
 0x15c   :  { %v516_v10 = vmul.f32 1.442695, %v508_v54  ;;  %v403_v11 = vmul.f32 0.3275911, %v395_v3  ;;  %v408_v12 = vadd.f32 1.0, %v400_v4  ;;  %v506_v52 = vsub.f32 0.0, %v394_v60 }
 0x15d   :  { %v518_v15 = vmul.f32 1.442695, %v509_v58  ;;  %v409_v16 = vadd.f32 1.0, %v401_v6  ;;  %v410_v18 = vadd.f32 1.0, %v402_v8  ;;  %v507_v39 = vsub.f32 0.0, %v395_v3 }
 0x15e   :  { %v411_v20 = vadd.f32 1.0, %v403_v11  ;;  %1234 = vrcp.f32 %v408_v12  ;;  %v520_v62 = vmul.f32 1.442695, %v510_v2  ;;  %v512_v63 = vmul.f32 %v504_v9, %v392_v56 }
 0x15f   :  { %1236 = vrcp.f32 %v409_v16  ;;  %v513_v27 = vmul.f32 %v505_v13, %v393_v59  ;;  %v514_v30 = vmul.f32 %v506_v52, %v394_v60  ;;  %v522_v32 = vmul.f32 1.442695, %v511_v5 }
 0x160   :  { %1238 = vrcp.f32 %v410_v18  ;;  %v515_v33 = vmul.f32 %v507_v39, %v395_v3  ;;  %v524_v42 = vmul.f32 1.442695, %v512_v63  ;;  %v1562_v3 = vmul.f32 0.5, %v1493_v50 }
 0x161   :  { %v1544_v14 = vpop.eup %1226  ;;  %1240 = vrcp.f32 %v411_v20  ;;  %v526_v47 = vmul.f32 1.442695, %v513_v27  ;;  %v528_v58 = vmul.f32 1.442695, %v514_v30  ;;  %v1568_v8 = vmul.f32 0.5, %v1495_v51 }
 0x162   :  { %v1546_v19 = vpop.eup %1228  ;;  %v428_v53 = vmul.f32 1.0614054, %v1544_v14  ;;  %1242 = vpow2.f32 %v516_v10  ;;  %v530_v2 = vmul.f32 1.442695, %v515_v33  ;;  %vm548_vm1 = vcmp.ge.f32.partialorder %v1500_v21, 0.0 }
 0x163   :  { %v1549_v23 = vpop.eup %1230  ;;  %v429_v41 = vmul.f32 1.0614054, %v1546_v19  ;;  %1244 = vpow2.f32 %v518_v15  ;;  %vm549_vm2 = vcmp.ge.f32.partialorder %v1502_v22, 0.0  ;;  %vm550_vm3 = vcmp.ge.f32.partialorder %v1505_v38, 0.0 }
 0x164   :  { %v1552_v24 = vpop.eup %1232  ;;  %v430_v25 = vmul.f32 1.0614054, %v1549_v23  ;;  %v436_v26 = vadd.f32 -1.4531521, %v428_v53  ;;  %1246 = vpow2.f32 %v520_v62  ;;  %vm551_vm4 = vcmp.ge.f32.partialorder %v1509_v40, 0.0 }
 0x165   :  { %v431_v28 = vmul.f32 1.0614054, %v1552_v24  ;;  %v437_v29 = vadd.f32 -1.4531521, %v429_v41  ;;  %1248 = vpow2.f32 %v522_v32  ;;  %vm552_vm5 = vcmp.ge.f32.partialorder %v1525_v46, 0.0 }
 0x166   :  { %v438_v0 = vadd.f32 -1.4531521, %v430_v25  ;;  %v444_v31 = vmul.f32 %v1544_v14, %v436_v26  ;;  %1250 = vpow2.f32 %v524_v42  ;;  %vm553_vm6 = vcmp.ge.f32.partialorder %v1528_v48, 0.0 }
 0x167   :  { %v439_v34 = vadd.f32 -1.4531521, %v431_v28  ;;  %v445_v35 = vmul.f32 %v1546_v19, %v437_v29  ;;  %1252 = vpow2.f32 %v526_v47  ;;  %vm554_vm7 = vcmp.ge.f32.partialorder %v1531_v49, 0.0 }
 0x168   :  { %v446_v43 = vmul.f32 %v1549_v23, %v438_v0  ;;  %v452_v45 = vadd.f32 1.4214138, %v444_v31  ;;  %v1565_v6 = vpop.eup %1234  ;;  %1254 = vpow2.f32 %v528_v58  ;;  %vm555_vm8 = vcmp.ge.f32.partialorder %v1534_v55, 0.0 }
 0x169   :  { %v447_v54 = vmul.f32 %v1552_v24, %v439_v34  ;;  %v453_v56 = vadd.f32 1.4214138, %v445_v35  ;;  %v1571_v11 = vpop.eup %1236  ;;  %v432_v50 = vmul.f32 1.0614054, %v1565_v6  ;;  %1256 = vpow2.f32 %v530_v2 }
 0x16a   :  { %v454_v59 = vadd.f32 1.4214138, %v446_v43  ;;  %v460_v60 = vmul.f32 %v1544_v14, %v452_v45  ;;  %v1575_v15 = vpop.eup %1238  ;;  %v433_v51 = vmul.f32 1.0614054, %v1571_v11  ;;  %v378_v46 = vmul.f32 0.5, %v1520_v1  ;;  %v1639_v1 = vld [vmem:[%s1783_s4] sm:$0xff] }
 0x16b   :  { %v455_v4 = vadd.f32 1.4214138, %v447_v54  ;;  %v461_v5 = vmul.f32 %v1546_v19, %v453_v56  ;;  %v1579_v52 = vpop.eup %1240  ;;  %v434_v39 = vmul.f32 1.0614054, %v1575_v15  ;;  %v440_v41 = vadd.f32 -1.4531521, %v432_v50 }
 0x16c   :  { %v462_v9 = vmul.f32 %v1549_v23, %v454_v59  ;;  %v468_v10 = vadd.f32 -0.28449672, %v460_v60  ;;  %v435_v25 = vmul.f32 1.0614054, %v1579_v52  ;;  %v441_v26 = vadd.f32 -1.4531521, %v433_v51  ;;  %v1243_v27 = vpop.eup %1242 }
 0x16d   :  { %v463_v12 = vmul.f32 %v1552_v24, %v455_v4  ;;  %v469_v13 = vadd.f32 -0.28449672, %v461_v5  ;;  %v442_v30 = vadd.f32 -1.4531521, %v434_v39  ;;  %v448_v0 = vmul.f32 %v1565_v6, %v440_v41  ;;  %v1245_v31 = vpop.eup %1244 }
 0x16e   :  { %v470_v16 = vadd.f32 -0.28449672, %v462_v9  ;;  %v476_v18 = vmul.f32 %v1544_v14, %v468_v10  ;;  %v443_v34 = vadd.f32 -1.4531521, %v435_v25  ;;  %v449_v35 = vmul.f32 %v1571_v11, %v441_v26  ;;  %v1247_v42 = vpop.eup %1246 }
 0x16f   :  { %v471_v53 = vadd.f32 -0.28449672, %v463_v12  ;;  %v477_v20 = vmul.f32 %v1546_v19, %v469_v13  ;;  %v450_v47 = vmul.f32 %v1575_v15, %v442_v30  ;;  %v456_v54 = vadd.f32 1.4214138, %v448_v0  ;;  %v1249_v56 = vpop.eup %1248 }
 0x170   :  { %v478_v62 = vmul.f32 %v1549_v23, %v470_v16  ;;  %v484_v63 = vadd.f32 0.2548296, %v476_v18  ;;  %v457_v60 = vadd.f32 1.4214138, %v449_v35  ;;  %v1251_v2 = vpop.eup %1250 }
 0x171   :  { %v479_v28 = vmul.f32 %v1552_v24, %v471_v53  ;;  %v485_v29 = vadd.f32 0.2548296, %v477_v20  ;;  %v458_v9 = vadd.f32 1.4214138, %v450_v47  ;;  %v1253_v10 = vpop.eup %1252 }
 0x172   :  { %v486_v32 = vadd.f32 0.2548296, %v478_v62  ;;  %v492_v33 = vmul.f32 %v1544_v14, %v484_v63  ;;  %v451_v14 = vmul.f32 %v1579_v52, %v443_v34  ;;  %v465_v16 = vmul.f32 %v1571_v11, %v457_v60 }
 0x173   :  { %v487_v43 = vadd.f32 0.2548296, %v479_v28  ;;  %v493_v45 = vmul.f32 %v1546_v19, %v485_v29  ;;  %v464_v19 = vmul.f32 %v1565_v6, %v456_v54  ;;  %v466_v53 = vmul.f32 %v1575_v15, %v458_v9 }
 0x174   :  { %v494_v58 = vmul.f32 %v1549_v23, %v486_v32  ;;  %v532_v59 = vmul.f32 %v1243_v27, %v492_v33  ;;  %v459_v50 = vadd.f32 1.4214138, %v451_v14  ;;  %v1255_v23 = vpop.eup %1254  ;;  %v473_v63 = vadd.f32 -0.28449672, %v465_v16 }
 0x175   :  { %v495_v4 = vmul.f32 %v1552_v24, %v487_v43  ;;  %v533_v5 = vmul.f32 %v1245_v31, %v493_v45  ;;  %v472_v20 = vadd.f32 -0.28449672, %v464_v19  ;;  %v1257_v39 = vpop.eup %1256  ;;  %v474_v27 = vadd.f32 -0.28449672, %v466_v53 }
 0x176   :  { %v534_v12 = vmul.f32 %v1247_v42, %v494_v58  ;;  %v540_v13 = vsub.f32 1.0, %v532_v59  ;;  %v467_v24 = vmul.f32 %v1579_v52, %v459_v50  ;;  %v481_v31 = vmul.f32 %v1571_v11, %v473_v63 }
 0x177   :  { %v535_v18 = vmul.f32 %v1249_v56, %v495_v4  ;;  %v541_v51 = vsub.f32 1.0, %v533_v5  ;;  %v480_v28 = vmul.f32 %v1565_v6, %v472_v20  ;;  %v482_v35 = vmul.f32 %v1575_v15, %v474_v27 }
 0x178   :  { %v542_v41 = vsub.f32 1.0, %v534_v12  ;;  %v556_v62 = vsub.f32 0.0, %v540_v13  ;;  %v475_v0 = vadd.f32 -0.28449672, %v467_v24  ;;  %v489_v58 = vadd.f32 0.2548296, %v481_v31 }
 0x179   :  { %v543_v25 = vsub.f32 1.0, %v535_v18  ;;  %v557_v26 = vsub.f32 0.0, %v541_v51  ;;  %v488_v47 = vadd.f32 0.2548296, %v480_v28  ;;  %v490_v14 = vadd.f32 0.2548296, %v482_v35 }
 0x17a   :  { %v558_v29 = vsub.f32 0.0, %v542_v41  ;;  %v564_v30 = vsel %vm548_vm1, %v540_v13, %v556_v62  ;;  %v483_v45 = vmul.f32 %v1579_v52, %v475_v0  ;;  %v497_v5 = vmul.f32 %v1571_v11, %v489_v58  ;;  %v1664_v35 = vld [vmem:[%s1783_s4 + $0x28] sm:$0xff] }
 0x17b   :  { %v559_v32 = vsub.f32 0.0, %v543_v25  ;;  %v565_v33 = vsel %vm549_vm2, %v541_v51, %v557_v26  ;;  %v572_v34 = vadd.f32 1.0, %v564_v30  ;;  %v496_v38 = vmul.f32 %v1565_v6, %v488_v47  ;;  %v1684_v47 = vld [vmem:[%s1784_s6 + $0x1] ss:$0 sm:$0xff] }
 0x17c   :  { %v566_v42 = vsel %vm550_vm3, %v542_v41, %v558_v29  ;;  %v573_v43 = vadd.f32 1.0, %v565_v33  ;;  %v491_v60 = vadd.f32 0.2548296, %v483_v45  ;;  %v498_v40 = vmul.f32 %v1575_v15, %v490_v14  ;;  %v1654_v33 = vld [vmem:[%s1783_s4 + $0x18] sm:$0xff]  ;;  %v1679_v45 = vld [vmem:[%s1784_s6] ss:$0 sm:$0xff] }
 0x17d   :  { %v567_v21 = vsel %vm551_vm4, %v543_v25, %v559_v32  ;;  %v574_v54 = vadd.f32 1.0, %v566_v42  ;;  %v580_v56 = vmul.f32 %v572_v34, %v1537_v57  ;;  %v536_v57 = vmul.f32 %v1251_v2, %v496_v38  ;;  %v1649_v32 = vld [vmem:[%s1783_s4 + $0x10] sm:$0xff]  ;;  %v1659_v34 = vld [vmem:[%s1783_s4 + $0x20] sm:$0xff] }
 0x17e   :  { %v575_v59 = vadd.f32 1.0, %v567_v21  ;;  %v581_v22 = vmul.f32 %v573_v43, %v1541_v61  ;;  %v499_v12 = vmul.f32 %v1579_v52, %v491_v60  ;;  %v537_v13 = vmul.f32 %v1253_v10, %v497_v5  ;;  %v1669_v42 = vld [vmem:[%s1783_s4 + $0x30] sm:$0xff]  ;;  %v1674_v43 = vld [vmem:[%s1783_s4 + $0x38] sm:$0xff] }
 0x17f   :  { %v582_v4 = vmul.f32 %v574_v54, %v1562_v3  ;;  %v538_v16 = vmul.f32 %v1255_v23, %v498_v40  ;;  %v544_v51 = vsub.f32 1.0, %v536_v57  ;;  %v376_v11 = vmul.f32 0.5, %v1516_v36  ;;  %v596_v54 = vld [vmem:[%s1785_s5] sm:$0x3] }
 0x180   :  { %v583_v9 = vmul.f32 %v575_v59, %v1568_v8  ;;  %v616_v19 = vcombine.low %v580_v56, %v581_v22  ;;  %v539_v18 = vmul.f32 %v1257_v39, %v499_v12  ;;  %v545_v3 = vsub.f32 1.0, %v537_v13 }
 0x181   :  { %v546_v53 = vsub.f32 1.0, %v538_v16  ;;  %v377_v20 = vmul.f32 0.5, %v1518_v37  ;;  %v560_v15 = vsub.f32 0.0, %v544_v51  ;;  %v379_v63 = vmul.f32 0.5, %v1522_v44  ;;  %v1644_v44 = vld [vmem:[%s1783_s4 + $0x8] sm:$0xff]  ;;  %s1719_s4 = smov 0  }
 0x182   :  { %v617_v50 = vcombine.low %v582_v4, %v583_v9  ;;  %v624_v61 = vrot.slane %v616_v19, %v1382_v17  ;;  %v547_v8 = vsub.f32 1.0, %v539_v18  ;;  %v561_v52 = vsub.f32 0.0, %v545_v3 }
 0x183   :  { %v562_v10 = vsub.f32 0.0, %v546_v53  ;;  %v568_v39 = vsel %vm552_vm5, %v544_v51, %v560_v15  ;;  %v600_v21 = vsub.s32 0, %v1367_v7  ;;  %v604_v56 = vsub.s32 1, %v1367_v7 }
 0x184   :  { %v631_v6 = vrot.slane %v617_v50, %v1382_v17  ;;  %v563_v23 = vsub.f32 0.0, %v547_v8  ;;  %v569_v41 = vsel %vm553_vm6, %v545_v3, %v561_v52  ;;  %v576_v37 = vadd.f32 1.0, %v568_v39 }
 0x185   :  { %v570_v36 = vsel %vm554_vm7, %v546_v53, %v562_v10  ;;  %v577_v24 = vadd.f32 1.0, %v569_v41  ;;  %v601_v58 = vrot.slane %v596_v54, %v600_v21  ;;  %v605_v59 = vrot.slane %v596_v54, %v604_v56 }
 0x186   :  { %v632_v2 = vcombine.low %v624_v61, %v631_v6  ;;  %v571_v62 = vsel %vm555_vm8, %v547_v8, %v563_v23  ;;  %v578_v25 = vadd.f32 1.0, %v570_v36  ;;  %v584_v26 = vmul.f32 %v576_v37, %v376_v11 }
 0x187   :  { %v579_v48 = vadd.f32 1.0, %v571_v62  ;;  %v585_v27 = vmul.f32 %v577_v24, %v377_v20  ;;  %v1715_v53 = vmov 0.0   ;;  %v1717_v8 = vmov 0.0  }
 0x188   :  { %1110 = vmatmul.mubr.msk.f32.vlgmr.msra.gmra.mrb[0].mxu0 %vm80_vm0, %v632_v2  ;;  %v586_v28 = vmul.f32 %v578_v25, %v378_v46 }
 0x189   :  { %v587_v49 = vmul.f32 %v579_v48, %v379_v63  ;;  %v633_v29 = vcombine.low %v584_v26, %v585_v27 }
 0x18b   :  { %v634_v55 = vcombine.low %v586_v28, %v587_v49  ;;  %v641_v30 = vrot.slane %v633_v29, %v1382_v17 }
 0x18d   :  { %v648_v0 = vrot.slane %v634_v55, %v1382_v17 }
 0x18f   :  { %v649_v31 = vcombine.low %v641_v30, %v648_v0 }
 0x191   :  { %1111 = vmatmul.mubr.msk.f32.vlgmr.msra.gmra.mrb[0].mxu1 %vm80_vm0, %v649_v31 }
 0x25b   :  { %v720_v22 = vpop.f32.mrb[0].mxu0 }
 0x25c   :  { %v721_v14 = vadd.f32 %v720_v22, %v601_v58  ;;  %v722_v60 = vpop.f32.mrb[1].mxu0 }
 0x25d   :  { %v723_v4 = vadd.f32 %v722_v60, %v605_v59 }
 0x25f   :  { %v735_v38 = vcombine.low %v721_v14, %v723_v4  ;;  %v736_v5 = vcombine.high %v721_v14, %v723_v4 }
 0x261   :  { %v743_v19 = vrot.slane %v735_v38, %v1382_v17  ;;  %v750_v40 = vrot.slane %v736_v5, %v1382_v17 }
 0x263   :  { %v751_v12 = vcombine.high %v743_v19, %v743_v19  ;;  %v752_v7 = vcombine.high %v750_v40, %v750_v40  ;;  %782 = vst.msk [vmem:[#allocation2] sm:$0xf] %vm1691_vm11, %v743_v19  ;;  %784 = vst.msk [vmem:[#allocation2 + $0x8] sm:$0xf] %vm1691_vm11, %v750_v40 }
 0x264   :  { %v726_v57 = vpop.f32.mrb[0].mxu1 }
 0x265   :  { %783 = vst.msk [vmem:[#allocation2 + $0x4] sm:$0xf] %vm1691_vm11, %v751_v12  ;;  %785 = vst.msk [vmem:[#allocation2 + $0xc] sm:$0xf] %vm1691_vm11, %v752_v7  ;;  %v727_v13 = vadd.f32 %v726_v57, %v601_v58  ;;  %v728_v50 = vpop.f32.mrb[1].mxu1 }
 0x266   :  { %v729_v61 = vadd.f32 %v728_v50, %v605_v59 }
 0x268   :  { %v753_v16 = vcombine.low %v727_v13, %v729_v61  ;;  %v754_v18 = vcombine.high %v727_v13, %v729_v61 }
 0x26a   :  { %v761_v51 = vrot.slane %v753_v16, %v1382_v17  ;;  %v768_v3 = vrot.slane %v754_v18, %v1382_v17 }
 0x26c   :  { %v769_v6 = vcombine.high %v761_v51, %v761_v51  ;;  %v770_v11 = vcombine.high %v768_v3, %v768_v3  ;;  %786 = vst.msk [vmem:[#allocation2 + $0x10] sm:$0xf] %vm1691_vm11, %v761_v51  ;;  %788 = vst.msk [vmem:[#allocation2 + $0x18] sm:$0xf] %vm1691_vm11, %v768_v3 }
 0x26e   :  { %787 = vst.msk [vmem:[#allocation2 + $0x14] sm:$0xf] %vm1691_vm11, %v769_v6  ;;  %789 = vst.msk [vmem:[#allocation2 + $0x1c] sm:$0xf] %vm1691_vm11, %v770_v11 }
 0x26f LB: > { %v1171_v20 = vpack.c.bf16 %v1644_v44, %v1639_v1  ;;  %v1304_v15 = vmov 0.0|0.0   ;;  %v1177_v52 = vpack.c.bf16 %v1664_v35, %v1659_v34  ;;  %v832_v2 = vrot.slane %v1292_v8, %v1382_v17  ;;  %s1307_s5 = smov 96   ;;  %s1308_s6 = smov 64   ;;  %s1296_s4 = sphi %s1719_s4, %s807_s4   ;;  %v1292_v8 = vphi %v1717_v8, %v939_v8   ;;  %v1288_v53 = vphi %v1715_v53, %v1064_v53  }
 0x270   : > { %1170 = vmatprep.subr.bf16.mxu0 %v1304_v15  ;;  %1176 = vmatprep.subr.bf16.mxu1 %v1304_v15  ;;  %v1174_v10 = vpack.c.bf16 %v1654_v33, %v1649_v32  ;;  %vm1305_vm12 = vmmov 0   ;;  %v1306_v23 = vmov 0.0   ;;  %v1180_v39 = vpack.c.bf16 %v1674_v43, %v1669_v42  ;;  %s1309_s14 = smov 32   ;;  %s1128_s15 = sshll.u32 %s1296_s4, 2 }
 0x271   : > { %1172 = vmatpush3.bf16.msra.mxu0 %v1171_v20  ;;  %1148 = vmatprep.mubr.msk.f32.mxu0 %vm1305_vm12, %v1306_v23  ;;  %s813_s3 = scalar_lea.vmem [#allocation2], %s1128_s15  ;;  %s810_s16 = ssub.s32 7, %s1296_s4  ;;  %vm1077_vm13 = vcmask 254976  }
 0x272   : > { %1173 = vmatprep.subr.bf16.mxu0 %v1304_v15  ;;  %1178 = vmatpush3.bf16.msra.mxu1 %v1177_v52  ;;  %s1129_s1 = sshll.u32 %s810_s16, 2  ;;  %s1119_s17 = sshll.u32 %s810_s16, 1 }
 0x273   : > { %833 = vrot.lane.b32.xlu0 %v832_v2, %s1307_s5  ;;  %1179 = vmatprep.subr.bf16.mxu1 %v1304_v15  ;;  %s817_s2 = scalar_lea.vmem [#allocation2], %s1129_s1  ;;  %s1079_s20 = scalar_lea.vmem %s1780_s8, %s1119_s17 }
 0x274   : > { %1159 = vmatprep.mubr.msk.f32.mxu1 %vm1305_vm12, %v1306_v23  ;;  %s1117_s0 = sshll.u32 %s1296_s4, 1  ;;  %s807_s4 = sadd.s32 1, %s1296_s4  }
 0x275   : > { %1175 = vmatpush3.bf16.msra.mxu0 %v1174_v10  ;;  %v814_v26 = vld [vmem:[%s813_s3] sm:$0xf]  ;;  %s1076_s23 = scalar_lea.vmem %s1779_s7, %s1117_s0  ;;  %p804_p0 = scmp.ge.s32.totalorder %s807_s4, 8  }
 0x276   : > { %1181 = vmatpush3.bf16.msra.mxu1 %v1180_v39  ;;  %v818_v55 = vld [vmem:[%s817_s2] sm:$0xf] }
 0x277   : > { %v1038_v9 = vrot.slane %v818_v55, 2 }
 0x279   : > { %1160 = vmatmul.mubr.msk.f32.vlgmr.msra.gmra.mrb[0].mxu1 %vm80_vm0, %v1288_v53 }
 0x2e5   : > { %v834_v41 = vpop.permute.xlu0 %833 }
 0x2e6   : > { %1149 = vmatmul.mubr.msk.f32.vlgmr.msra.gmra.mrb[0].mxu0 %vm80_vm0, %v834_v41 }
 0x34c   : > { %v1015_v36 = vpop.f32.mrb[0].mxu1 }
 0x34d   : > { %v1161_v62 = vpop.f32.mrb[1].mxu1  ;;  %v1016_v25 = vadd.f32 %v1684_v47, %v1015_v36 }
 0x34f   : > { %v1026_v48 = vrot.slane %v1016_v25, %v1382_v17 }
 0x3b9   : > { %v903_v37 = vpop.f32.mrb[0].mxu0 }
 0x3ba   : > { %v904_v24 = vadd.f32 %v1679_v45, %v903_v37  ;;  %v1150_v46 = vpop.f32.mrb[1].mxu0 }
 0x3bc   : > { %v921_v63 = vrot.slane %v904_v24, %v1382_v17  ;;  %v907_v27 = vadd.f32 %v904_v24, %v814_v26 }
 0x3be   : > { %922 = vrot.lane.b32.xlu0 %v921_v63, %s1308_s6  ;;  %v1123_v28 = vmul.f32 -1.442695, %v907_v27 }
 0x3c0   : > { %1258 = vpow2.f32 %v1123_v28 }
 0x3c2   : > { %1047 = vrot.lane.b32.xlu0 %v1026_v48, %s1309_s14 }
 0x3c6   : > { %1051 = vrot.lane.b32.xlu0 %v818_v55, %s1307_s5 }
 0x3ca   : > { %v1259_v49 = vpop.eup %1258 }
 0x3cb   : > { %v911_v29 = vadd.f32 1.0, %v1259_v49 }
 0x3cd   : > { %1260 = vrcp.f32 %v911_v29 }
 0x3d7   : > { %v1261_v30 = vpop.eup %1260 }
 0x3d8   : > { %v932_v12 = vsub.f32 1.0, %v1261_v30  ;;  %v938_v57 = vmul.f32 %v1292_v8, %v1261_v30 }
 0x430   : > { %v923_v0 = vpop.permute.xlu0 %922 }
 0x431   : > { %v925_v31 = vmul.f32 %v1261_v30, %v923_v0 }
 0x433   : > { %927 = vrot.lane.b32.xlu1 %v925_v31, %s1308_s6 }
 0x434   : > { %v1048_v4 = vpop.permute.xlu0 %1047 }
 0x437   : > { %1027 = vrot.lane.b32.xlu1 %v1026_v48, %s1307_s5 }
 0x438   : > { %v1052_v16 = vpop.permute.xlu0 %1051 }
 0x439   : > { %v1053_v51 = vrot.slane %v1052_v16, 2 }
 0x4a5   : > { %v928_v21 = vpop.permute.xlu1 %927 }
 0x4a6   : > { %v930_v54 = vadd.f32 %v928_v21, %v814_v26 }
 0x4a8   : > { %1262 = vtanh.f32 %v930_v54 }
 0x4a9   : > { %v1028_v56 = vpop.permute.xlu1 %1027 }
 0x4aa   : > { %v1030_v58 = vadd.f32 %v1028_v56, %v818_v55  ;;  %v1040_v19 = vadd.f32 %v1038_v9, %v1028_v56 }
 0x4ac   : > { %v1126_v59 = vmul.f32 -1.442695, %v1030_v58  ;;  %v1127_v40 = vmul.f32 -1.442695, %v1040_v19 }
 0x4ae   : > { %1264 = vpow2.f32 %v1126_v59 }
 0x4b2   : > { %v1263_v22 = vpop.eup %1262 }
 0x4b3   : > { %934 = vrot.lane.b32.xlu1 %v1263_v22, %s1307_s5 }
 0x4b8   : > { %v1265_v14 = vpop.eup %1264 }
 0x4b9   : > { %v1034_v60 = vadd.f32 1.0, %v1265_v14 }
 0x4bb   : > { %1266 = vrcp.f32 %v1034_v60 }
 0x4bc   : > { %1268 = vpow2.f32 %v1127_v40 }
 0x4c5   : > { %v1267_v38 = vpop.eup %1266 }
 0x4c6   : > { %v1050_v5 = vmul.f32 %v1267_v38, %v1048_v4  ;;  %v1269_v61 = vpop.eup %1268 }
 0x4c7   : > { %v1044_v18 = vadd.f32 1.0, %v1269_v61 }
 0x4c8   : > { %1056 = vrot.lane.b32.xlu1 %v1050_v5, %s1309_s14 }
 0x4c9   : > { %1270 = vrcp.f32 %v1044_v18 }
 0x4d3   : > { %v1271_v11 = vpop.eup %1270 }
 0x4d4   : > { %v1061_v20 = vsub.f32 1.0, %v1271_v11  ;;  %v1063_v2 = vmul.f32 %v1288_v53, %v1271_v11 }
 0x525   : > { %v935_v7 = vpop.permute.xlu1 %934 }
 0x526   : > { %v937_v13 = vmul.f32 %v935_v7, %v932_v12 }
 0x528   : > { %v939_v8 = vadd.f32 %v938_v57, %v937_v13  }
 0x52a   : > { %v1072_v50 = vrot.slane %v939_v8, %v1382_v17 }
 0x52c   : > { %1073 = vrot.lane.b32.xlu0 %v1072_v50, %s1307_s5 }
 0x53a   : > { %v1057_v3 = vpop.permute.xlu1 %1056 }
 0x53b   : > { %v1059_v6 = vadd.f32 %v1057_v3, %v1053_v51 }
 0x53d   : > { %1272 = vtanh.f32 %v1059_v6 }
 0x547   : > { %v1273_v15 = vpop.eup %1272 }
 0x548   : > { %v1062_v52 = vmul.f32 %v1273_v15, %v1061_v20 }
 0x54a   : > { %v1064_v53 = vadd.f32 %v1063_v2, %v1062_v52  }
 0x54c   : > { %1080 = vst.msk [vmem:[%s1079_s20] sm:$0x3] %vm1077_vm13, %v1064_v53 }
 0x599   :  { %806 = sbr.rel (!%p804_p0) target bundleno = 623 (0x26f), region = 69 }
 0x59e   : > { %v1074_v10 = vpop.permute.xlu0 %1073 }
 0x59f   : > { %1078 = vst.msk [vmem:[%s1076_s23] sm:$0x3] %vm1077_vm13, %v1074_v10 }

</bundles_post_ra>
